<compile_context>
chip_gen: v7x
topology: tpu7x:2x2x1
jax: 0.10.0
libtpu: 0.0.40
codegen_flags: <defaults>
</compile_context>

<pallas_src>
import jax
import jax.numpy as jnp
from jax.experimental import pallas as pl
from jax.experimental.pallas import tpu as pltpu

NOISE_DIM = 64
IMAGE_DIM = 784
HIDDEN_DIM = 128
BN_EPS = 1e-5
IMAGE_DIM_PAD = 896          # 7 * 128: lane-dense width for the final output
OUT_TILE = 128               # final-layer column tile width (one lane group)
WEIGHT_DTYPE = jnp.bfloat16  # storage/DMA dtype for the big weight matrices


# ---------------------------------------------------------------------------
# Fused kernel.  grid = (IMAGE_DIM_PAD // OUT_TILE,):
#   step j == 0   : run the four Linear->BN->ReLU blocks, stash h in scratch
#   every step j  : out[:, j*128:(j+1)*128] = sigmoid(h @ w5[:, tile j] + b5)
# ---------------------------------------------------------------------------
def _generator_kernel(x_ref,
                      w1_ref, p1_ref,
                      w2_ref, p2_ref,
                      w3_ref, p3_ref,
                      w4_ref, p4_ref,
                      w5_ref, b5_ref,
                      o_ref,
                      h_ref):
    """x_ref: (B, 64) f32; wN_ref: (K, N) bf16; pN_ref: (2, N) f32 = [gamma; beta];
    w5_ref: (1024, 128) bf16 column tile; b5_ref: (1, 128) f32 tile;
    o_ref: (B, 128) f32 output tile; h_ref: (B, 1024) f32 scratch."""
    j = pl.program_id(0)

    @pl.when(j == 0)
    def _():
        def lin_bn_relu(h, w_ref, p_ref):
            # Linear (bias omitted: exactly cancelled by the BN mean subtraction).
            y = jnp.dot(h, w_ref[...].astype(jnp.float32),
                        preferred_element_type=jnp.float32)
            # BatchNorm1d training-mode: batch mean, biased variance, f32 math.
            mean = jnp.mean(y, axis=0, keepdims=True)
            centered = y - mean
            var = jnp.mean(centered * centered, axis=0, keepdims=True)
            scale = p_ref[0:1, :] * jax.lax.rsqrt(var + BN_EPS)   # gamma folded in
            return jnp.maximum(centered * scale + p_ref[1:2, :], 0.0)  # + beta, ReLU

        h = x_ref[...]
        h = lin_bn_relu(h, w1_ref, p1_ref)
        h = lin_bn_relu(h, w2_ref, p2_ref)
        h = lin_bn_relu(h, w3_ref, p3_ref)
        h = lin_bn_relu(h, w4_ref, p4_ref)
        h_ref[...] = h

    # Final Linear + Sigmoid on this 128-wide column tile.
    y = jnp.dot(h_ref[...], w5_ref[...].astype(jnp.float32),
                preferred_element_type=jnp.float32) + b5_ref[...]
    o_ref[...] = jax.nn.sigmoid(y)   # padded lanes (>=784) hold sigmoid(0)=0.5


# ---------------------------------------------------------------------------
# Wrappers
# ---------------------------------------------------------------------------
def _const_spec(shape):
    """Full-array block with a constant index map: fetched once, stays resident."""
    ndim = len(shape)
    return pl.BlockSpec(shape, lambda j: (0,) * ndim)


@jax.jit
def generator_forward_padded(noise, packed_params):
    """Hot path. noise: (B, 64) f32 -> (B, 896) f32.
    Columns >= 784 are padding (value 0.5) and must be ignored by the consumer."""
    B = noise.shape[0]
    w1, p1, w2, p2, w3, p3, w4, p4, w5p, b5p = packed_params
    n_pad = w5p.shape[1]
    n_tiles = n_pad // OUT_TILE

    grid_spec = pltpu.PrefetchScalarGridSpec(
        num_scalar_prefetch=0,
        grid=(n_tiles,),
        in_specs=[
            _const_spec(noise.shape),
            _const_spec(w1.shape), _const_spec(p1.shape),
            _const_spec(w2.shape), _const_spec(p2.shape),
            _const_spec(w3.shape), _const_spec(p3.shape),
            _const_spec(w4.shape), _const_spec(p4.shape),
            pl.BlockSpec((w5p.shape[0], OUT_TILE), lambda j: (0, j)),  # pipelined
            pl.BlockSpec((1, OUT_TILE), lambda j: (0, j)),
        ],
        out_specs=pl.BlockSpec((B, OUT_TILE), lambda j: (0, j)),
        scratch_shapes=[pltpu.VMEM((B, HIDDEN_DIM * 8), jnp.float32)],
    )
    return pl.pallas_call(
        _generator_kernel,
        out_shape=jax.ShapeDtypeStruct((B, n_pad), jnp.float32),
        grid_spec=grid_spec,
        # "arbitrary": the j==0 step fills the shared h scratch that later steps
        # reuse, so the column-tile axis must execute sequentially on one core.
        # TODO(synk): v7x dual-TC split of the column tiles would need per-core
        # recomputation of h (or CMEM sharing); kept single-core for correctness.
        compiler_params=pltpu.CompilerParams(
            dimension_semantics=("arbitrary",),
        ),
    )(noise, w1, p1, w2, p2, w3, p3, w4, p4, w5p, b5p)


def generator_forward(noise, packed_params):
    """Module-faithful (B, 784) output; adds one XLA slice op outside the kernel."""
    return generator_forward_padded(noise, packed_params)[:, :IMAGE_DIM]


# ---------------------------------------------------------------------------
# Parameters
# ---------------------------------------------------------------------------
def init_params(key):
    """Deterministic PyTorch-Linear-style uniform init; BN gamma=1, beta=0."""
    dims = [
        (NOISE_DIM, HIDDEN_DIM),           # genBlock 1
        (HIDDEN_DIM, HIDDEN_DIM * 2),      # genBlock 2
        (HIDDEN_DIM * 2, HIDDEN_DIM * 4),  # genBlock 3
        (HIDDEN_DIM * 4, HIDDEN_DIM * 8),  # genBlock 4
        (HIDDEN_DIM * 8, IMAGE_DIM),       # final Linear
    ]
    params = []
    for i, (fan_in, fan_out) in enumerate(dims):
        kw, kb, key = jax.random.split(key, 3)
        bound = 1.0 / jnp.sqrt(fan_in)
        w = jax.random.uniform(kw, (fan_in, fan_out), jnp.float32, -bound, bound)
        b = jax.random.uniform(kb, (fan_out,), jnp.float32, -bound, bound)
        if i < 4:
            gamma = jnp.ones((fan_out,), jnp.float32)
            beta = jnp.zeros((fan_out,), jnp.float32)
            params.append((w, b, gamma, beta))
        else:
            params.append((w, b))
    return params


def pack_params(params, weight_dtype=WEIGHT_DTYPE):
    """One-time repack to kernel layout:
    bf16 weights, (2,N) [gamma;beta] stacks (bias dropped: it cancels under BN),
    final layer zero-padded 784 -> 896 for lane-dense stores."""
    packed = []
    for w, _b, gamma, beta in params[:4]:
        packed.append(w.astype(weight_dtype))
        packed.append(jnp.stack([gamma, beta], axis=0).astype(jnp.float32))  # (2, N)
    w5, b5 = params[4]
    pad = IMAGE_DIM_PAD - IMAGE_DIM
    packed.append(jnp.pad(w5, ((0, 0), (0, pad))).astype(weight_dtype))        # (1024, 896)
    packed.append(jnp.pad(b5, (0, pad)).reshape(1, IMAGE_DIM_PAD)
                  .astype(jnp.float32))                                         # (1, 896)
    return tuple(packed)


# ---------------------------------------------------------------------------
# Reference (pure JAX, module semantics with the same bf16-stored weights)
# ---------------------------------------------------------------------------
def generator_ref(noise, params, weight_dtype=WEIGHT_DTYPE):
    x = noise
    for w, b, gamma, beta in params[:4]:
        w = w.astype(weight_dtype).astype(jnp.float32)
        y = x @ w + b                       # bias kept: cancelled by mean subtraction
        mean = jnp.mean(y, axis=0, keepdims=True)
        var = jnp.mean((y - mean) ** 2, axis=0, keepdims=True)
        y = (y - mean) * jax.lax.rsqrt(var + BN_EPS) * gamma + beta
        x = jnp.maximum(y, 0.0)
    w, b = params[4]
    w = w.astype(weight_dtype).astype(jnp.float32)
    return jax.nn.sigmoid(x @ w + b)


if __name__ == "__main__":
    key = jax.random.PRNGKey(0)
    k_noise, k_params = jax.random.split(key)

    batch = 8  # BatchNorm1d training-mode semantics need batch > 1
    noise = jax.random.normal(k_noise, (batch, NOISE_DIM), jnp.float32)
    params = init_params(k_params)
    packed = pack_params(params)

    out_pad = generator_forward_padded(noise, packed)
    out_pad = jax.block_until_ready(out_pad)
    assert out_pad.shape == (batch, IMAGE_DIM_PAD), out_pad.shape

    out = out_pad[:, :IMAGE_DIM]            # trim only for the correctness check
    ref = generator_ref(noise, params)
    max_err = float(jnp.max(jnp.abs(out - ref)))
    assert out.shape == (batch, IMAGE_DIM), out.shape
    assert max_err < 2e-3, max_err
    print("KERNEL_OK")
</pallas_src>

<mosaic_0001>
module attributes {stable_mosaic.version = 11 : i64} {
  func.func @_generator_kernel(%arg0: i32, %arg1: memref<8x64xf32, #tpu.memory_space<vmem>>, %arg2: memref<64x128xbf16, #tpu.memory_space<vmem>>, %arg3: memref<2x128xf32, #tpu.memory_space<vmem>>, %arg4: memref<128x256xbf16, #tpu.memory_space<vmem>>, %arg5: memref<2x256xf32, #tpu.memory_space<vmem>>, %arg6: memref<256x512xbf16, #tpu.memory_space<vmem>>, %arg7: memref<2x512xf32, #tpu.memory_space<vmem>>, %arg8: memref<512x1024xbf16, #tpu.memory_space<vmem>>, %arg9: memref<2x1024xf32, #tpu.memory_space<vmem>>, %arg10: memref<1024x128xbf16, #tpu.memory_space<vmem>>, %arg11: memref<1x128xf32, #tpu.memory_space<vmem>>, %arg12: memref<8x128xf32, #tpu.memory_space<vmem>>, %arg13: memref<8x1024xf32, #tpu.memory_space<vmem>>) attributes {dimension_semantics = [#tpu.dimension_semantics<arbitrary>], iteration_bounds = array<i64: 7>, scalar_prefetch = 0 : i64, scratch_operands = 1 : i64, tpu.core_type = #tpu.core_type<tc>, window_params = [{pipeline_mode = #tpu.pipeline_mode<synchronous>, transform_indices = @transform_0, window_bounds = array<i64: 8, 64>}, {pipeline_mode = #tpu.pipeline_mode<synchronous>, transform_indices = @transform_1, window_bounds = array<i64: 64, 128>}, {pipeline_mode = #tpu.pipeline_mode<synchronous>, transform_indices = @transform_2, window_bounds = array<i64: 2, 128>}, {pipeline_mode = #tpu.pipeline_mode<synchronous>, transform_indices = @transform_3, window_bounds = array<i64: 128, 256>}, {pipeline_mode = #tpu.pipeline_mode<synchronous>, transform_indices = @transform_4, window_bounds = array<i64: 2, 256>}, {pipeline_mode = #tpu.pipeline_mode<synchronous>, transform_indices = @transform_5, window_bounds = array<i64: 256, 512>}, {pipeline_mode = #tpu.pipeline_mode<synchronous>, transform_indices = @transform_6, window_bounds = array<i64: 2, 512>}, {pipeline_mode = #tpu.pipeline_mode<synchronous>, transform_indices = @transform_7, window_bounds = array<i64: 512, 1024>}, {pipeline_mode = #tpu.pipeline_mode<synchronous>, transform_indices = @transform_8, window_bounds = array<i64: 2, 1024>}, {transform_indices = @transform_9, window_bounds = array<i64: 1024, 128>}, {transform_indices = @transform_10, window_bounds = array<i64: 1, 128>}, {transform_indices = @transform_11, window_bounds = array<i64: 8, 128>}]} {
    %c0_i32 = arith.constant 0 : i32
    %0 = arith.cmpi eq, %arg0, %c0_i32 : i32
    %1 = arith.extui %0 : i1 to i32
    %c0_i32_0 = arith.constant 0 : i32
    %2 = arith.cmpi ne, %1, %c0_i32_0 : i32
    scf.if %2 {
      %c0_9 = arith.constant 0 : index
      %c0_10 = arith.constant 0 : index
      %16 = vector.load %arg1[%c0_9, %c0_10] : memref<8x64xf32, #tpu.memory_space<vmem>>, vector<8x64xf32>
      %c0_11 = arith.constant 0 : index
      %c0_12 = arith.constant 0 : index
      %17 = vector.load %arg2[%c0_11, %c0_12] : memref<64x128xbf16, #tpu.memory_space<vmem>>, vector<64x128xbf16>
      %18 = arith.extf %17 : vector<64x128xbf16> to vector<64x128xf32>
      %cst_13 = arith.constant dense<0.000000e+00> : vector<8x128xf32>
      %19 = tpu.matmul %16, %18, %cst_13 {dimension_numbers = #tpu.dot_dimension_numbers<[1], [0], [0], [1], [0, 0, 1, 1], [], []>} : vector<8x64xf32>, vector<64x128xf32>, vector<8x128xf32> -> vector<8x128xf32>
      %cst_14 = arith.constant dense<0.000000e+00> : vector<128xf32>
      %20 = vector.multi_reduction <add>, %19, %cst_14 [0] : vector<8x128xf32> to vector<128xf32>
      %21 = vector.shape_cast %20 : vector<128xf32> to vector<1x128xf32>
      %cst_15 = arith.constant 8.000000e+00 : f32
      %22 = vector.broadcast %cst_15 : f32 to vector<1x128xf32>
      %23 = arith.divf %21, %22 : vector<1x128xf32>
      %24 = vector.broadcast %23 : vector<1x128xf32> to vector<8x128xf32>
      %25 = arith.subf %19, %24 : vector<8x128xf32>
      %26 = arith.mulf %25, %25 : vector<8x128xf32>
      %cst_16 = arith.constant dense<0.000000e+00> : vector<128xf32>
      %27 = vector.multi_reduction <add>, %26, %cst_16 [0] : vector<8x128xf32> to vector<128xf32>
      %28 = vector.shape_cast %27 : vector<128xf32> to vector<1x128xf32>
      %cst_17 = arith.constant 8.000000e+00 : f32
      %29 = vector.broadcast %cst_17 : f32 to vector<1x128xf32>
      %30 = arith.divf %28, %29 : vector<1x128xf32>
      %c0_18 = arith.constant 0 : index
      %c0_19 = arith.constant 0 : index
      %31 = vector.load %arg3[%c0_18, %c0_19] : memref<2x128xf32, #tpu.memory_space<vmem>>, vector<1x128xf32>
      %cst_20 = arith.constant 9.99999974E-6 : f32
      %32 = vector.broadcast %cst_20 : f32 to vector<1x128xf32>
      %33 = arith.addf %30, %32 : vector<1x128xf32>
      %34 = math.rsqrt %33 : vector<1x128xf32>
      %35 = arith.mulf %31, %34 : vector<1x128xf32>
      %36 = vector.broadcast %35 : vector<1x128xf32> to vector<8x128xf32>
      %37 = arith.mulf %25, %36 : vector<8x128xf32>
      %c1 = arith.constant 1 : index
      %c0_21 = arith.constant 0 : index
      %38 = vector.load %arg3[%c1, %c0_21] : memref<2x128xf32, #tpu.memory_space<vmem>>, vector<1x128xf32>
      %39 = vector.broadcast %38 : vector<1x128xf32> to vector<8x128xf32>
      %40 = arith.addf %37, %39 : vector<8x128xf32>
      %cst_22 = arith.constant 0.000000e+00 : f32
      %41 = vector.broadcast %cst_22 : f32 to vector<8x128xf32>
      %42 = arith.maximumf %40, %41 : vector<8x128xf32>
      %c0_23 = arith.constant 0 : index
      %c0_24 = arith.constant 0 : index
      %43 = vector.load %arg4[%c0_23, %c0_24] : memref<128x256xbf16, #tpu.memory_space<vmem>>, vector<128x256xbf16>
      %44 = arith.extf %43 : vector<128x256xbf16> to vector<128x256xf32>
      %cst_25 = arith.constant dense<0.000000e+00> : vector<8x256xf32>
      %45 = tpu.matmul %42, %44, %cst_25 {dimension_numbers = #tpu.dot_dimension_numbers<[1], [0], [0], [1], [0, 0, 1, 1], [], []>} : vector<8x128xf32>, vector<128x256xf32>, vector<8x256xf32> -> vector<8x256xf32>
      %cst_26 = arith.constant dense<0.000000e+00> : vector<256xf32>
      %46 = vector.multi_reduction <add>, %45, %cst_26 [0] : vector<8x256xf32> to vector<256xf32>
      %47 = vector.shape_cast %46 : vector<256xf32> to vector<1x256xf32>
      %cst_27 = arith.constant 8.000000e+00 : f32
      %48 = vector.broadcast %cst_27 : f32 to vector<1x256xf32>
      %49 = arith.divf %47, %48 : vector<1x256xf32>
      %50 = vector.broadcast %49 : vector<1x256xf32> to vector<8x256xf32>
      %51 = arith.subf %45, %50 : vector<8x256xf32>
      %52 = arith.mulf %51, %51 : vector<8x256xf32>
      %cst_28 = arith.constant dense<0.000000e+00> : vector<256xf32>
      %53 = vector.multi_reduction <add>, %52, %cst_28 [0] : vector<8x256xf32> to vector<256xf32>
      %54 = vector.shape_cast %53 : vector<256xf32> to vector<1x256xf32>
      %cst_29 = arith.constant 8.000000e+00 : f32
      %55 = vector.broadcast %cst_29 : f32 to vector<1x256xf32>
      %56 = arith.divf %54, %55 : vector<1x256xf32>
      %c0_30 = arith.constant 0 : index
      %c0_31 = arith.constant 0 : index
      %57 = vector.load %arg5[%c0_30, %c0_31] : memref<2x256xf32, #tpu.memory_space<vmem>>, vector<1x256xf32>
      %cst_32 = arith.constant 9.99999974E-6 : f32
      %58 = vector.broadcast %cst_32 : f32 to vector<1x256xf32>
      %59 = arith.addf %56, %58 : vector<1x256xf32>
      %60 = math.rsqrt %59 : vector<1x256xf32>
      %61 = arith.mulf %57, %60 : vector<1x256xf32>
      %62 = vector.broadcast %61 : vector<1x256xf32> to vector<8x256xf32>
      %63 = arith.mulf %51, %62 : vector<8x256xf32>
      %c1_33 = arith.constant 1 : index
      %c0_34 = arith.constant 0 : index
      %64 = vector.load %arg5[%c1_33, %c0_34] : memref<2x256xf32, #tpu.memory_space<vmem>>, vector<1x256xf32>
      %65 = vector.broadcast %64 : vector<1x256xf32> to vector<8x256xf32>
      %66 = arith.addf %63, %65 : vector<8x256xf32>
      %cst_35 = arith.constant 0.000000e+00 : f32
      %67 = vector.broadcast %cst_35 : f32 to vector<8x256xf32>
      %68 = arith.maximumf %66, %67 : vector<8x256xf32>
      %c0_36 = arith.constant 0 : index
      %c0_37 = arith.constant 0 : index
      %69 = vector.load %arg6[%c0_36, %c0_37] : memref<256x512xbf16, #tpu.memory_space<vmem>>, vector<256x512xbf16>
      %70 = arith.extf %69 : vector<256x512xbf16> to vector<256x512xf32>
      %cst_38 = arith.constant dense<0.000000e+00> : vector<8x512xf32>
      %71 = tpu.matmul %68, %70, %cst_38 {dimension_numbers = #tpu.dot_dimension_numbers<[1], [0], [0], [1], [0, 0, 1, 1], [], []>} : vector<8x256xf32>, vector<256x512xf32>, vector<8x512xf32> -> vector<8x512xf32>
      %cst_39 = arith.constant dense<0.000000e+00> : vector<512xf32>
      %72 = vector.multi_reduction <add>, %71, %cst_39 [0] : vector<8x512xf32> to vector<512xf32>
      %73 = vector.shape_cast %72 : vector<512xf32> to vector<1x512xf32>
      %cst_40 = arith.constant 8.000000e+00 : f32
      %74 = vector.broadcast %cst_40 : f32 to vector<1x512xf32>
      %75 = arith.divf %73, %74 : vector<1x512xf32>
      %76 = vector.broadcast %75 : vector<1x512xf32> to vector<8x512xf32>
      %77 = arith.subf %71, %76 : vector<8x512xf32>
      %78 = arith.mulf %77, %77 : vector<8x512xf32>
      %cst_41 = arith.constant dense<0.000000e+00> : vector<512xf32>
      %79 = vector.multi_reduction <add>, %78, %cst_41 [0] : vector<8x512xf32> to vector<512xf32>
      %80 = vector.shape_cast %79 : vector<512xf32> to vector<1x512xf32>
      %cst_42 = arith.constant 8.000000e+00 : f32
      %81 = vector.broadcast %cst_42 : f32 to vector<1x512xf32>
      %82 = arith.divf %80, %81 : vector<1x512xf32>
      %c0_43 = arith.constant 0 : index
      %c0_44 = arith.constant 0 : index
      %83 = vector.load %arg7[%c0_43, %c0_44] : memref<2x512xf32, #tpu.memory_space<vmem>>, vector<1x512xf32>
      %cst_45 = arith.constant 9.99999974E-6 : f32
      %84 = vector.broadcast %cst_45 : f32 to vector<1x512xf32>
      %85 = arith.addf %82, %84 : vector<1x512xf32>
      %86 = math.rsqrt %85 : vector<1x512xf32>
      %87 = arith.mulf %83, %86 : vector<1x512xf32>
      %88 = vector.broadcast %87 : vector<1x512xf32> to vector<8x512xf32>
      %89 = arith.mulf %77, %88 : vector<8x512xf32>
      %c1_46 = arith.constant 1 : index
      %c0_47 = arith.constant 0 : index
      %90 = vector.load %arg7[%c1_46, %c0_47] : memref<2x512xf32, #tpu.memory_space<vmem>>, vector<1x512xf32>
      %91 = vector.broadcast %90 : vector<1x512xf32> to vector<8x512xf32>
      %92 = arith.addf %89, %91 : vector<8x512xf32>
      %cst_48 = arith.constant 0.000000e+00 : f32
      %93 = vector.broadcast %cst_48 : f32 to vector<8x512xf32>
      %94 = arith.maximumf %92, %93 : vector<8x512xf32>
      %c0_49 = arith.constant 0 : index
      %c0_50 = arith.constant 0 : index
      %95 = vector.load %arg8[%c0_49, %c0_50] : memref<512x1024xbf16, #tpu.memory_space<vmem>>, vector<512x1024xbf16>
      %96 = arith.extf %95 : vector<512x1024xbf16> to vector<512x1024xf32>
      %cst_51 = arith.constant dense<0.000000e+00> : vector<8x1024xf32>
      %97 = tpu.matmul %94, %96, %cst_51 {dimension_numbers = #tpu.dot_dimension_numbers<[1], [0], [0], [1], [0, 0, 1, 1], [], []>} : vector<8x512xf32>, vector<512x1024xf32>, vector<8x1024xf32> -> vector<8x1024xf32>
      %cst_52 = arith.constant dense<0.000000e+00> : vector<1024xf32>
      %98 = vector.multi_reduction <add>, %97, %cst_52 [0] : vector<8x1024xf32> to vector<1024xf32>
      %99 = vector.shape_cast %98 : vector<1024xf32> to vector<1x1024xf32>
      %cst_53 = arith.constant 8.000000e+00 : f32
      %100 = vector.broadcast %cst_53 : f32 to vector<1x1024xf32>
      %101 = arith.divf %99, %100 : vector<1x1024xf32>
      %102 = vector.broadcast %101 : vector<1x1024xf32> to vector<8x1024xf32>
      %103 = arith.subf %97, %102 : vector<8x1024xf32>
      %104 = arith.mulf %103, %103 : vector<8x1024xf32>
      %cst_54 = arith.constant dense<0.000000e+00> : vector<1024xf32>
      %105 = vector.multi_reduction <add>, %104, %cst_54 [0] : vector<8x1024xf32> to vector<1024xf32>
      %106 = vector.shape_cast %105 : vector<1024xf32> to vector<1x1024xf32>
      %cst_55 = arith.constant 8.000000e+00 : f32
      %107 = vector.broadcast %cst_55 : f32 to vector<1x1024xf32>
      %108 = arith.divf %106, %107 : vector<1x1024xf32>
      %c0_56 = arith.constant 0 : index
      %c0_57 = arith.constant 0 : index
      %109 = vector.load %arg9[%c0_56, %c0_57] : memref<2x1024xf32, #tpu.memory_space<vmem>>, vector<1x1024xf32>
      %cst_58 = arith.constant 9.99999974E-6 : f32
      %110 = vector.broadcast %cst_58 : f32 to vector<1x1024xf32>
      %111 = arith.addf %108, %110 : vector<1x1024xf32>
      %112 = math.rsqrt %111 : vector<1x1024xf32>
      %113 = arith.mulf %109, %112 : vector<1x1024xf32>
      %114 = vector.broadcast %113 : vector<1x1024xf32> to vector<8x1024xf32>
      %115 = arith.mulf %103, %114 : vector<8x1024xf32>
      %c1_59 = arith.constant 1 : index
      %c0_60 = arith.constant 0 : index
      %116 = vector.load %arg9[%c1_59, %c0_60] : memref<2x1024xf32, #tpu.memory_space<vmem>>, vector<1x1024xf32>
      %117 = vector.broadcast %116 : vector<1x1024xf32> to vector<8x1024xf32>
      %118 = arith.addf %115, %117 : vector<8x1024xf32>
      %cst_61 = arith.constant 0.000000e+00 : f32
      %119 = vector.broadcast %cst_61 : f32 to vector<8x1024xf32>
      %120 = arith.maximumf %118, %119 : vector<8x1024xf32>
      %c0_62 = arith.constant 0 : index
      %c0_63 = arith.constant 0 : index
      %121 = vector.load %arg13[%c0_62, %c0_63] : memref<8x1024xf32, #tpu.memory_space<vmem>>, vector<8x1024xf32>
      tpu.vector_store %arg13[%c0_62, %c0_63], %120 {strides = array<i32>} : memref<8x1024xf32, #tpu.memory_space<vmem>>, vector<8x1024xf32>,
    } else {
    }
    %c0 = arith.constant 0 : index
    %c0_1 = arith.constant 0 : index
    %3 = vector.load %arg13[%c0, %c0_1] : memref<8x1024xf32, #tpu.memory_space<vmem>>, vector<8x1024xf32>
    %c0_2 = arith.constant 0 : index
    %c0_3 = arith.constant 0 : index
    %4 = vector.load %arg10[%c0_2, %c0_3] : memref<1024x128xbf16, #tpu.memory_space<vmem>>, vector<1024x128xbf16>
    %5 = arith.extf %4 : vector<1024x128xbf16> to vector<1024x128xf32>
    %cst = arith.constant dense<0.000000e+00> : vector<8x128xf32>
    %6 = tpu.matmul %3, %5, %cst {dimension_numbers = #tpu.dot_dimension_numbers<[1], [0], [0], [1], [0, 0, 1, 1], [], []>} : vector<8x1024xf32>, vector<1024x128xf32>, vector<8x128xf32> -> vector<8x128xf32>
    %c0_4 = arith.constant 0 : index
    %c0_5 = arith.constant 0 : index
    %7 = vector.load %arg11[%c0_4, %c0_5] : memref<1x128xf32, #tpu.memory_space<vmem>>, vector<1x128xf32>
    %8 = vector.broadcast %7 : vector<1x128xf32> to vector<8x128xf32>
    %9 = arith.addf %6, %8 : vector<8x128xf32>
    %10 = arith.negf %9 : vector<8x128xf32>
    %11 = math.exp %10 : vector<8x128xf32>
    %cst_6 = arith.constant 1.000000e+00 : f32
    %12 = vector.broadcast %cst_6 : f32 to vector<8x128xf32>
    %13 = arith.addf %12, %11 : vector<8x128xf32>
    %14 = arith.divf %12, %13 : vector<8x128xf32>
    %c0_7 = arith.constant 0 : index
    %c0_8 = arith.constant 0 : index
    %15 = vector.load %arg12[%c0_7, %c0_8] : memref<8x128xf32, #tpu.memory_space<vmem>>, vector<8x128xf32>
    tpu.vector_store %arg12[%c0_7, %c0_8], %14 {strides = array<i32>} : memref<8x128xf32, #tpu.memory_space<vmem>>, vector<8x128xf32>,
    return
  }
  func.func @transform_0(%arg0: i32) -> (i32, i32) {
    %c0_i32 = arith.constant 0 : i32
    %c0_i32_0 = arith.constant 0 : i32
    %c0_i32_1 = arith.constant 0 : i32
    return %c0_i32, %c0_i32_0 : i32, i32
  }
  func.func @transform_1(%arg0: i32) -> (i32, i32) {
    %c0_i32 = arith.constant 0 : i32
    %c0_i32_0 = arith.constant 0 : i32
    %c0_i32_1 = arith.constant 0 : i32
    return %c0_i32, %c0_i32_0 : i32, i32
  }
  func.func @transform_2(%arg0: i32) -> (i32, i32) {
    %c0_i32 = arith.constant 0 : i32
    %c0_i32_0 = arith.constant 0 : i32
    %c0_i32_1 = arith.constant 0 : i32
    return %c0_i32, %c0_i32_0 : i32, i32
  }
  func.func @transform_3(%arg0: i32) -> (i32, i32) {
    %c0_i32 = arith.constant 0 : i32
    %c0_i32_0 = arith.constant 0 : i32
    %c0_i32_1 = arith.constant 0 : i32
    return %c0_i32, %c0_i32_0 : i32, i32
  }
  func.func @transform_4(%arg0: i32) -> (i32, i32) {
    %c0_i32 = arith.constant 0 : i32
    %c0_i32_0 = arith.constant 0 : i32
    %c0_i32_1 = arith.constant 0 : i32
    return %c0_i32, %c0_i32_0 : i32, i32
  }
  func.func @transform_5(%arg0: i32) -> (i32, i32) {
    %c0_i32 = arith.constant 0 : i32
    %c0_i32_0 = arith.constant 0 : i32
    %c0_i32_1 = arith.constant 0 : i32
    return %c0_i32, %c0_i32_0 : i32, i32
  }
  func.func @transform_6(%arg0: i32) -> (i32, i32) {
    %c0_i32 = arith.constant 0 : i32
    %c0_i32_0 = arith.constant 0 : i32
    %c0_i32_1 = arith.constant 0 : i32
    return %c0_i32, %c0_i32_0 : i32, i32
  }
  func.func @transform_7(%arg0: i32) -> (i32, i32) {
    %c0_i32 = arith.constant 0 : i32
    %c0_i32_0 = arith.constant 0 : i32
    %c0_i32_1 = arith.constant 0 : i32
    return %c0_i32, %c0_i32_0 : i32, i32
  }
  func.func @transform_8(%arg0: i32) -> (i32, i32) {
    %c0_i32 = arith.constant 0 : i32
    %c0_i32_0 = arith.constant 0 : i32
    %c0_i32_1 = arith.constant 0 : i32
    return %c0_i32, %c0_i32_0 : i32, i32
  }
  func.func @transform_9(%arg0: i32) -> (i32, i32) {
    %c0_i32 = arith.constant 0 : i32
    %c0_i32_0 = arith.constant 0 : i32
    return %c0_i32, %arg0 : i32, i32
  }
  func.func @transform_10(%arg0: i32) -> (i32, i32) {
    %c0_i32 = arith.constant 0 : i32
    %c0_i32_0 = arith.constant 0 : i32
    return %c0_i32, %arg0 : i32, i32
  }
  func.func @transform_11(%arg0: i32) -> (i32, i32) {
    %c0_i32 = arith.constant 0 : i32
    %c0_i32_0 = arith.constant 0 : i32
    return %c0_i32, %arg0 : i32, i32
  }
}

</mosaic_0001>

<bundles_post_ra>
// kernel: generator_forward_padded.1
= control target key start
LH: loop header
LB: loop body
LE: loop exit
PB: predicated region body
PF: predicated region fallthrough
CT: control target
= control target key end

     0   :  { %s6940_s0 = inlined_call_operand.hbm [shape: f32[8,64], index: 0, kind: input, shape index: {}]   ;;  %s6941_s1 = inlined_call_operand.hbm [shape: bf16[64,128], index: 1, kind: input, shape index: {}]   ;;  %s6942_s2 = inlined_call_operand.hbm [shape: f32[2,128], index: 2, kind: input, shape index: {}]   ;;  %s6943_s3 = inlined_call_operand.hbm [shape: bf16[128,256], index: 3, kind: input, shape index: {}]   ;;  %s6944_s4 = inlined_call_operand.hbm [shape: f32[2,256], index: 4, kind: input, shape index: {}]   ;;  %s6945_s5 = inlined_call_operand.hbm [shape: bf16[256,512], index: 5, kind: input, shape index: {}]   ;;  %s6946_s6 = inlined_call_operand.hbm [shape: f32[2,512], index: 6, kind: input, shape index: {}]   ;;  %s6947_s7 = inlined_call_operand.hbm [shape: bf16[512,1024], index: 7, kind: input, shape index: {}]   ;;  %s6948_s8 = inlined_call_operand.hbm [shape: f32[2,1024], index: 8, kind: input, shape index: {}]   ;;  %s6949_s9 = inlined_call_operand.hbm [shape: bf16[1024,896], index: 9, kind: input, shape index: {}]   ;;  %s6950_s10 = inlined_call_operand.hbm [shape: f32[1,896], index: 10, kind: input, shape index: {}]   ;;  %s6951_s11 = inlined_call_operand.hbm [shape: f32[8,896], index: 11, kind: output, shape index: {}]  }
   0x1   :  { %6971 = sst [smem:[#allocation34_spill]] %s6941_s1 }
   0x2   :  { %6972 = sst [smem:[#allocation35_spill]] %s6943_s3 }
   0x3   :  { %6973 = sst [smem:[#allocation36_spill]] %s6945_s5 }
   0x4   :  { %6974 = sst [smem:[#allocation37_spill]] %s6947_s7 }
   0x5   :  { %6975 = sst [smem:[#allocation38_spill]] %s6949_s9 }
   0x6   :  { %6976 = sst [smem:[#allocation39_spill]] %s6950_s10 }
   0x7   :  { %6977 = sst [smem:[#allocation40_spill]] %s6951_s11 }
   0x8   :  { %16 = vsyncpa [#allocation4], 0 }
   0x9   :  { %17 = vsyncpa [#allocation7], 0 }
   0xa   :  { %18 = vsyncpa [#allocation10], 0 }
   0xb   :  { %19 = vsyncpa [#allocation13], 0 }
   0xc   :  { %20 = vsyncpa [#allocation16], 0 }
   0xd   :  { %21 = vsyncpa [#allocation19], 0 }
   0xe   :  { %23 = vsyncpa [#allocation19 + $0x1], 0 }
   0xf   :  { %24 = vsyncpa [#allocation5], 0 }
  0x10   :  { %26 = vsyncpa [#allocation5 + $0x1], 0  ;;  %s6277_s17 = smov 0   ;;  %s6279_s18 = smov 0  }
  0x11   :  { %s6281_s19 = smov 0   ;;  %s6283_s20 = smov 0  }
  0x12 LB: > { %6978 = sst [smem:[#allocation29_spill]] %s6178_s17  ;;  %s6192_s21 = smov [#allocation6]   ;;  %s6190_s20 = sphi %s6283_s20, %s7024_s20   ;;  %s6186_s19 = sphi %s6281_s19, %s7028_s19   ;;  %s6182_s18 = sphi %s6279_s18, %s7027_s18   ;;  %s6178_s17 = sphi %s6277_s17, %s7026_s17  }
  0x13   : > { %s327_s22 = sshll.u32 %s6192_s21, 4  ;;  %s6298_s23 = sadd.s32 4294967295, %s6190_s20   ;;  %s6304_s22 = int_to_ptr.vmem [resolvable:$true] %s327_s22 }
  0x14   : > { %p3786_p0 = scmp.ge.s32.totalorder %s6190_s20, 1  ;;  %p6956_p1 = scmp.eq.s32.totalorder %s6298_s23, 0 }
  0x15   : > { %p304_p2 = scmp.lt.s32.totalorder %s6190_s20, 8  ;;  %s6193_s25 = smov [#allocation9]  }
  0x16   : > { %s351_s26 = sshll.u32 %s6193_s25, 4  ;;  %s6194_s28 = smov [#allocation12]   ;;  %s6318_s26 = int_to_ptr.vmem [resolvable:$true] %s351_s26 }
  0x17   : > { %p6306_p4 = pnand %p3786_p0, %p304_p2  ;;  %s6320_s29 = sshll.u32 %s6194_s28, 4  ;;  %s376_s29 = int_to_ptr.vmem [resolvable:$true] %s6320_s29 }
  0x18   : > { %s6982_s1 = sld [smem:[#allocation34_spill]] }
  0x19   : > { %s6979_s24 = scalar_select %p6306_p4, 1, 0 }
  0x1a   : > { %p5525_p5 = pneg %p6306_p4 }
  0x1b   : > { %6980 = sst [smem:[#allocation30_spill]] %s6979_s24 }
  0x1c   : > { %p6314_p6 = pnand %p5525_p5, %p6956_p1 }
  0x1e   : > { %s6981_s27 = scalar_select %p6314_p6, 1, 0 }
  0x1f   : > { %s5792_s13 = scalar_lea.hbm %s6982_s1, 512  ;;  %p6330_p8 = pneg %p6314_p6 }
  0x20   : > { %p5793_p7 = scmp.ne.s32.totalorder %s6982_s1, %s5792_s13  ;;  %p5799_p11 = scmp.lt.u32.totalorder %s5792_s13, %s6982_s1 }
  0x22   : > { %p5795_p9 = pnand %p6330_p8, %p5793_p7 }
  0x24   : > { %p5796_p10 = pneg %p5795_p9 }
  0x26   : > { %p5801_p12 = pnand %p5799_p11, %p5796_p10 }
  0x28   : > { %5804 = shalt.err (!%p5801_p12)
}
  0x29   : > { %s5805_s28 = scalar_lea.vmem %s6304_s22, 512  ;;  %p5813_p5 = scmp.lt.s32.totalorder %s6304_s22, %s6304_s22 }
  0x2a   : > { %p5806_p13 = scmp.ne.s32.totalorder %s6304_s22, %s5805_s28  ;;  %p5814_p3 = scmp.lt.s32.totalorder %s5805_s28, %s5805_s28 }
  0x2c   : > { %p5808_p0 = pnand %p5806_p13, %p6330_p8  ;;  %p5815_p7 = por %p5814_p3, %p5813_p5 }
  0x2e   : > { %p5809_p2 = pneg %p5808_p0 }
  0x30   : > { %p5816_p9 = pnand %p5815_p7, %p5809_p2 }
  0x32   : > { %5819 = shalt.err (!%p5816_p9)
}
  0x33   : > { %s6955_s30 = smov 64   ;;  %s6958_s12 = smov 4  }
  0x34   : > { %5531 = dma.hbm_to_vmem [thread:$0]  (!%p6314_p6), %s6982_s1, 512, %s6304_s22, [#allocation7], %s6955_s30, %s6955_s30, %s6958_s12  }
  0x35   : > { %s6984_s3 = sld [smem:[#allocation35_spill]] }
  0x3b   : > { %s5820_s25 = scalar_lea.hbm %s6984_s3, 2048 }
  0x3c   : > { %p5821_p3 = scmp.ne.s32.totalorder %s6984_s3, %s5820_s25  ;;  %p5827_p12 = scmp.lt.u32.totalorder %s5820_s25, %s6984_s3 }
  0x3e   : > { %p5823_p10 = pnand %p5821_p3, %p6330_p8 }
  0x40   : > { %p5824_p11 = pneg %p5823_p10 }
  0x42   : > { %p5829_p13 = pnand %p5827_p12, %p5824_p11 }
  0x44   : > { %5832 = shalt.err (!%p5829_p13)
}
  0x45   : > { %s5833_s22 = scalar_lea.vmem %s6318_s26, 2048  ;;  %p5841_p7 = scmp.lt.s32.totalorder %s6318_s26, %s6318_s26 }
  0x46   : > { %p5834_p0 = scmp.ne.s32.totalorder %s6318_s26, %s5833_s22  ;;  %p5842_p9 = scmp.lt.s32.totalorder %s5833_s22, %s5833_s22 }
  0x48   : > { %p5836_p2 = pnand %p5834_p0, %p6330_p8  ;;  %p5843_p3 = por %p5842_p9, %p5841_p7 }
  0x4a   : > { %p5837_p5 = pneg %p5836_p2 }
  0x4c   : > { %p5844_p10 = pnand %p5843_p3, %p5837_p5 }
  0x4e   : > { %5847 = shalt.err (!%p5844_p10)
}
  0x4f   : > { %s6197_s11 = smov 128   ;;  %s6198_s10 = smov 8  }
  0x50   : > { %5537 = dma.hbm_to_vmem [thread:$0]  (!%p6314_p6), %s6984_s3, 2048, %s6318_s26, [#allocation10], %s6197_s11, %s6197_s11, %s6198_s10  }
  0x51   : > { %s6985_s5 = sld [smem:[#allocation36_spill]] }
  0x57   : > { %s5848_s21 = scalar_lea.hbm %s6985_s5, 8192 }
  0x58   : > { %p5849_p11 = scmp.ne.s32.totalorder %s6985_s5, %s5848_s21  ;;  %p5855_p0 = scmp.lt.u32.totalorder %s5848_s21, %s6985_s5 }
  0x5a   : > { %p5851_p12 = pnand %p5849_p11, %p6330_p8 }
  0x5c   : > { %p5852_p13 = pneg %p5851_p12 }
  0x5e   : > { %p5857_p2 = pnand %p5855_p0, %p5852_p13 }
  0x60   : > { %5860 = shalt.err (!%p5857_p2)
}
  0x61   : > { %s5861_s24 = scalar_lea.vmem %s376_s29, 8192  ;;  %p5869_p3 = scmp.lt.s32.totalorder %s376_s29, %s376_s29 }
  0x62   : > { %p5862_p5 = scmp.ne.s32.totalorder %s376_s29, %s5861_s24  ;;  %p5870_p10 = scmp.lt.s32.totalorder %s5861_s24, %s5861_s24 }
  0x64   : > { %p5864_p7 = pnand %p5862_p5, %p6330_p8  ;;  %p5871_p1 = por %p5870_p10, %p5869_p3 }
  0x66   : > { %p5865_p9 = pneg %p5864_p7 }
  0x68   : > { %p5872_p4 = pnand %p5871_p1, %p5865_p9 }
  0x6a   : > { %5875 = shalt.err (!%p5872_p4)
}
  0x6b   : > { %s6199_s26 = smov 256   ;;  %s6200_s11 = smov 16  }
  0x6c   : > { %5543 = dma.hbm_to_vmem [thread:$0]  (!%p6314_p6), %s6985_s5, 8192, %s376_s29, [#allocation13], %s6199_s26, %s6199_s26, %s6200_s11  }
  0x6d   : > { %s6201_s13 = smov [#allocation15]   ;;  %s6986_s7 = sld [smem:[#allocation37_spill]] }
  0x6e   : > { %s399_s14 = sshll.u32 %s6201_s13, 4  ;;  %s400_s14 = int_to_ptr.vmem [resolvable:$true] %s399_s14 }
  0x73   : > { %s5876_s25 = scalar_lea.hbm %s6986_s7, 32768 }
  0x74   : > { %p5877_p1 = scmp.ne.s32.totalorder %s6986_s7, %s5876_s25  ;;  %p5883_p12 = scmp.lt.u32.totalorder %s5876_s25, %s6986_s7 }
  0x76   : > { %p5879_p4 = pnand %p5877_p1, %p6330_p8 }
  0x78   : > { %p5880_p11 = pneg %p5879_p4 }
  0x7a   : > { %p5885_p13 = pnand %p5883_p12, %p5880_p11 }
  0x7c   : > { %5888 = shalt.err (!%p5885_p13)
}
  0x7d   : > { %s5889_s29 = scalar_lea.vmem %s400_s14, 32768  ;;  %p5897_p7 = scmp.lt.s32.totalorder %s400_s14, %s400_s14 }
  0x7e   : > { %p5890_p0 = scmp.ne.s32.totalorder %s400_s14, %s5889_s29  ;;  %p5898_p9 = scmp.lt.s32.totalorder %s5889_s29, %s5889_s29 }
  0x80   : > { %p5892_p2 = pnand %p5890_p0, %p6330_p8  ;;  %p5899_p3 = por %p5898_p9, %p5897_p7 }
  0x82   : > { %p5893_p5 = pneg %p5892_p2 }
  0x84   : > { %p5900_p10 = pnand %p5899_p3, %p5893_p5 }
  0x86   : > { %5903 = shalt.err (!%p5900_p10)
}
  0x87   : > { %s6202_s26 = smov 512   ;;  %s6203_s12 = smov 32  }
  0x88   : > { %5549 = dma.hbm_to_vmem [thread:$0]  (!%p6314_p6), %s6986_s7, 32768, %s400_s14, [#allocation16], %s6202_s26, %s6202_s26, %s6203_s12  }
  0x89   : > { %s3785_s10 = sadd.s32 4294967294, %s6190_s20   ;;  %s6416_s13 = sadd.s32 1, %s6190_s20  }
  0x8a   : > { %6987 = sst [smem:[#allocation31_spill]] %s6416_s13  ;;  %s225_s15 = ssub.s32 %s6190_s20, %s6416_s13 }
  0x8b   : > { %s228_s21 = sadd.s32 1, %s6186_s19  ;;  %p226_p1 = scmp.eq.s32.totalorder %s225_s15, 0 }
  0x8c   : > { %p235_p4 = scmp.ne.s32.totalorder %s6186_s19, %s6182_s18  ;;  %p236_p11 = scmp.eq.s32.totalorder %s6190_s20, 0 }
  0x8d   : > { %p241_p12 = scmp.ne.s32.totalorder %s6182_s18, %s6178_s17  ;;  %p6990_p0 = scmp.eq.s32.totalorder %s6298_s23, 0 }
  0x8e   : > { %s6427_s25 = scalar_select %p226_p1, %s6186_s19, %s228_s21  }
  0x8f   : > { %p6429_p13 = por %p236_p11, %p235_p4  ;;  %p6435_p2 = por %p6990_p0, %p241_p12 }
  0x90   : > { %6988 = sst [smem:[#allocation32_spill]] %s6427_s25  ;;  %p291_p5 = scmp.eq.s32.totalorder %s6298_s23, 6 }
  0x91   : > { %s6991_s14 = scalar_select %p6435_p2, 1, 0 }
  0x92   : > { %p297_p7 = scmp.eq.s32.totalorder %s3785_s10, 6  ;;  %p5573_p9 = scmp.lt.s32.totalorder %s6190_s20, 7 }
  0x93   : > { %s424_s22 = sand.u32 1, %s6190_s20   ;;  %p6442_p3 = por %p291_p5, %p235_p4 }
  0x94   : > { %p6446_p10 = por %p297_p7, %p241_p12  ;;  %s6959_s26 = sand.u32 1, %s6186_s19  }
  0x95   : > { %s6992_s24 = scalar_select %p6442_p3, 1, 0 }
  0x96   : > { %s6993_s29 = scalar_select %p6446_p10, 1, 0 }
  0x97   : > { %s3797_s12 = sshll.u32 %s6959_s26, 9  ;;  %s3798_s11 = sshll.u32 %s6190_s20, 6 }
  0x98   : > { %6994 = sst [smem:[#allocation33_spill]] %s6993_s29  ;;  %s6995_s9 = sld [smem:[#allocation38_spill]] }
  0x99   : > { %s428_s10 = scalar_lea.vmem [#allocation18], %s3797_s12  ;;  %p6461_p1 = pnand %p5573_p9, %p6429_p13 }
  0x9a   : > { %s434_s1 = sshll.u32 %s428_s10, 4  ;;  %s6467_s26 = scalar_lea.sflag [#allocation19], %s424_s22  ;;  %s6465_s1 = int_to_ptr.vmem [resolvable:$true] %s434_s1 }
  0x9b   : > { %s6996_s3 = scalar_select %p6461_p1, 1, 0 }
  0x9c   : > { %p6968_p11 = pneg %p6461_p1 }
  0x9e   : > { %s6457_s21 = scalar_lea.hbm %s6995_s9, %s3798_s11  ;;  %s5909_s11 = scalar_lea.hbm %s6995_s9, 57344 }
  0x9f   : > { %s5904_s30 = scalar_lea.hbm %s6457_s21, 8192  ;;  %p5910_p13 = scmp.lt.u32.totalorder %s6457_s21, %s6995_s9 }
  0xa0   : > { %p5905_p4 = scmp.ne.s32.totalorder %s6457_s21, %s5904_s30  ;;  %p5911_p5 = scmp.lt.u32.totalorder %s5909_s11, %s5904_s30 }
  0xa1   : > { %p5913_p9 = scmp.lt.u32.totalorder %s5904_s30, %s6457_s21 }
  0xa2   : > { %p5907_p12 = pnand %p6968_p11, %p5905_p4  ;;  %p5912_p7 = por %p5911_p5, %p5910_p13 }
  0xa4   : > { %p5908_p0 = pneg %p5907_p12  ;;  %p5914_p10 = por %p5913_p9, %p5912_p7 }
  0xa6   : > { %p5915_p3 = pnand %p5914_p10, %p5908_p0 }
  0xa8   : > { %5918 = shalt.err (!%p5915_p3)
}
  0xa9   : > { %s5919_s22 = scalar_lea.vmem %s6465_s1, 8192  ;;  %s6204_s12 = smov [#allocation18]  }
  0xaa   : > { %p5920_p4 = scmp.ne.s32.totalorder %s6465_s1, %s5919_s22  ;;  %s5924_s28 = sshll.u32 %s6204_s12, 4  ;;  %s5925_s28 = int_to_ptr.vmem [resolvable:$false] %s5924_s28 }
  0xab   : > { %s5926_s15 = scalar_lea.vmem %s5925_s28, 16384  ;;  %p5927_p6 = scmp.lt.s32.totalorder %s6465_s1, %s5925_s28 }
  0xac   : > { %p5922_p12 = pnand %p5920_p4, %p6968_p11  ;;  %p5928_p13 = scmp.lt.s32.totalorder %s5926_s15, %s5919_s22 }
  0xae   : > { %p5923_p2 = pneg %p5922_p12  ;;  %p5929_p5 = por %p5928_p13, %p5927_p6 }
  0xb0   : > { %p5930_p7 = pnand %p5929_p5, %p5923_p2 }
  0xb2   : > { %5933 = shalt.err (!%p5930_p7)
}
  0xb3   : > { %s6205_s30 = smov 448   ;;  %s6997_s11 = smov 4  }
  0xb4   : > { %s6998_s10 = smov 64   ;;  %s6206_s5 = smov [#allocation3]  }
  0xb5   : > { %5556 = dma.hbm_to_vmem [thread:$0]  (!%p6461_p1), %s6457_s21, 8192, %s6465_s1, %s6467_s26, %s6205_s30, %s6998_s10, %s6997_s11  }
  0xb6   : > { %s317_s7 = sshll.u32 %s6206_s5, 4  ;;  %s6207_s12 = smov [#allocation8]   ;;  %s318_s7 = int_to_ptr.vmem [resolvable:$true] %s317_s7 }
  0xb7   : > { %s341_s9 = sshll.u32 %s6207_s12, 4  ;;  %s5934_s15 = scalar_lea.hbm %s6940_s0, 128  ;;  %s342_s9 = int_to_ptr.vmem [resolvable:$true] %s341_s9 }
  0xb8   : > { %p5935_p6 = scmp.ne.s32.totalorder %s6940_s0, %s5934_s15  ;;  %p5941_p10 = scmp.lt.u32.totalorder %s5934_s15, %s6940_s0 }
  0xba   : > { %p5937_p2 = pnand %p5935_p6, %p6330_p8 }
  0xbc   : > { %p5938_p3 = pneg %p5937_p2 }
  0xbe   : > { %p5943_p0 = pnand %p5941_p10, %p5938_p3 }
  0xc0   : > { %5946 = shalt.err (!%p5943_p0)
}
  0xc1   : > { %s5947_s1 = scalar_lea.vmem %s318_s7, 128  ;;  %p5955_p13 = scmp.lt.s32.totalorder %s318_s7, %s318_s7 }
  0xc2   : > { %p5948_p9 = scmp.ne.s32.totalorder %s318_s7, %s5947_s1  ;;  %p5956_p5 = scmp.lt.s32.totalorder %s5947_s1, %s5947_s1 }
  0xc4   : > { %p5950_p4 = pnand %p5948_p9, %p6330_p8  ;;  %p5957_p7 = por %p5956_p5, %p5955_p13 }
  0xc6   : > { %p5951_p12 = pneg %p5950_p4 }
  0xc8   : > { %p5958_p11 = pnand %p5957_p7, %p5951_p12 }
  0xca   : > { %5961 = shalt.err (!%p5958_p11)
}
  0xcb   : > { %p6999_p6 = scmp.ne.s32.totalorder %s6981_s27, 0  ;;  %s5962_s29 = scalar_lea.hbm %s6942_s2, 32 }
  0xcc   : > { %p5963_p2 = scmp.ne.s32.totalorder %s6942_s2, %s5962_s29  ;;  %p5969_p11 = scmp.lt.u32.totalorder %s5962_s29, %s6942_s2 }
  0xcd   : > { %5528 = dma.hbm_to_vmem [thread:$0]  (!%p6999_p6), %s6940_s0, 128, %s318_s7, [#allocation4]  }
  0xce   : > { %p5965_p3 = pnand %p5963_p2, %p6330_p8 }
  0xd0   : > { %p5966_p10 = pneg %p5965_p3 }
  0xd2   : > { %p5971_p0 = pnand %p5969_p11, %p5966_p10 }
  0xd4   : > { %5974 = shalt.err (!%p5971_p0)
}
  0xd5   : > { %s5975_s12 = scalar_lea.vmem %s342_s9, 32  ;;  %p5983_p13 = scmp.lt.s32.totalorder %s342_s9, %s342_s9 }
  0xd6   : > { %p5976_p9 = scmp.ne.s32.totalorder %s342_s9, %s5975_s12  ;;  %p5984_p5 = scmp.lt.s32.totalorder %s5975_s12, %s5975_s12 }
  0xd8   : > { %p5978_p4 = pnand %p5976_p9, %p6330_p8  ;;  %p5985_p7 = por %p5984_p5, %p5983_p13 }
  0xda   : > { %p5979_p12 = pneg %p5978_p4 }
  0xdc   : > { %p5986_p1 = pnand %p5985_p7, %p5979_p12 }
  0xde   : > { %5989 = shalt.err (!%p5986_p1)
}
  0xdf   : > { %5534 = dma.hbm_to_vmem [thread:$0]  (!%p6999_p6), %s6942_s2, 32, %s342_s9, [#allocation7]  }
  0xe0   : > { %s6208_s22 = smov [#allocation11]   ;;  %s6209_s1 = smov [#allocation14]  }
  0xe1   : > { %s365_s15 = sshll.u32 %s6208_s22, 4  ;;  %s389_s5 = sshll.u32 %s6209_s1, 4  ;;  %s366_s15 = int_to_ptr.vmem [resolvable:$true] %s365_s15  ;;  %s390_s5 = int_to_ptr.vmem [resolvable:$true] %s389_s5 }
  0xe2   : > { %s5990_s25 = scalar_lea.hbm %s6944_s4, 64 }
  0xe3   : > { %p5991_p1 = scmp.ne.s32.totalorder %s6944_s4, %s5990_s25  ;;  %p5997_p10 = scmp.lt.u32.totalorder %s5990_s25, %s6944_s4 }
  0xe5   : > { %p5993_p2 = pnand %p5991_p1, %p6330_p8 }
  0xe7   : > { %p5994_p3 = pneg %p5993_p2 }
  0xe9   : > { %p5999_p11 = pnand %p5997_p10, %p5994_p3 }
  0xeb   : > { %6002 = shalt.err (!%p5999_p11)
}
  0xec   : > { %s6003_s9 = scalar_lea.vmem %s366_s15, 64  ;;  %p6011_p12 = scmp.lt.s32.totalorder %s366_s15, %s366_s15 }
  0xed   : > { %p6004_p0 = scmp.ne.s32.totalorder %s366_s15, %s6003_s9  ;;  %p6012_p13 = scmp.lt.s32.totalorder %s6003_s9, %s6003_s9 }
  0xef   : > { %p6006_p9 = pnand %p6004_p0, %p6330_p8  ;;  %p6013_p5 = por %p6012_p13, %p6011_p12 }
  0xf1   : > { %p6007_p4 = pneg %p6006_p9 }
  0xf3   : > { %p6014_p7 = pnand %p6013_p5, %p6007_p4 }
  0xf5   : > { %6017 = shalt.err (!%p6014_p7)
}
  0xf6   : > { %5540 = dma.hbm_to_vmem [thread:$0]  (!%p6999_p6), %s6944_s4, 64, %s366_s15, [#allocation10]  }
  0xf7   : > { %s6018_s22 = scalar_lea.hbm %s6946_s6, 128 }
  0xf8   : > { %p6019_p1 = scmp.ne.s32.totalorder %s6946_s6, %s6018_s22  ;;  %p6025_p10 = scmp.lt.u32.totalorder %s6018_s22, %s6946_s6 }
  0xfa   : > { %p6021_p2 = pnand %p6019_p1, %p6330_p8 }
  0xfc   : > { %p6022_p3 = pneg %p6021_p2 }
  0xfe   : > { %p6027_p11 = pnand %p6025_p10, %p6022_p3 }
 0x100   : > { %6030 = shalt.err (!%p6027_p11)
}
 0x101   : > { %s6031_s29 = scalar_lea.vmem %s390_s5, 128  ;;  %p6039_p12 = scmp.lt.s32.totalorder %s390_s5, %s390_s5 }
 0x102   : > { %p6032_p0 = scmp.ne.s32.totalorder %s390_s5, %s6031_s29  ;;  %p6040_p13 = scmp.lt.s32.totalorder %s6031_s29, %s6031_s29 }
 0x104   : > { %p6034_p9 = pnand %p6032_p0, %p6330_p8  ;;  %p6041_p5 = por %p6040_p13, %p6039_p12 }
 0x106   : > { %p6035_p4 = pneg %p6034_p9 }
 0x108   : > { %p6042_p7 = pnand %p6041_p5, %p6035_p4 }
 0x10a   : > { %6045 = shalt.err (!%p6042_p7)
}
 0x10b   : > { %5546 = dma.hbm_to_vmem [thread:$0]  (!%p6999_p6), %s6946_s6, 128, %s390_s5, [#allocation13]  }
 0x10c   : > { %s6210_s30 = smov [#allocation17]   ;;  %s3799_s9 = sshll.u32 %s6190_s20, 4 }
 0x10d   : > { %s413_s11 = sshll.u32 %s6210_s30, 4  ;;  %s6046_s7 = scalar_lea.hbm %s6948_s8, 256  ;;  %s414_s11 = int_to_ptr.vmem [resolvable:$true] %s413_s11 }
 0x10e   : > { %p6047_p1 = scmp.ne.s32.totalorder %s6948_s8, %s6046_s7  ;;  %p6053_p10 = scmp.lt.u32.totalorder %s6046_s7, %s6948_s8 }
 0x110   : > { %p6049_p2 = pnand %p6047_p1, %p6330_p8 }
 0x112   : > { %p6050_p3 = pneg %p6049_p2 }
 0x114   : > { %p6055_p11 = pnand %p6053_p10, %p6050_p3 }
 0x116   : > { %6058 = shalt.err (!%p6055_p11)
}
 0x117   : > { %s6059_s5 = scalar_lea.vmem %s414_s11, 256  ;;  %p6067_p12 = scmp.lt.s32.totalorder %s414_s11, %s414_s11 }
 0x118   : > { %p6060_p0 = scmp.ne.s32.totalorder %s414_s11, %s6059_s5  ;;  %p6068_p13 = scmp.lt.s32.totalorder %s6059_s5, %s6059_s5 }
 0x11a   : > { %p6062_p9 = pnand %p6060_p0, %p6330_p8  ;;  %p6069_p5 = por %p6068_p13, %p6067_p12 }
 0x11c   : > { %p6063_p4 = pneg %p6062_p9 }
 0x11e   : > { %p6070_p7 = pnand %p6069_p5, %p6063_p4 }
 0x120   : > { %6073 = shalt.err (!%p6070_p7)
}
 0x121   : > { %5552 = dma.hbm_to_vmem [thread:$0]  (!%p6999_p6), %s6948_s8, 256, %s414_s11, [#allocation16]  }
 0x122   : > { %s7000_s21 = sld [smem:[#allocation39_spill]]  ;;  %s7001_s16 = sand.u32 1, %s6186_s19  }
 0x123   : > { %s447_s10 = scalar_lea.vmem [#allocation20], %s7001_s16  ;;  %p7002_p1 = scmp.ne.s32.totalorder %s6996_s3, 0 }
 0x124   : > { %s454_s12 = sshll.u32 %s447_s10, 4  ;;  %s455_s12 = int_to_ptr.vmem [resolvable:$true] %s454_s12 }
 0x125   : > { %p7003_p2 = pneg %p7002_p1 }
 0x128   : > { %s6591_s30 = scalar_lea.hbm %s7000_s21, %s3799_s9  ;;  %s6079_s28 = scalar_lea.hbm %s7000_s21, 112 }
 0x129   : > { %s6074_s27 = scalar_lea.hbm %s6591_s30, 16  ;;  %p6080_p6 = scmp.lt.u32.totalorder %s6591_s30, %s7000_s21 }
 0x12a   : > { %p6075_p8 = scmp.ne.s32.totalorder %s6591_s30, %s6074_s27  ;;  %p6081_p11 = scmp.lt.u32.totalorder %s6079_s28, %s6074_s27 }
 0x12b   : > { %p6083_p9 = scmp.lt.u32.totalorder %s6074_s27, %s6591_s30 }
 0x12c   : > { %p6077_p3 = pnand %p6075_p8, %p7003_p2  ;;  %p6082_p0 = por %p6081_p11, %p6080_p6 }
 0x12e   : > { %p6078_p10 = pneg %p6077_p3  ;;  %p6084_p4 = por %p6083_p9, %p6082_p0 }
 0x130   : > { %p6085_p12 = pnand %p6084_p4, %p6078_p10 }
 0x132   : > { %6088 = shalt.err (!%p6085_p12)
}
 0x133   : > { %s6089_s1 = scalar_lea.vmem %s455_s12, 16  ;;  %p7004_p5 = pmov %p7003_p2 }
 0x134   : > { %p6090_p13 = scmp.ne.s32.totalorder %s455_s12, %s6089_s1  ;;  %s6211_s13 = smov [#allocation20]  }
 0x135   : > { %s6094_s5 = sshll.u32 %s6211_s13, 4  ;;  %s6095_s5 = int_to_ptr.vmem [resolvable:$false] %s6094_s5 }
 0x136   : > { %p6092_p7 = pnand %p6090_p13, %p7004_p5  ;;  %s6096_s17 = scalar_lea.vmem %s6095_s5, 32 }
 0x137   : > { %p6097_p2 = scmp.lt.s32.totalorder %s455_s12, %s6095_s5  ;;  %p6098_p3 = scmp.lt.s32.totalorder %s6096_s17, %s6089_s1 }
 0x138   : > { %p6093_p8 = pneg %p6092_p7 }
 0x139   : > { %p6099_p6 = por %p6098_p3, %p6097_p2 }
 0x13b   : > { %p6100_p11 = pnand %p6099_p6, %p6093_p8 }
 0x13d   : > { %6103 = shalt.err (!%p6100_p11)
}
 0x13e   : > { %5559 = dma.hbm_to_vmem [thread:$0]  (!%p7002_p1), %s6591_s30, 16, %s455_s12, %s6467_s26  }
 0x13f   : > { %s7005_s25 = sld [smem:[#allocation30_spill]] }
 0x145   : > { %p7006_p10 = scmp.ne.s32.totalorder %s7005_s25, 0 }
 0x146   : > { %p7007_p0 = scmp.eq.s32.totalorder (!%p7006_p10), %s6298_s23, 0 }
 0x147   : > { %463 = sbr.rel (%p7006_p10) target bundleno = 1992 (0x7c8), region = 64 }
 0x14e   : > { %6149 = dma.done.wait (%p7007_p0), [#allocation4], 128   ;;  %p7008_p9 = pmov %p7007_p0 }
 0x14f   : > { %p7009_p4 = pmov %p7007_p0 }
 0x150   : > { %6151 = vsyncadd (%p7008_p9), [#allocation4], 4294967168 }
 0x151   : > { %6153 = dma.done.wait (%p7009_p4), [#allocation7], 544   ;;  %p7010_p12 = pmov %p7007_p0 }
 0x152   : > { %p7011_p13 = pmov %p7007_p0 }
 0x153   : > { %6155 = vsyncadd (%p7010_p12), [#allocation7], 4294966752 }
 0x154   : > { %6157 = dma.done.wait (%p7011_p13), [#allocation10], 2112   ;;  %p7012_p1 = pmov %p7007_p0 }
 0x155   : > { %p7013_p5 = pmov %p7007_p0 }
 0x156   : > { %6159 = vsyncadd (%p7012_p1), [#allocation10], 4294965184 }
 0x157   : > { %6161 = dma.done.wait (%p7013_p5), [#allocation13], 8320   ;;  %p7014_p7 = pmov %p7007_p0 }
 0x158   : > { %p7015_p8 = pmov %p7007_p0 }
 0x159   : > { %6163 = vsyncadd (%p7014_p7), [#allocation13], 4294958976 }
 0x15a   : > { %6165 = dma.done.wait (%p7015_p8), [#allocation16], 33024   ;;  %p7016_p2 = pmov %p7007_p0 }
 0x15b   : > { %s501_s3 = sand.u32 1, %s6298_s23   ;;  %s6639_s26 = sand.u32 1, %s6182_s18  }
 0x15c   : > { %6167 = vsyncadd (%p7016_p2), [#allocation16], 4294934272  ;;  %s3810_s29 = sshll.u32 %s6639_s26, 9  ;;  %s502_s15 = scalar_lea.sflag [#allocation19], %s501_s3 }
 0x15d   : > { %s6642_s30 = scalar_lea.vmem [#allocation18], %s3810_s29  ;;  %p7017_p3 = scmp.ne.s32.totalorder %s6991_s14, 0 }
 0x15f   : > { %6169 = dma.done.wait (%p7017_p3), %s502_s15, 8208  }
 0x160   : > { %6171 = vsyncadd (%p7017_p3), %s502_s15, 4294959088  ;;  %s3811_s16 = sshll.u32 %s6639_s26, 3  ;;  %s513_s10 = scalar_lea.vmem [#allocation20], %s6639_s26 }
 0x161   : > { %s6650_s12 = scalar_lea.vmem [#allocation21], %s3811_s16  ;;  %p7018_p6 = scmp.ne.s32.totalorder %s6298_s23, 0 }
 0x162   : > { %v3822_v0 = vld [vmem:[#allocation6] sm:$0xff] (!%p7018_p6)   ;;  %v6212_v1 = vmov (!%p7018_p6), 0.0|0.0   ;;  %v4093_v2 = vld [vmem:[#allocation6 + $0x8] sm:$0xff] (!%p7018_p6)   ;;  %vm6213_vm0 = vmmov (!%p7018_p6), 0   ;;  %v6214_v3 = vmov (!%p7018_p6), 0.0   ;;  %v4094_v4 = vld [vmem:[#allocation6 + $0x10] sm:$0xff] (!%p7018_p6)   ;;  %v672_v42 = vlaneseq (!%p7018_p6) }
 0x163   : > { %559 = sbr.rel (%p7018_p6) target bundleno = 1668 (0x684), region = 112  ;;  %4327 = vmatprep.subr.bf16.mxu0 (!%p7018_p6), %v6212_v1  ;;  %4324 = vmatprep.mubr.msk.f32.mxu0 (!%p7018_p6), %vm6213_vm0, %v6214_v3  ;;  %v4095_v5 = vld [vmem:[#allocation6 + $0x18] sm:$0xff] (!%p7018_p6)   ;;  %vm577_vm1 = vcmask (!%p7018_p6), 523264   ;;  %v5638_v7 = vld [vmem:[#allocation9 + $0x4] ss:$8 sps:$4 sm:$0xff] (!%p7018_p6)  }
 0x164   : > { %4329 = vmatpush3.bf16.msra.mxu0 (!%p7018_p6), %v3822_v0  ;;  %796 = vmatprep.mubr.f32.mxu1 (!%p7018_p6), %v6214_v3  ;;  %v560_v6 = vld [vmem:[#allocation3] sm:$0xff] (!%p7018_p6)  ;;  %v5640_v8 = vld [vmem:[#allocation9] ss:$8 sps:$4 sm:$0xff] (!%p7018_p6)   ;;  %v5644_v11 = vld [vmem:[#allocation9 + $0x24] ss:$8 sps:$4 sm:$0xff] (!%p7018_p6)   ;;  %v6654_v43 = vshrl.u32 (!%p7018_p6), %v672_v42, 7 }
 0x165   : > { %4330 = vmatprep.subr.bf16.mxu0 (!%p7018_p6), %v6212_v1  ;;  %4340 = vmatprep.subr.bf16.mxu1 (!%p7018_p6), %v5638_v7  ;;  %v5641_v9 = vld [vmem:[#allocation9 + $0x14] ss:$8 sps:$4 sm:$0xff] (!%p7018_p6)   ;;  %v5643_v10 = vld [vmem:[#allocation9 + $0x10] ss:$8 sps:$4 sm:$0xff] (!%p7018_p6)   ;;  %v5646_v12 = vld [vmem:[#allocation9 + $0x20] ss:$8 sps:$4 sm:$0xff] (!%p7018_p6)  }
 0x166   : > { %4342 = vmatpush1.bf16.msra.mxu1 (!%p7018_p6), %v5640_v8  ;;  %v5647_v13 = vld [vmem:[#allocation9 + $0x34] ss:$8 sps:$4 sm:$0xff] (!%p7018_p6)   ;;  %v5649_v14 = vld [vmem:[#allocation9 + $0x30] ss:$8 sps:$4 sm:$0xff] (!%p7018_p6)   ;;  %v5650_v15 = vld [vmem:[#allocation9 + $0x44] ss:$8 sps:$4 sm:$0xff] (!%p7018_p6)  }
 0x167   : > { %4344 = vmatprep.subr.bf16.mxu1 (!%p7018_p6), %v5641_v9  ;;  %v5652_v16 = vld [vmem:[#allocation9 + $0x40] ss:$8 sps:$4 sm:$0xff] (!%p7018_p6)   ;;  %v5653_v17 = vld [vmem:[#allocation9 + $0x54] ss:$8 sps:$4 sm:$0xff] (!%p7018_p6)   ;;  %v5655_v18 = vld [vmem:[#allocation9 + $0x50] ss:$8 sps:$4 sm:$0xff] (!%p7018_p6)  }
 0x168   : > { %4332 = vmatpush3.bf16.msra.mxu0 (!%p7018_p6), %v4093_v2  ;;  %v5656_v19 = vld [vmem:[#allocation9 + $0x64] ss:$8 sps:$4 sm:$0xff] (!%p7018_p6)   ;;  %v5658_v20 = vld [vmem:[#allocation9 + $0x60] ss:$8 sps:$4 sm:$0xff] (!%p7018_p6)   ;;  %v5659_v21 = vld [vmem:[#allocation9 + $0x74] ss:$8 sps:$4 sm:$0xff] (!%p7018_p6)  }
 0x169   : > { %4333 = vmatprep.subr.bf16.mxu0 (!%p7018_p6), %v6212_v1  ;;  %v5661_v22 = vld [vmem:[#allocation9 + $0x70] ss:$8 sps:$4 sm:$0xff] (!%p7018_p6)   ;;  %v668_v44 = vld [vmem:[#allocation8] sm:$0x1] (!%p7018_p6)  ;;  %v6657_v45 = vsub.s32 (!%p7018_p6), 0, %v6654_v43 }
 0x16a   : > { %4346 = vmatpush1.bf16.msra.mxu1 %v5643_v10  ;;  %v3814_v49 = vld [vmem:[#allocation8 + $0x1] ss:$0 sm:$0xff]  ;;  %v5662_v53 = vld [vmem:[#allocation12 + $0x4] ss:$16 sps:$4 sm:$0xff]   ;;  %v5665_v54 = vld [vmem:[#allocation12 + $0xc] ss:$16 sps:$4 sm:$0xff]  }
 0x16b   : > { %4348 = vmatprep.subr.bf16.mxu1 %v5644_v11  ;;  %v5664_v55 = vld [vmem:[#allocation12] ss:$16 sps:$4 sm:$0xff]   ;;  %v5667_v56 = vld [vmem:[#allocation12 + $0x8] ss:$16 sps:$4 sm:$0xff]   ;;  %v5668_v57 = vld [vmem:[#allocation12 + $0x24] ss:$16 sps:$4 sm:$0xff]  }
 0x16c   : > { %4335 = vmatpush3.bf16.msra.mxu0 %v4094_v4  ;;  %v5671_v58 = vld [vmem:[#allocation12 + $0x2c] ss:$16 sps:$4 sm:$0xff]   ;;  %v5670_v59 = vld [vmem:[#allocation12 + $0x20] ss:$16 sps:$4 sm:$0xff]   ;;  %v5673_v60 = vld [vmem:[#allocation12 + $0x28] ss:$16 sps:$4 sm:$0xff]  }
 0x16d   : > { %4336 = vmatprep.subr.bf16.mxu0 %v6212_v1  ;;  %v5674_v61 = vld [vmem:[#allocation12 + $0x44] ss:$16 sps:$4 sm:$0xff]   ;;  %v5677_v62 = vld [vmem:[#allocation12 + $0x4c] ss:$16 sps:$4 sm:$0xff]   ;;  %v5676_v63 = vld [vmem:[#allocation12 + $0x40] ss:$16 sps:$4 sm:$0xff]  }
 0x16e   : > { %4350 = vmatpush1.bf16.msra.mxu1 %v5646_v12  ;;  %v5679_v0 = vld [vmem:[#allocation12 + $0x48] ss:$16 sps:$4 sm:$0xff]   ;;  %v5680_v1 = vld [vmem:[#allocation12 + $0x64] ss:$16 sps:$4 sm:$0xff]   ;;  %v5683_v2 = vld [vmem:[#allocation12 + $0x6c] ss:$16 sps:$4 sm:$0xff]  }
 0x16f   : > { %4352 = vmatprep.subr.bf16.mxu1 %v5647_v13  ;;  %v5682_v3 = vld [vmem:[#allocation12 + $0x60] ss:$16 sps:$4 sm:$0xff]   ;;  %v5685_v4 = vld [vmem:[#allocation12 + $0x68] ss:$16 sps:$4 sm:$0xff]   ;;  %v5692_v9 = vld [vmem:[#allocation12 + $0xa4] ss:$16 sps:$4 sm:$0xff]  }
 0x170   : > { %4338 = vmatpush3.bf16.msra.mxu0 %v4095_v5  ;;  %v5686_v5 = vld [vmem:[#allocation12 + $0x84] ss:$16 sps:$4 sm:$0xff]   ;;  %v5688_v7 = vld [vmem:[#allocation12 + $0x80] ss:$16 sps:$4 sm:$0xff]   ;;  %v5691_v8 = vld [vmem:[#allocation12 + $0x88] ss:$16 sps:$4 sm:$0xff]  }
 0x171   : > { %4372 = vmatprep.subr.bf16.mxu0 %v5662_v53  ;;  %v5695_v10 = vld [vmem:[#allocation12 + $0xac] ss:$16 sps:$4 sm:$0xff]   ;;  %v5694_v11 = vld [vmem:[#allocation12 + $0xa0] ss:$16 sps:$4 sm:$0xff]   ;;  %v5697_v12 = vld [vmem:[#allocation12 + $0xa8] ss:$16 sps:$4 sm:$0xff]  }
 0x172   : > { %4354 = vmatpush1.bf16.msra.mxu1 %v5649_v14  ;;  %v5698_v13 = vld [vmem:[#allocation12 + $0xc4] ss:$16 sps:$4 sm:$0xff]   ;;  %v5701_v14 = vld [vmem:[#allocation12 + $0xcc] ss:$16 sps:$4 sm:$0xff]  }
 0x173   : > { %4325 = vmatmul.mubr.msk.f32.vlgmr.msra.gmra.mrb[0].mxu0 %vm577_vm1, %v560_v6  ;;  %4356 = vmatprep.subr.bf16.mxu1 %v5650_v15  ;;  %v5689_v6 = vld [vmem:[#allocation12 + $0x8c] ss:$16 sps:$4 sm:$0xff]   ;;  %v5700_v15 = vld [vmem:[#allocation12 + $0xc0] ss:$16 sps:$4 sm:$0xff]  }
 0x174   : > { %4374 = vmatpush1.bf16.msra.mxu0 %v5664_v55  ;;  %v5743_v42 = vld [vmem:[#allocation12 + $0x1ac] ss:$16 sps:$4 sm:$0xff]  }
 0x175   : > { %4376 = vmatprep.subr.bf16.mxu0 %v5668_v57  ;;  %v5755_v53 = vld [vmem:[#allocation12 + $0x1ec] ss:$16 sps:$4 sm:$0xff]  }
 0x176   : > { %4358 = vmatpush1.bf16.msra.mxu1 %v5652_v16  ;;  %v5703_v16 = vld [vmem:[#allocation12 + $0xc8] ss:$16 sps:$4 sm:$0xff]  }
 0x177   : > { %4360 = vmatprep.subr.bf16.mxu1 %v5653_v17  ;;  %v5704_v17 = vld [vmem:[#allocation12 + $0xe4] ss:$16 sps:$4 sm:$0xff]  }
 0x178   : > { %4378 = vmatpush1.bf16.msra.mxu0 %v5670_v59 }
 0x179   : > { %4380 = vmatprep.subr.bf16.mxu0 %v5674_v61 }
 0x17a   : > { %4362 = vmatpush1.bf16.msra.mxu1 %v5655_v18  ;;  %v5707_v18 = vld [vmem:[#allocation12 + $0xec] ss:$16 sps:$4 sm:$0xff]  }
 0x17b   : > { %4364 = vmatprep.subr.bf16.mxu1 %v5656_v19  ;;  %v5706_v19 = vld [vmem:[#allocation12 + $0xe0] ss:$16 sps:$4 sm:$0xff]  }
 0x17c   : > { %4382 = vmatpush1.bf16.msra.mxu0 %v5676_v63 }
 0x17d   : > { %4384 = vmatprep.subr.bf16.mxu0 %v5680_v1 }
 0x17e   : > { %4366 = vmatpush1.bf16.msra.mxu1 %v5658_v20  ;;  %v5709_v20 = vld [vmem:[#allocation12 + $0xe8] ss:$16 sps:$4 sm:$0xff]  }
 0x17f   : > { %4368 = vmatprep.subr.bf16.mxu1 %v5659_v21  ;;  %v5710_v21 = vld [vmem:[#allocation12 + $0x104] ss:$16 sps:$4 sm:$0xff]  }
 0x180   : > { %4386 = vmatpush1.bf16.msra.mxu0 %v5682_v3 }
 0x181   : > { %4388 = vmatprep.subr.bf16.mxu0 %v5686_v5 }
 0x182   : > { %4370 = vmatpush1.bf16.msra.mxu1 %v5661_v22  ;;  %v5713_v22 = vld [vmem:[#allocation12 + $0x10c] ss:$16 sps:$4 sm:$0xff]  }
 0x183   : > { %4436 = vmatprep.subr.bf16.mxu1 %v5665_v54  ;;  %v5757_v54 = vld [vmem:[#allocation12 + $0x1e8] ss:$16 sps:$4 sm:$0xff]  }
 0x184   : > { %4390 = vmatpush1.bf16.msra.mxu0 %v5688_v7 }
 0x185   : > { %4392 = vmatprep.subr.bf16.mxu0 %v5692_v9 }
 0x188   : > { %4394 = vmatpush1.bf16.msra.mxu0 %v5694_v11 }
 0x189   : > { %4396 = vmatprep.subr.bf16.mxu0 %v5698_v13 }
 0x18c   : > { %4398 = vmatpush1.bf16.msra.mxu0 %v5700_v15 }
 0x18d   : > { %4400 = vmatprep.subr.bf16.mxu0 %v5704_v17 }
 0x190   : > { %4402 = vmatpush1.bf16.msra.mxu0 %v5706_v19 }
 0x191   : > { %4404 = vmatprep.subr.bf16.mxu0 %v5710_v21 }
 0x246   : > { %v647_v23 = vpop.f32.mrb[0].mxu0 }
 0x247   : > { %v651_v24 = vrot.slane %v647_v23, 4  ;;  %v4326_v25 = vpop.f32.mrb[1].mxu0 }
 0x248   : > { %v5716_v25 = vld [vmem:[#allocation12 + $0x124] ss:$16 sps:$4 sm:$0xff]  }
 0x249   : > { %v652_v26 = vadd.f32 %v651_v24, %v647_v23  ;;  %v5715_v24 = vld [vmem:[#allocation12 + $0x108] ss:$16 sps:$4 sm:$0xff]  }
 0x24b   : > { %v653_v27 = vrot.slane %v652_v26, 2 }
 0x24d   : > { %v654_v28 = vadd.f32 %v653_v27, %v652_v26  ;;  %v5719_v26 = vld [vmem:[#allocation12 + $0x12c] ss:$16 sps:$4 sm:$0xff]   ;;  %v5718_v27 = vld [vmem:[#allocation12 + $0x120] ss:$16 sps:$4 sm:$0xff]  }
 0x24f   : > { %v655_v29 = vrot.slane %v654_v28, 1 }
 0x251   : > { %v656_v30 = vadd.f32 %v655_v29, %v654_v28  ;;  %v5721_v28 = vld [vmem:[#allocation12 + $0x128] ss:$16 sps:$4 sm:$0xff]   ;;  %v5722_v29 = vld [vmem:[#allocation12 + $0x144] ss:$16 sps:$4 sm:$0xff]  }
 0x253   : > { %v658_v31 = vmul.f32 0.125, %v656_v30  ;;  %v5725_v30 = vld [vmem:[#allocation12 + $0x14c] ss:$16 sps:$4 sm:$0xff]  }
 0x255   : > { %v659_v32 = vsub.f32 %v647_v23, %v658_v31  ;;  %v5712_v23 = vld [vmem:[#allocation12 + $0x100] ss:$16 sps:$4 sm:$0xff]  }
 0x256   : > { %4406 = vmatpush1.bf16.msra.mxu0 %v5712_v23  ;;  %v5724_v31 = vld [vmem:[#allocation12 + $0x140] ss:$16 sps:$4 sm:$0xff]  }
 0x257   : > { %v660_v33 = vmul.f32 %v659_v32, %v659_v32  ;;  %4408 = vmatprep.subr.bf16.mxu0 %v5716_v25 }
 0x259   : > { %v661_v34 = vrot.slane %v660_v33, 4 }
 0x25a   : > { %4410 = vmatpush1.bf16.msra.mxu0 %v5718_v27  ;;  %v6215_v27 = vmov 1966171168  }
 0x25b   : > { %v662_v35 = vadd.f32 %v661_v34, %v660_v33  ;;  %4412 = vmatprep.subr.bf16.mxu0 %v5722_v29  ;;  %v5728_v33 = vld [vmem:[#allocation12 + $0x164] ss:$16 sps:$4 sm:$0xff]   ;;  %v5731_v34 = vld [vmem:[#allocation12 + $0x16c] ss:$16 sps:$4 sm:$0xff]  }
 0x25d   : > { %v663_v36 = vrot.slane %v662_v35, 2 }
 0x25e   : > { %4414 = vmatpush1.bf16.msra.mxu0 %v5724_v31 }
 0x25f   : > { %v664_v37 = vadd.f32 %v663_v36, %v662_v35  ;;  %v5730_v35 = vld [vmem:[#allocation12 + $0x160] ss:$16 sps:$4 sm:$0xff]   ;;  %v5733_v36 = vld [vmem:[#allocation12 + $0x168] ss:$16 sps:$4 sm:$0xff]   ;;  %4416 = vmatprep.subr.bf16.mxu0 %v5728_v33 }
 0x261   : > { %v665_v38 = vrot.slane %v664_v37, 1 }
 0x262   : > { %4418 = vmatpush1.bf16.msra.mxu0 %v5730_v35  ;;  %v835_v35 = vld [vmem:[#allocation11] ss:$2 sm:$0x3] }
 0x263   : > { %v666_v39 = vadd.f32 %v665_v38, %v664_v37  ;;  %v5734_v37 = vld [vmem:[#allocation12 + $0x184] ss:$16 sps:$4 sm:$0xff]   ;;  %v5737_v38 = vld [vmem:[#allocation12 + $0x18c] ss:$16 sps:$4 sm:$0xff]  }
 0x264   : > { %4420 = vmatprep.subr.bf16.mxu0 %v5734_v37  ;;  %v6666_v37 = vsub.s32 1, %v6654_v43 }
 0x265   : > { %v667_v40 = vmul.f32 0.125, %v666_v39  ;;  %v5736_v39 = vld [vmem:[#allocation12 + $0x180] ss:$16 sps:$4 sm:$0xff]  }
 0x266   : > { %4422 = vmatpush1.bf16.msra.mxu0 %v5736_v39 }
 0x267   : > { %v669_v41 = vadd.f32 1e-05, %v667_v40  ;;  %v5739_v40 = vld [vmem:[#allocation12 + $0x188] ss:$16 sps:$4 sm:$0xff]  }
 0x269   : > { %5758 = vrsqrt.f32 %v669_v41  ;;  %v5740_v41 = vld [vmem:[#allocation12 + $0x1a4] ss:$16 sps:$4 sm:$0xff]  }
 0x26a   : > { %4424 = vmatprep.subr.bf16.mxu0 %v5740_v41 }
 0x273   : > { %v5759_v46 = vpop.eup %5758 }
 0x274   : > { %v671_v47 = vmul.f32 %v5759_v46, %v668_v44  ;;  %v5742_v44 = vld [vmem:[#allocation12 + $0x1a0] ss:$16 sps:$4 sm:$0xff]   ;;  %v5745_v46 = vld [vmem:[#allocation12 + $0x1a8] ss:$16 sps:$4 sm:$0xff]  }
 0x275   : > { %4426 = vmatpush1.bf16.msra.mxu0 %v5742_v44 }
 0x276   : > { %v675_v48 = vrot.slane %v671_v47, %v6657_v45  ;;  %v5746_v47 = vld [vmem:[#allocation12 + $0x1c4] ss:$16 sps:$4 sm:$0xff]  }
 0x277   : > { %4428 = vmatprep.subr.bf16.mxu0 %v5746_v47 }
 0x278   : > { %v676_v50 = vmul.f32 %v675_v48, %v659_v32  ;;  %v5727_v32 = vld [vmem:[#allocation12 + $0x148] ss:$16 sps:$4 sm:$0xff]   ;;  %v5749_v48 = vld [vmem:[#allocation12 + $0x1cc] ss:$16 sps:$4 sm:$0xff]  }
 0x27a   : > { %v682_v51 = vadd.f32 %v3814_v49, %v676_v50  ;;  %v5748_v49 = vld [vmem:[#allocation12 + $0x1c0] ss:$16 sps:$4 sm:$0xff]   ;;  %v5751_v50 = vld [vmem:[#allocation12 + $0x1c8] ss:$16 sps:$4 sm:$0xff]  }
 0x27b   : > { %4430 = vmatpush1.bf16.msra.mxu0 %v5748_v49 }
 0x27c   : > { %v683_v52 = vmax.f32 %v682_v51, 0.0  ;;  %v5752_v51 = vld [vmem:[#allocation12 + $0x1e4] ss:$16 sps:$4 sm:$0xff]  }
 0x27d   : > { %4432 = vmatprep.subr.bf16.mxu0 %v5752_v51 }
 0x27e   : > { %797 = vmatmul.mubr.f32.vlgmr.msra.gmra.mrb[0].mxu1 %v683_v52  ;;  %v5754_v52 = vld [vmem:[#allocation12 + $0x1e0] ss:$16 sps:$4 sm:$0xff]  }
 0x27f   : > { %4438 = vmatpush1.bf16.msra.mxu1 %v5667_v56  ;;  %4434 = vmatpush1.bf16.msra.mxu0 %v5754_v52  ;;  %v1382_v52 = vld [vmem:[#allocation15] sm:$0xff] }
 0x280   : > { %4440 = vmatprep.subr.bf16.mxu1 %v5671_v58 }
 0x283   : > { %4442 = vmatpush1.bf16.msra.mxu1 %v5673_v60 }
 0x284   : > { %4444 = vmatprep.subr.bf16.mxu1 %v5677_v62 }
 0x287   : > { %4446 = vmatpush1.bf16.msra.mxu1 %v5679_v0 }
 0x288   : > { %4448 = vmatprep.subr.bf16.mxu1 %v5683_v2 }
 0x28b   : > { %4450 = vmatpush1.bf16.msra.mxu1 %v5685_v4 }
 0x28c   : > { %4452 = vmatprep.subr.bf16.mxu1 %v5689_v6 }
 0x28f   : > { %4454 = vmatpush1.bf16.msra.mxu1 %v5691_v8 }
 0x290   : > { %4456 = vmatprep.subr.bf16.mxu1 %v5695_v10 }
 0x293   : > { %4458 = vmatpush1.bf16.msra.mxu1 %v5697_v12 }
 0x294   : > { %4460 = vmatprep.subr.bf16.mxu1 %v5701_v14 }
 0x297   : > { %4462 = vmatpush1.bf16.msra.mxu1 %v5703_v16 }
 0x298   : > { %4464 = vmatprep.subr.bf16.mxu1 %v5707_v18 }
 0x29b   : > { %4466 = vmatpush1.bf16.msra.mxu1 %v5709_v20 }
 0x29c   : > { %4468 = vmatprep.subr.bf16.mxu1 %v5713_v22 }
 0x29f   : > { %4470 = vmatpush1.bf16.msra.mxu1 %v5715_v24 }
 0x2a0   : > { %4472 = vmatprep.subr.bf16.mxu1 %v5719_v26 }
 0x2a3   : > { %4474 = vmatpush1.bf16.msra.mxu1 %v5721_v28  ;;  %v844_v28 = vunpack.c.l.s4 %v6215_v27 }
 0x2a4   : > { %4476 = vmatprep.subr.bf16.mxu1 %v5725_v30 }
 0x2a5   : > { %v845_v29 = vunpack.c.0.s8 %v844_v28  ;;  %v1422_v28 = vld [vmem:[#allocation15 + $0x140] sm:$0xff] }
 0x2a7   : > { %4478 = vmatpush1.bf16.msra.mxu1 %v5727_v32  ;;  %v6661_v31 = vsub.s32 %v845_v29, %v6654_v43  ;;  %v1426_v29 = vld [vmem:[#allocation15 + $0x160] sm:$0xff] }
 0x2a8   : > { %4480 = vmatprep.subr.bf16.mxu1 %v5731_v34 }
 0x2ab   : > { %4482 = vmatpush1.bf16.msra.mxu1 %v5733_v36 }
 0x2ac   : > { %4484 = vmatprep.subr.bf16.mxu1 %v5737_v38  ;;  %v873_v38 = vld [vmem:[#allocation11 + $0x1] ss:$2 sm:$0x3] }
 0x2ad   : > { %v882_v44 = vrot.slane %v873_v38, %v6666_v37 }
 0x2af   : > { %4486 = vmatpush1.bf16.msra.mxu1 %v5739_v40 }
 0x2b0   : > { %4488 = vmatprep.subr.bf16.mxu1 %v5743_v42  ;;  %v878_v42 = vrot.slane %v873_v38, %v6657_v45  ;;  %v1430_v38 = vld [vmem:[#allocation15 + $0x180] sm:$0xff] }
 0x2b3   : > { %4490 = vmatpush1.bf16.msra.mxu1 %v5745_v46 }
 0x2b4   : > { %4492 = vmatprep.subr.bf16.mxu1 %v5749_v48 }
 0x2b7   : > { %4494 = vmatpush1.bf16.msra.mxu1 %v5751_v50 }
 0x2b8   : > { %4496 = vmatprep.subr.bf16.mxu1 %v5755_v53  ;;  %v1386_v53 = vld [vmem:[#allocation15 + $0x20] sm:$0xff] }
 0x2bb   : > { %4498 = vmatpush1.bf16.msra.mxu1 %v5757_v54  ;;  %v1383_v54 = vld [vmem:[#allocation15 + $0x8] sm:$0xff] }
 0x351   : > { %v798_v55 = vpop.f32.mrb[0].mxu1 }
 0x352   : > { %v803_v56 = vrot.slane %v798_v55, 4  ;;  %v800_v57 = vpop.f32.mrb[1].mxu1 }
 0x353   : > { %v809_v58 = vrot.slane %v800_v57, 4 }
 0x354   : > { %v804_v59 = vadd.f32 %v803_v56, %v798_v55  ;;  %v1387_v56 = vld [vmem:[#allocation15 + $0x28] sm:$0xff] }
 0x355   : > { %v810_v60 = vadd.f32 %v809_v58, %v800_v57  ;;  %v5291_v58 = vcombine.high %v1383_v54, %v1387_v56 }
 0x356   : > { %v805_v61 = vrot.slane %v804_v59, 2 }
 0x357   : > { %v811_v62 = vrot.slane %v810_v60, 2  ;;  %4628 = vmatprep.subr.bf16.mxu1 %v5291_v58  ;;  %v1447_v58 = vld [vmem:[#allocation15 + $0x208] sm:$0xff] }
 0x358   : > { %v806_v63 = vadd.f32 %v805_v61, %v804_v59  ;;  %v5292_v59 = vcombine.low %v1383_v54, %v1387_v56  ;;  %v1394_v61 = vld [vmem:[#allocation15 + $0x60] sm:$0xff] }
 0x359   : > { %v812_v0 = vadd.f32 %v811_v62, %v810_v60  ;;  %v1390_v60 = vld [vmem:[#allocation15 + $0x40] sm:$0xff]  ;;  %v1391_v62 = vld [vmem:[#allocation15 + $0x48] sm:$0xff] }
 0x35a   : > { %v807_v1 = vrot.slane %v806_v63, 1  ;;  %v1446_v56 = vld [vmem:[#allocation15 + $0x200] sm:$0xff] }
 0x35b   : > { %v813_v2 = vrot.slane %v812_v0, 1 }
 0x35c   : > { %v808_v3 = vadd.f32 %v807_v1, %v806_v63  ;;  %v5229_v63 = vcombine.high %v1390_v60, %v1394_v61  ;;  %v5230_v1 = vcombine.low %v1390_v60, %v1394_v61  ;;  %v1451_v60 = vld [vmem:[#allocation15 + $0x228] sm:$0xff] }
 0x35d   : > { %v814_v4 = vadd.f32 %v813_v2, %v812_v0  ;;  %v1395_v0 = vld [vmem:[#allocation15 + $0x68] sm:$0xff] }
 0x35e   : > { %v815_v5 = vmul.f32 0.125, %v808_v3  ;;  %v5293_v2 = vcombine.high %v1391_v62, %v1395_v0  ;;  %v5294_v3 = vcombine.low %v1391_v62, %v1395_v0  ;;  %v5307_v62 = vcombine.high %v1447_v58, %v1451_v60  ;;  %v1454_v0 = vld [vmem:[#allocation15 + $0x240] sm:$0xff] }
 0x35f   : > { %v816_v6 = vmul.f32 0.125, %v814_v4  ;;  %v1398_v4 = vld [vmem:[#allocation15 + $0x80] sm:$0xff] }
 0x360   : > { %v817_v7 = vsub.f32 %v798_v55, %v815_v5  ;;  %v5227_v55 = vcombine.high %v1382_v52, %v1386_v53  ;;  %v1402_v5 = vld [vmem:[#allocation15 + $0xa0] sm:$0xff] }
 0x361   : > { %v818_v8 = vsub.f32 %v800_v57, %v816_v6  ;;  %v5228_v57 = vcombine.low %v1382_v52, %v1386_v53  ;;  %v1399_v6 = vld [vmem:[#allocation15 + $0x88] sm:$0xff] }
 0x362   : > { %v819_v9 = vmul.f32 %v817_v7, %v817_v7  ;;  %4500 = vmatprep.subr.bf16.mxu0 %v5227_v55  ;;  %v1443_v52 = vld [vmem:[#allocation15 + $0x1e8] sm:$0xff] }
 0x363   : > { %v820_v10 = vmul.f32 %v818_v8, %v818_v8 }
 0x364   : > { %v821_v11 = vrot.slane %v819_v9, 4 }
 0x365   : > { %v827_v12 = vrot.slane %v820_v10, 4 }
 0x366   : > { %v822_v13 = vadd.f32 %v821_v11, %v819_v9  ;;  %v5232_v9 = vcombine.low %v1398_v4, %v1402_v5 }
 0x367   : > { %v828_v14 = vadd.f32 %v827_v12, %v820_v10  ;;  %v1406_v12 = vld [vmem:[#allocation15 + $0xc0] sm:$0xff] }
 0x368   : > { %v823_v15 = vrot.slane %v822_v13, 2 }
 0x369   : > { %v829_v16 = vrot.slane %v828_v14, 2 }
 0x36a   : > { %v824_v17 = vadd.f32 %v823_v15, %v822_v13  ;;  %v1410_v13 = vld [vmem:[#allocation15 + $0xe0] sm:$0xff] }
 0x36b   : > { %v830_v18 = vadd.f32 %v829_v16, %v828_v14  ;;  %v1407_v14 = vld [vmem:[#allocation15 + $0xc8] sm:$0xff]  ;;  %v5233_v15 = vcombine.high %v1406_v12, %v1410_v13 }
 0x36c   : > { %v825_v19 = vrot.slane %v824_v17, 1  ;;  %v1411_v16 = vld [vmem:[#allocation15 + $0xe8] sm:$0xff] }
 0x36d   : > { %v831_v20 = vrot.slane %v830_v18, 1 }
 0x36e   : > { %v826_v21 = vadd.f32 %v825_v19, %v824_v17  ;;  %v5234_v17 = vcombine.low %v1406_v12, %v1410_v13  ;;  %v5298_v19 = vcombine.low %v1407_v14, %v1411_v16  ;;  %v1467_v12 = vld [vmem:[#allocation15 + $0x2a8] sm:$0xff] }
 0x36f   : > { %v832_v22 = vadd.f32 %v831_v20, %v830_v18  ;;  %v5297_v18 = vcombine.high %v1407_v14, %v1411_v16  ;;  %v1414_v20 = vld [vmem:[#allocation15 + $0x100] sm:$0xff] }
 0x370   : > { %v833_v23 = vmul.f32 0.125, %v826_v21  ;;  %v1418_v21 = vld [vmem:[#allocation15 + $0x120] sm:$0xff] }
 0x371   : > { %v834_v24 = vmul.f32 0.125, %v832_v22  ;;  %v1415_v22 = vld [vmem:[#allocation15 + $0x108] sm:$0xff]  ;;  %v1470_v16 = vld [vmem:[#allocation15 + $0x2c0] sm:$0xff] }
 0x372   : > { %v836_v25 = vadd.f32 1e-05, %v833_v23  ;;  %v5235_v23 = vcombine.high %v1414_v20, %v1418_v21 }
 0x373   : > { %v837_v26 = vadd.f32 1e-05, %v834_v24  ;;  %v1419_v24 = vld [vmem:[#allocation15 + $0x128] sm:$0xff] }
 0x374   : > { %5760 = vrsqrt.f32 %v836_v25  ;;  %v5236_v25 = vcombine.low %v1414_v20, %v1418_v21  ;;  %v5300_v27 = vcombine.low %v1415_v22, %v1419_v24  ;;  %v1475_v20 = vld [vmem:[#allocation15 + $0x2e8] sm:$0xff] }
 0x375   : > { %5762 = vrsqrt.f32 %v837_v26  ;;  %v5299_v26 = vcombine.high %v1415_v22, %v1419_v24  ;;  %v1478_v24 = vld [vmem:[#allocation15 + $0x300] sm:$0xff] }
 0x37e   : > { %v5761_v30 = vpop.eup %5760 }
 0x37f   : > { %v5763_v32 = vpop.eup %5762 }
 0x380   : > { %v842_v33 = vcombine.low %v5761_v30, %v5763_v32  ;;  %v1423_v30 = vld [vmem:[#allocation15 + $0x148] sm:$0xff]  ;;  %v5237_v32 = vcombine.high %v1422_v28, %v1426_v29 }
 0x382   : > { %v849_v34 = vrot.slane %v842_v33, %v6661_v31  ;;  %v1427_v33 = vld [vmem:[#allocation15 + $0x168] sm:$0xff] }
 0x384   : > { %v856_v36 = vrot.slane %v849_v34, %v6661_v31  ;;  %v5238_v34 = vcombine.low %v1422_v28, %v1426_v29  ;;  %v1483_v28 = vld [vmem:[#allocation15 + $0x328] sm:$0xff] }
 0x386   : > { %v858_v39 = vmul.f32 %v856_v36, %v835_v35  ;;  %v5301_v35 = vcombine.high %v1423_v30, %v1427_v33  ;;  %v5302_v36 = vcombine.low %v1423_v30, %v1427_v33  ;;  %v1486_v33 = vld [vmem:[#allocation15 + $0x340] sm:$0xff] }
 0x388   : > { %v863_v40 = vrot.slane %v858_v39, %v6657_v45  ;;  %v867_v41 = vrot.slane %v858_v39, %v6666_v37  ;;  %v1434_v39 = vld [vmem:[#allocation15 + $0x1a0] sm:$0xff] }
 0x38a   : > { %v871_v46 = vmul.f32 %v867_v41, %v818_v8  ;;  %v870_v47 = vmul.f32 %v863_v40, %v817_v7  ;;  %v5231_v7 = vcombine.high %v1398_v4, %v1402_v5  ;;  %v1403_v8 = vld [vmem:[#allocation15 + $0xa8] sm:$0xff]  ;;  %v5239_v41 = vcombine.high %v1430_v38, %v1434_v39 }
 0x38b   : > { %v5295_v10 = vcombine.high %v1399_v6, %v1403_v8  ;;  %v5296_v11 = vcombine.low %v1399_v6, %v1403_v8  ;;  %v1431_v40 = vld [vmem:[#allocation15 + $0x188] sm:$0xff]  ;;  %v1462_v8 = vld [vmem:[#allocation15 + $0x280] sm:$0xff] }
 0x38c   : > { %v886_v48 = vadd.f32 %v882_v44, %v871_v46  ;;  %v885_v49 = vadd.f32 %v878_v42, %v870_v47  ;;  %v1435_v42 = vld [vmem:[#allocation15 + $0x1a8] sm:$0xff]  ;;  %v5240_v44 = vcombine.low %v1430_v38, %v1434_v39 }
 0x38d   : > { %v5303_v46 = vcombine.high %v1431_v40, %v1435_v42  ;;  %v5304_v47 = vcombine.low %v1431_v40, %v1435_v42  ;;  %v1459_v4 = vld [vmem:[#allocation15 + $0x268] sm:$0xff]  ;;  %v1494_v42 = vld [vmem:[#allocation15 + $0x380] sm:$0xff] }
 0x38e   : > { %v888_v50 = vmax.f32 %v886_v48, 0.0  ;;  %v887_v51 = vmax.f32 %v885_v49, 0.0  ;;  %v1438_v48 = vld [vmem:[#allocation15 + $0x1c0] sm:$0xff]  ;;  %v1491_v38 = vld [vmem:[#allocation15 + $0x368] sm:$0xff] }
 0x38f   : > { %v1442_v49 = vld [vmem:[#allocation15 + $0x1e0] sm:$0xff] }
 0x390   : > { %1145 = vmatprep.mubr.f32.mxu0 %v888_v50  ;;  %1216 = vmatprep.mubr.f32.mxu1 %v888_v50  ;;  %v1439_v50 = vld [vmem:[#allocation15 + $0x1c8] sm:$0xff]  ;;  %v5242_v53 = vcombine.low %v1438_v48, %v1442_v49 }
 0x391   : > { %1146 = vmatmul.mubr.f32.vlgmr.msra.gmra.mrb[2].mxu0 %v887_v51  ;;  %1217 = vmatmul.mubr.f32.vlgmr.msra.gmra.mrb[2].mxu1 %v887_v51  ;;  %v5241_v51 = vcombine.high %v1438_v48, %v1442_v49  ;;  %v5305_v54 = vcombine.high %v1439_v50, %v1443_v52  ;;  %v5306_v55 = vcombine.low %v1439_v50, %v1443_v52  ;;  %v1499_v48 = vld [vmem:[#allocation15 + $0x3a8] sm:$0xff]  ;;  %v1502_v52 = vld [vmem:[#allocation15 + $0x3c0] sm:$0xff] }
 0x392   : > { %4502 = vmatpush1.bf16.msra.mxu0 %v5228_v57  ;;  %4630 = vmatpush1.bf16.msra.mxu1 %v5292_v59  ;;  %v1450_v57 = vld [vmem:[#allocation15 + $0x220] sm:$0xff] }
 0x393   : > { %4504 = vmatprep.subr.bf16.mxu0 %v5229_v63  ;;  %4632 = vmatprep.subr.bf16.mxu1 %v5293_v2  ;;  %v5243_v59 = vcombine.high %v1446_v56, %v1450_v57  ;;  %v5244_v61 = vcombine.low %v1446_v56, %v1450_v57  ;;  %v5308_v63 = vcombine.low %v1447_v58, %v1451_v60  ;;  %v1455_v2 = vld [vmem:[#allocation15 + $0x248] sm:$0xff]  ;;  %v6672_v60 = vld [vmem:[#allocation15 + $0x400] sm:$0xff] }
 0x394   : > { %v5309_v6 = vcombine.high %v1455_v2, %v1459_v4  ;;  %v1507_v56 = vld [vmem:[#allocation15 + $0x3e8] sm:$0xff] }
 0x396   : > { %4506 = vmatpush1.bf16.msra.mxu0 %v5230_v1  ;;  %4634 = vmatpush1.bf16.msra.mxu1 %v5294_v3  ;;  %v1458_v1 = vld [vmem:[#allocation15 + $0x260] sm:$0xff] }
 0x397   : > { %4508 = vmatprep.subr.bf16.mxu0 %v5231_v7  ;;  %4636 = vmatprep.subr.bf16.mxu1 %v5295_v10  ;;  %v5245_v3 = vcombine.high %v1454_v0, %v1458_v1  ;;  %v5246_v5 = vcombine.low %v1454_v0, %v1458_v1  ;;  %v5310_v7 = vcombine.low %v1455_v2, %v1459_v4  ;;  %v1463_v10 = vld [vmem:[#allocation15 + $0x288] sm:$0xff] }
 0x398   : > { %v5311_v14 = vcombine.high %v1463_v10, %v1467_v12  ;;  %v6680_v0 = vld [vmem:[#allocation15 + $0x428] sm:$0xff] }
 0x39a   : > { %4510 = vmatpush1.bf16.msra.mxu0 %v5232_v9  ;;  %4638 = vmatpush1.bf16.msra.mxu1 %v5296_v11  ;;  %v1466_v9 = vld [vmem:[#allocation15 + $0x2a0] sm:$0xff] }
 0x39b   : > { %4512 = vmatprep.subr.bf16.mxu0 %v5233_v15  ;;  %4640 = vmatprep.subr.bf16.mxu1 %v5297_v18  ;;  %v5247_v11 = vcombine.high %v1462_v8, %v1466_v9  ;;  %v5248_v13 = vcombine.low %v1462_v8, %v1466_v9  ;;  %v5312_v15 = vcombine.low %v1463_v10, %v1467_v12  ;;  %v1471_v18 = vld [vmem:[#allocation15 + $0x2c8] sm:$0xff] }
 0x39c   : > { %v5313_v22 = vcombine.high %v1471_v18, %v1475_v20 }
 0x39e   : > { %4514 = vmatpush1.bf16.msra.mxu0 %v5234_v17  ;;  %4642 = vmatpush1.bf16.msra.mxu1 %v5298_v19  ;;  %v1474_v17 = vld [vmem:[#allocation15 + $0x2e0] sm:$0xff] }
 0x39f   : > { %4516 = vmatprep.subr.bf16.mxu0 %v5235_v23  ;;  %4644 = vmatprep.subr.bf16.mxu1 %v5299_v26  ;;  %v5249_v19 = vcombine.high %v1470_v16, %v1474_v17  ;;  %v5250_v21 = vcombine.low %v1470_v16, %v1474_v17  ;;  %v5314_v23 = vcombine.low %v1471_v18, %v1475_v20  ;;  %v1479_v26 = vld [vmem:[#allocation15 + $0x308] sm:$0xff] }
 0x3a0   : > { %v5315_v30 = vcombine.high %v1479_v26, %v1483_v28 }
 0x3a2   : > { %4518 = vmatpush1.bf16.msra.mxu0 %v5236_v25  ;;  %4646 = vmatpush1.bf16.msra.mxu1 %v5300_v27  ;;  %v1482_v25 = vld [vmem:[#allocation15 + $0x320] sm:$0xff] }
 0x3a3   : > { %4520 = vmatprep.subr.bf16.mxu0 %v5237_v32  ;;  %4648 = vmatprep.subr.bf16.mxu1 %v5301_v35  ;;  %v5251_v27 = vcombine.high %v1478_v24, %v1482_v25  ;;  %v5252_v29 = vcombine.low %v1478_v24, %v1482_v25  ;;  %v5316_v32 = vcombine.low %v1479_v26, %v1483_v28  ;;  %v1487_v35 = vld [vmem:[#allocation15 + $0x348] sm:$0xff] }
 0x3a4   : > { %v5317_v40 = vcombine.high %v1487_v35, %v1491_v38 }
 0x3a6   : > { %4522 = vmatpush1.bf16.msra.mxu0 %v5238_v34  ;;  %4650 = vmatpush1.bf16.msra.mxu1 %v5302_v36  ;;  %v1490_v34 = vld [vmem:[#allocation15 + $0x360] sm:$0xff] }
 0x3a7   : > { %4524 = vmatprep.subr.bf16.mxu0 %v5239_v41  ;;  %4652 = vmatprep.subr.bf16.mxu1 %v5303_v46  ;;  %v5253_v36 = vcombine.high %v1486_v33, %v1490_v34  ;;  %v5254_v39 = vcombine.low %v1486_v33, %v1490_v34  ;;  %v5318_v41 = vcombine.low %v1487_v35, %v1491_v38  ;;  %v1495_v46 = vld [vmem:[#allocation15 + $0x388] sm:$0xff] }
 0x3a8   : > { %v5319_v50 = vcombine.high %v1495_v46, %v1499_v48 }
 0x3aa   : > { %4526 = vmatpush1.bf16.msra.mxu0 %v5240_v44  ;;  %4654 = vmatpush1.bf16.msra.mxu1 %v5304_v47  ;;  %v1498_v44 = vld [vmem:[#allocation15 + $0x3a0] sm:$0xff] }
 0x3ab   : > { %4528 = vmatprep.subr.bf16.mxu0 %v5241_v51  ;;  %4656 = vmatprep.subr.bf16.mxu1 %v5305_v54  ;;  %v5255_v47 = vcombine.high %v1494_v42, %v1498_v44  ;;  %v5256_v49 = vcombine.low %v1494_v42, %v1498_v44  ;;  %v5320_v51 = vcombine.low %v1495_v46, %v1499_v48 }
 0x3ae   : > { %4530 = vmatpush1.bf16.msra.mxu0 %v5242_v53  ;;  %4658 = vmatpush1.bf16.msra.mxu1 %v5306_v55  ;;  %v1506_v53 = vld [vmem:[#allocation15 + $0x3e0] sm:$0xff]  ;;  %v1503_v55 = vld [vmem:[#allocation15 + $0x3c8] sm:$0xff] }
 0x3af   : > { %4532 = vmatprep.subr.bf16.mxu0 %v5243_v59  ;;  %4660 = vmatprep.subr.bf16.mxu1 %v5307_v62  ;;  %v5257_v54 = vcombine.high %v1502_v52, %v1506_v53  ;;  %v5258_v57 = vcombine.low %v1502_v52, %v1506_v53  ;;  %v5321_v58 = vcombine.high %v1503_v55, %v1507_v56  ;;  %v6676_v62 = vld [vmem:[#allocation15 + $0x408] sm:$0xff] }
 0x3b0   : > { %v5322_v59 = vcombine.low %v1503_v55, %v1507_v56  ;;  %v5323_v2 = vcombine.high %v6676_v62, %v6680_v0 }
 0x3b2   : > { %4534 = vmatpush1.bf16.msra.mxu0 %v5244_v61  ;;  %4662 = vmatpush1.bf16.msra.mxu1 %v5308_v63  ;;  %v6674_v61 = vld [vmem:[#allocation15 + $0x420] sm:$0xff] }
 0x3b3   : > { %4536 = vmatprep.subr.bf16.mxu0 %v5245_v3  ;;  %4664 = vmatprep.subr.bf16.mxu1 %v5309_v6  ;;  %v5259_v63 = vcombine.high %v6672_v60, %v6674_v61  ;;  %v5260_v1 = vcombine.low %v6672_v60, %v6674_v61  ;;  %v5324_v3 = vcombine.low %v6676_v62, %v6680_v0 }
 0x3b6   : > { %4538 = vmatpush1.bf16.msra.mxu0 %v5246_v5  ;;  %4666 = vmatpush1.bf16.msra.mxu1 %v5310_v7 }
 0x3b7   : > { %4540 = vmatprep.subr.bf16.mxu0 %v5247_v11  ;;  %4668 = vmatprep.subr.bf16.mxu1 %v5311_v14 }
 0x3ba   : > { %4542 = vmatpush1.bf16.msra.mxu0 %v5248_v13  ;;  %4670 = vmatpush1.bf16.msra.mxu1 %v5312_v15 }
 0x3bb   : > { %4544 = vmatprep.subr.bf16.mxu0 %v5249_v19  ;;  %4672 = vmatprep.subr.bf16.mxu1 %v5313_v22 }
 0x3be   : > { %4546 = vmatpush1.bf16.msra.mxu0 %v5250_v21  ;;  %4674 = vmatpush1.bf16.msra.mxu1 %v5314_v23 }
 0x3bf   : > { %4548 = vmatprep.subr.bf16.mxu0 %v5251_v27  ;;  %4676 = vmatprep.subr.bf16.mxu1 %v5315_v30 }
 0x3c2   : > { %4550 = vmatpush1.bf16.msra.mxu0 %v5252_v29  ;;  %4678 = vmatpush1.bf16.msra.mxu1 %v5316_v32 }
 0x3c3   : > { %4552 = vmatprep.subr.bf16.mxu0 %v5253_v36  ;;  %4680 = vmatprep.subr.bf16.mxu1 %v5317_v40 }
 0x3c6   : > { %4554 = vmatpush1.bf16.msra.mxu0 %v5254_v39  ;;  %4682 = vmatpush1.bf16.msra.mxu1 %v5318_v41 }
 0x3c7   : > { %4556 = vmatprep.subr.bf16.mxu0 %v5255_v47  ;;  %4684 = vmatprep.subr.bf16.mxu1 %v5319_v50 }
 0x3ca   : > { %4558 = vmatpush1.bf16.msra.mxu0 %v5256_v49  ;;  %4686 = vmatpush1.bf16.msra.mxu1 %v5320_v51 }
 0x3cb   : > { %4560 = vmatprep.subr.bf16.mxu0 %v5257_v54  ;;  %4688 = vmatprep.subr.bf16.mxu1 %v5321_v58 }
 0x3ce   : > { %4562 = vmatpush1.bf16.msra.mxu0 %v5258_v57  ;;  %4690 = vmatpush1.bf16.msra.mxu1 %v5322_v59 }
 0x3cf   : > { %4564 = vmatprep.subr.bf16.mxu0 %v5259_v63  ;;  %4692 = vmatprep.subr.bf16.mxu1 %v5323_v2 }
 0x464   : > { %v1147_v4 = vpop.f32.mrb[2].mxu0  ;;  %v1218_v5 = vpop.f32.mrb[2].mxu1 }
 0x465   : > { %v1223_v6 = vrot.slane %v1147_v4, 4  ;;  %v1235_v7 = vrot.slane %v1218_v5, 4  ;;  %v1149_v8 = vpop.f32.mrb[3].mxu0  ;;  %v1220_v9 = vpop.f32.mrb[3].mxu1 }
 0x466   : > { %v1229_v10 = vrot.slane %v1149_v8, 4  ;;  %v1241_v11 = vrot.slane %v1220_v9, 4 }
 0x467   : > { %v1224_v12 = vadd.f32 %v1223_v6, %v1147_v4  ;;  %v1236_v13 = vadd.f32 %v1235_v7, %v1218_v5 }
 0x468   : > { %v1230_v14 = vadd.f32 %v1229_v10, %v1149_v8  ;;  %v1242_v15 = vadd.f32 %v1241_v11, %v1220_v9 }
 0x469   : > { %v1225_v16 = vrot.slane %v1224_v12, 2  ;;  %v1237_v17 = vrot.slane %v1236_v13, 2 }
 0x46a   : > { %v1231_v18 = vrot.slane %v1230_v14, 2  ;;  %v1243_v19 = vrot.slane %v1242_v15, 2 }
 0x46b   : > { %v1226_v20 = vadd.f32 %v1225_v16, %v1224_v12  ;;  %v1238_v21 = vadd.f32 %v1237_v17, %v1236_v13 }
 0x46c   : > { %v1232_v22 = vadd.f32 %v1231_v18, %v1230_v14  ;;  %v1244_v23 = vadd.f32 %v1243_v19, %v1242_v15 }
 0x46d   : > { %v1227_v24 = vrot.slane %v1226_v20, 1  ;;  %v1239_v25 = vrot.slane %v1238_v21, 1 }
 0x46e   : > { %v1233_v26 = vrot.slane %v1232_v22, 1  ;;  %v1245_v27 = vrot.slane %v1244_v23, 1 }
 0x46f   : > { %v1228_v28 = vadd.f32 %v1227_v24, %v1226_v20  ;;  %v1240_v29 = vadd.f32 %v1239_v25, %v1238_v21 }
 0x470   : > { %v1234_v30 = vadd.f32 %v1233_v26, %v1232_v22  ;;  %v1246_v32 = vadd.f32 %v1245_v27, %v1244_v23 }
 0x471   : > { %v1247_v33 = vmul.f32 0.125, %v1228_v28  ;;  %v1249_v34 = vmul.f32 0.125, %v1240_v29 }
 0x472   : > { %v1248_v35 = vmul.f32 0.125, %v1234_v30  ;;  %v1250_v36 = vmul.f32 0.125, %v1246_v32  ;;  %v1287_v32 = vld [vmem:[#allocation14] ss:$2 sm:$0xf] }
 0x473   : > { %v6688_v38 = vsub.f32 %v1147_v4, %v1247_v33  ;;  %v6690_v39 = vsub.f32 %v1218_v5, %v1249_v34  ;;  %v6708_v34 = vsub.s32 3, %v6654_v43 }
 0x474   : > { %v6692_v40 = vsub.f32 %v1149_v8, %v1248_v35  ;;  %v6694_v41 = vsub.f32 %v1220_v9, %v1250_v36  ;;  %v1352_v35 = vld [vmem:[#allocation14 + $0x1] ss:$2 sm:$0xf]  ;;  %v6711_v36 = vsub.s32 2, %v6654_v43 }
 0x475   : > { %v1255_v42 = vmul.f32 %v6688_v38, %v6688_v38  ;;  %v1257_v44 = vmul.f32 %v6690_v39, %v6690_v39 }
 0x476   : > { %v1256_v46 = vmul.f32 %v6692_v40, %v6692_v40  ;;  %v1258_v47 = vmul.f32 %v6694_v41, %v6694_v41 }
 0x477   : > { %v1259_v48 = vrot.slane %v1255_v42, 4  ;;  %v1271_v49 = vrot.slane %v1257_v44, 4 }
 0x478   : > { %v1265_v50 = vrot.slane %v1256_v46, 4  ;;  %v1277_v51 = vrot.slane %v1258_v47, 4 }
 0x479   : > { %v1260_v52 = vadd.f32 %v1259_v48, %v1255_v42  ;;  %v1272_v53 = vadd.f32 %v1271_v49, %v1257_v44  ;;  %v1361_v44 = vrot.slane %v1352_v35, %v6666_v37 }
 0x47a   : > { %v1266_v54 = vadd.f32 %v1265_v50, %v1256_v46  ;;  %v1278_v55 = vadd.f32 %v1277_v51, %v1258_v47  ;;  %v1357_v46 = vrot.slane %v1352_v35, %v6657_v45  ;;  %v1365_v47 = vrot.slane %v1352_v35, %v6711_v36 }
 0x47b   : > { %v1261_v56 = vrot.slane %v1260_v52, 2  ;;  %v1273_v57 = vrot.slane %v1272_v53, 2 }
 0x47c   : > { %v1267_v58 = vrot.slane %v1266_v54, 2  ;;  %v1279_v59 = vrot.slane %v1278_v55, 2 }
 0x47d   : > { %v1262_v63 = vadd.f32 %v1261_v56, %v1260_v52  ;;  %v1274_v2 = vadd.f32 %v1273_v57, %v1272_v53  ;;  %v1369_v52 = vrot.slane %v1352_v35, %v6708_v34 }
 0x47e   : > { %v1268_v4 = vadd.f32 %v1267_v58, %v1266_v54  ;;  %v1280_v5 = vadd.f32 %v1279_v59, %v1278_v55  ;;  %v1518_v59 = vld [vmem:[#allocation15 + $0x440] sm:$0xff] }
 0x47f   : > { %v1263_v6 = vrot.slane %v1262_v63, 1  ;;  %v1275_v7 = vrot.slane %v1274_v2, 1 }
 0x480   : > { %v1269_v8 = vrot.slane %v1268_v4, 1  ;;  %v1281_v9 = vrot.slane %v1280_v5, 1 }
 0x481   : > { %v1264_v10 = vadd.f32 %v1263_v6, %v1262_v63  ;;  %v1276_v11 = vadd.f32 %v1275_v7, %v1274_v2  ;;  %v1523_v6 = vld [vmem:[#allocation15 + $0x468] sm:$0xff] }
 0x482   : > { %v1270_v12 = vadd.f32 %v1269_v8, %v1268_v4  ;;  %v1282_v13 = vadd.f32 %v1281_v9, %v1280_v5  ;;  %v1522_v4 = vld [vmem:[#allocation15 + $0x460] sm:$0xff]  ;;  %v1519_v5 = vld [vmem:[#allocation15 + $0x448] sm:$0xff] }
 0x483   : > { %v1283_v14 = vmul.f32 0.125, %v1264_v10  ;;  %v1285_v15 = vmul.f32 0.125, %v1276_v11  ;;  %v1527_v9 = vld [vmem:[#allocation15 + $0x488] sm:$0xff] }
 0x484   : > { %v1284_v16 = vmul.f32 0.125, %v1270_v12  ;;  %v1286_v17 = vmul.f32 0.125, %v1282_v13  ;;  %v1531_v10 = vld [vmem:[#allocation15 + $0x4a8] sm:$0xff]  ;;  %v5262_v12 = vcombine.low %v1518_v59, %v1522_v4  ;;  %v5326_v13 = vcombine.low %v1519_v5, %v1523_v6 }
 0x485   : > { %v1288_v18 = vadd.f32 1e-05, %v1283_v14  ;;  %v1290_v19 = vadd.f32 1e-05, %v1285_v15  ;;  %v5327_v15 = vcombine.high %v1527_v9, %v1531_v10  ;;  %v5328_v61 = vcombine.low %v1527_v9, %v1531_v10  ;;  %v1582_v9 = vld [vmem:[#allocation15 + $0x640] sm:$0xff] }
 0x486   : > { %v1289_v20 = vadd.f32 1e-05, %v1284_v16  ;;  %v1291_v21 = vadd.f32 1e-05, %v1286_v17  ;;  %v1534_v16 = vld [vmem:[#allocation15 + $0x4c0] sm:$0xff] }
 0x487   : > { %5764 = vrsqrt.f32 %v1288_v18  ;;  %v1538_v17 = vld [vmem:[#allocation15 + $0x4e0] sm:$0xff]  ;;  %v1535_v18 = vld [vmem:[#allocation15 + $0x4c8] sm:$0xff] }
 0x488   : > { %5766 = vrsqrt.f32 %v1290_v19  ;;  %v1539_v19 = vld [vmem:[#allocation15 + $0x4e8] sm:$0xff]  ;;  %v5265_v62 = vcombine.high %v1534_v16, %v1538_v17  ;;  %v1586_v10 = vld [vmem:[#allocation15 + $0x660] sm:$0xff] }
 0x489   : > { %5768 = vrsqrt.f32 %v1289_v20  ;;  %v5329_v0 = vcombine.high %v1535_v18, %v1539_v19  ;;  %v1543_v20 = vld [vmem:[#allocation15 + $0x508] sm:$0xff] }
 0x48a   : > { %5770 = vrsqrt.f32 %v1291_v21  ;;  %v1547_v21 = vld [vmem:[#allocation15 + $0x528] sm:$0xff] }
 0x491   : > { %v5765_v22 = vpop.eup %5764 }
 0x492   : > { %v5767_v23 = vpop.eup %5766 }
 0x493   : > { %v5769_v24 = vpop.eup %5768 }
 0x494   : > { %v5771_v25 = vpop.eup %5770  ;;  %v1300_v26 = vcombine.low %v5765_v22, %v5769_v24  ;;  %v5266_v22 = vcombine.low %v1534_v16, %v1538_v17  ;;  %v5277_v16 = vcombine.high %v1582_v9, %v1586_v10 }
 0x495   : > { %v1301_v27 = vcombine.low %v5767_v23, %v5771_v25  ;;  %v5330_v23 = vcombine.low %v1535_v18, %v1539_v19  ;;  %v5331_v25 = vcombine.high %v1543_v20, %v1547_v21  ;;  %v1590_v18 = vld [vmem:[#allocation15 + $0x680] sm:$0xff] }
 0x496   : > { %v1308_v28 = vrot.slane %v1300_v26, %v6661_v31  ;;  %v1550_v26 = vld [vmem:[#allocation15 + $0x540] sm:$0xff] }
 0x497   : > { %v1315_v29 = vrot.slane %v1301_v27, %v6661_v31  ;;  %v1554_v27 = vld [vmem:[#allocation15 + $0x560] sm:$0xff] }
 0x498   : > { %v1594_v19 = vld [vmem:[#allocation15 + $0x6a0] sm:$0xff] }
 0x499   : > { %v1316_v30 = vcombine.low %v1308_v28, %v1315_v29  ;;  %v1551_v28 = vld [vmem:[#allocation15 + $0x548] sm:$0xff] }
 0x49a   : > { %v1555_v29 = vld [vmem:[#allocation15 + $0x568] sm:$0xff] }
 0x49b   : > { %v1323_v33 = vrot.slane %v1316_v30, %v6661_v31  ;;  %v5333_v35 = vcombine.high %v1551_v28, %v1555_v29 }
 0x49d   : > { %v1325_v42 = vmul.f32 %v1323_v33, %v1287_v32  ;;  %v5332_v32 = vcombine.low %v1543_v20, %v1547_v21  ;;  %v5269_v33 = vcombine.high %v1550_v26, %v1554_v27  ;;  %v1598_v20 = vld [vmem:[#allocation15 + $0x6c0] sm:$0xff] }
 0x49e   : > { %v1602_v21 = vld [vmem:[#allocation15 + $0x6e0] sm:$0xff] }
 0x49f   : > { %v1342_v48 = vrot.slane %v1325_v42, %v6708_v34  ;;  %v1334_v49 = vrot.slane %v1325_v42, %v6666_v37  ;;  %v1330_v50 = vrot.slane %v1325_v42, %v6657_v45  ;;  %v1338_v51 = vrot.slane %v1325_v42, %v6711_v36  ;;  %v1558_v42 = vld [vmem:[#allocation15 + $0x580] sm:$0xff] }
 0x4a1   : > { %v1350_v53 = vmul.f32 %v1342_v48, %v6694_v41  ;;  %v1348_v54 = vmul.f32 %v1334_v49, %v6692_v40  ;;  %v1347_v55 = vmul.f32 %v1330_v50, %v6688_v38  ;;  %v1349_v56 = vmul.f32 %v1338_v51, %v6690_v39  ;;  %v1526_v41 = vld [vmem:[#allocation15 + $0x480] sm:$0xff] }
 0x4a2   : > { %v5261_v38 = vcombine.high %v1518_v59, %v1522_v4  ;;  %v5325_v39 = vcombine.high %v1519_v5, %v1523_v6  ;;  %v1530_v40 = vld [vmem:[#allocation15 + $0x4a0] sm:$0xff]  ;;  %v5270_v48 = vcombine.low %v1550_v26, %v1554_v27  ;;  %v5334_v49 = vcombine.low %v1551_v28, %v1555_v29  ;;  %v1575_v5 = vld [vmem:[#allocation15 + $0x608] sm:$0xff] }
 0x4a3   : > { %v1375_v57 = vadd.f32 %v1361_v44, %v1348_v54  ;;  %v1374_v58 = vadd.f32 %v1357_v46, %v1347_v55  ;;  %v6725_v63 = vadd.f32 %v1365_v47, %v1349_v56  ;;  %v1377_v2 = vadd.f32 %v1369_v52, %v1350_v53  ;;  %v1562_v44 = vld [vmem:[#allocation15 + $0x5a0] sm:$0xff]  ;;  %v1559_v46 = vld [vmem:[#allocation15 + $0x588] sm:$0xff] }
 0x4a4   : > { %v5263_v14 = vcombine.high %v1526_v41, %v1530_v40  ;;  %v5264_v60 = vcombine.low %v1526_v41, %v1530_v40  ;;  %v1563_v47 = vld [vmem:[#allocation15 + $0x5a8] sm:$0xff]  ;;  %v5271_v50 = vcombine.high %v1558_v42, %v1562_v44  ;;  %v1566_v52 = vld [vmem:[#allocation15 + $0x5c0] sm:$0xff]  ;;  %v5272_v56 = vcombine.low %v1558_v42, %v1562_v44 }
 0x4a5   : > { %v6727_v7 = vmax.f32 %v1375_v57, 0.0  ;;  %v6729_v8 = vmax.f32 %v1374_v58, 0.0  ;;  %v6735_v11 = vmax.f32 %v1377_v2, 0.0  ;;  %v5335_v51 = vcombine.high %v1559_v46, %v1563_v47  ;;  %v1570_v53 = vld [vmem:[#allocation15 + $0x5e0] sm:$0xff]  ;;  %v1567_v54 = vld [vmem:[#allocation15 + $0x5c8] sm:$0xff] }
 0x4a6   : > { %v1571_v55 = vld [vmem:[#allocation15 + $0x5e8] sm:$0xff]  ;;  %v5336_v57 = vcombine.low %v1559_v46, %v1563_v47  ;;  %v5273_v58 = vcombine.high %v1566_v52, %v1570_v53  ;;  %v1574_v2 = vld [vmem:[#allocation15 + $0x600] sm:$0xff]  ;;  %v5274_v41 = vcombine.low %v1566_v52, %v1570_v53  ;;  %v5281_v26 = vcombine.high %v1598_v20, %v1602_v21 }
 0x4a7   : > { %2214 = vmatprep.mubr.f32.mxu0 %v6727_v7  ;;  %2356 = vmatprep.mubr.f32.mxu1 %v6727_v7  ;;  %v5337_v59 = vcombine.high %v1567_v54, %v1571_v55  ;;  %v1578_v4 = vld [vmem:[#allocation15 + $0x620] sm:$0xff]  ;;  %v1579_v6 = vld [vmem:[#allocation15 + $0x628] sm:$0xff] }
 0x4a8   : > { %2215 = vmatmul.mubr.f32.vlgmr.msra.gmra.mrb[4].mxu0 %v6729_v8  ;;  %2357 = vmatmul.mubr.f32.vlgmr.msra.gmra.mrb[4].mxu1 %v6729_v8  ;;  %v5339_v40 = vcombine.high %v1575_v5, %v1579_v6  ;;  %v1606_v28 = vld [vmem:[#allocation15 + $0x700] sm:$0xff] }
 0x4a9   : > { %4566 = vmatpush1.bf16.msra.mxu0 %v5260_v1  ;;  %4694 = vmatpush1.bf16.msra.mxu1 %v5324_v3  ;;  %v1542_v1 = vld [vmem:[#allocation15 + $0x500] sm:$0xff] }
 0x4aa   : > { %2285 = vmatprep.mubr.f32.mxu0 %v6735_v11  ;;  %2427 = vmatprep.mubr.f32.mxu1 %v6735_v11  ;;  %v1546_v3 = vld [vmem:[#allocation15 + $0x520] sm:$0xff] }
 0x4ab   : > { %4568 = vmatprep.subr.bf16.mxu0 %v5261_v38  ;;  %4696 = vmatprep.subr.bf16.mxu1 %v5325_v39  ;;  %v5267_v24 = vcombine.high %v1542_v1, %v1546_v3  ;;  %v5268_v30 = vcombine.low %v1542_v1, %v1546_v3  ;;  %v5338_v38 = vcombine.low %v1567_v54, %v1571_v55  ;;  %v1610_v29 = vld [vmem:[#allocation15 + $0x720] sm:$0xff] }
 0x4ac   : > { %v5275_v39 = vcombine.high %v1574_v2, %v1578_v4  ;;  %v5279_v1 = vcombine.high %v1590_v18, %v1594_v19  ;;  %v5283_v42 = vcombine.high %v1606_v28, %v1610_v29  ;;  %v1614_v46 = vld [vmem:[#allocation15 + $0x740] sm:$0xff] }
 0x4ad   : > { %4570 = vmatpush1.bf16.msra.mxu0 %v5262_v12  ;;  %4698 = vmatpush1.bf16.msra.mxu1 %v5326_v13  ;;  %v1583_v12 = vld [vmem:[#allocation15 + $0x648] sm:$0xff]  ;;  %v1618_v47 = vld [vmem:[#allocation15 + $0x760] sm:$0xff] }
 0x4ae   : > { %4572 = vmatprep.subr.bf16.mxu0 %v5263_v14  ;;  %4700 = vmatprep.subr.bf16.mxu1 %v5327_v15  ;;  %v1587_v13 = vld [vmem:[#allocation15 + $0x668] sm:$0xff]  ;;  %v5276_v14 = vcombine.low %v1574_v2, %v1578_v4  ;;  %v5340_v15 = vcombine.low %v1575_v5, %v1579_v6  ;;  %v5285_v52 = vcombine.high %v1614_v46, %v1618_v47  ;;  %v1622_v54 = vld [vmem:[#allocation15 + $0x780] sm:$0xff] }
 0x4af   : > { %v5341_v17 = vcombine.high %v1583_v12, %v1587_v13  ;;  %v1626_v55 = vld [vmem:[#allocation15 + $0x7a0] sm:$0xff] }
 0x4b0   : > { %v5287_v2 = vcombine.high %v1622_v54, %v1626_v55  ;;  %v1630_v5 = vld [vmem:[#allocation15 + $0x7c0] sm:$0xff] }
 0x4b1   : > { %4574 = vmatpush1.bf16.msra.mxu0 %v5264_v60  ;;  %4702 = vmatpush1.bf16.msra.mxu1 %v5328_v61  ;;  %v1591_v60 = vld [vmem:[#allocation15 + $0x688] sm:$0xff]  ;;  %v1634_v6 = vld [vmem:[#allocation15 + $0x7e0] sm:$0xff] }
 0x4b2   : > { %4576 = vmatprep.subr.bf16.mxu0 %v5265_v62  ;;  %4704 = vmatprep.subr.bf16.mxu1 %v5329_v0  ;;  %v1595_v61 = vld [vmem:[#allocation15 + $0x6a8] sm:$0xff]  ;;  %v5278_v62 = vcombine.low %v1582_v9, %v1586_v10  ;;  %v5342_v0 = vcombine.low %v1583_v12, %v1587_v13  ;;  %v5289_v9 = vcombine.high %v1630_v5, %v1634_v6  ;;  %v1384_v12 = vld [vmem:[#allocation15 + $0x10] sm:$0xff] }
 0x4b3   : > { %v5343_v3 = vcombine.high %v1591_v60, %v1595_v61  ;;  %v1388_v13 = vld [vmem:[#allocation15 + $0x30] sm:$0xff] }
 0x4b5   : > { %4578 = vmatpush1.bf16.msra.mxu0 %v5266_v22  ;;  %4706 = vmatpush1.bf16.msra.mxu1 %v5330_v23  ;;  %v1599_v22 = vld [vmem:[#allocation15 + $0x6c8] sm:$0xff] }
 0x4b6   : > { %4580 = vmatprep.subr.bf16.mxu0 %v5267_v24  ;;  %4708 = vmatprep.subr.bf16.mxu1 %v5331_v25  ;;  %v1603_v23 = vld [vmem:[#allocation15 + $0x6e8] sm:$0xff]  ;;  %v5280_v24 = vcombine.low %v1590_v18, %v1594_v19  ;;  %v5344_v25 = vcombine.low %v1591_v60, %v1595_v61  ;;  %v5355_v18 = vcombine.high %v1384_v12, %v1388_v13  ;;  %v1392_v60 = vld [vmem:[#allocation15 + $0x50] sm:$0xff] }
 0x4b7   : > { %v5345_v27 = vcombine.high %v1599_v22, %v1603_v23  ;;  %v1396_v61 = vld [vmem:[#allocation15 + $0x70] sm:$0xff] }
 0x4b9   : > { %4582 = vmatpush1.bf16.msra.mxu0 %v5268_v30  ;;  %4710 = vmatpush1.bf16.msra.mxu1 %v5332_v32  ;;  %v1607_v30 = vld [vmem:[#allocation15 + $0x708] sm:$0xff] }
 0x4ba   : > { %4584 = vmatprep.subr.bf16.mxu0 %v5269_v33  ;;  %4712 = vmatprep.subr.bf16.mxu1 %v5333_v35  ;;  %v1611_v32 = vld [vmem:[#allocation15 + $0x728] sm:$0xff]  ;;  %v5282_v33 = vcombine.low %v1598_v20, %v1602_v21  ;;  %v5346_v35 = vcombine.low %v1599_v22, %v1603_v23  ;;  %v5357_v21 = vcombine.high %v1392_v60, %v1396_v61  ;;  %v1400_v23 = vld [vmem:[#allocation15 + $0x90] sm:$0xff] }
 0x4bb   : > { %v5347_v44 = vcombine.high %v1607_v30, %v1611_v32 }
 0x4bd   : > { %4586 = vmatpush1.bf16.msra.mxu0 %v5270_v48  ;;  %4714 = vmatpush1.bf16.msra.mxu1 %v5334_v49  ;;  %v1615_v48 = vld [vmem:[#allocation15 + $0x748] sm:$0xff] }
 0x4be   : > { %4588 = vmatprep.subr.bf16.mxu0 %v5271_v50  ;;  %4716 = vmatprep.subr.bf16.mxu1 %v5335_v51  ;;  %v1619_v49 = vld [vmem:[#allocation15 + $0x768] sm:$0xff]  ;;  %v5284_v50 = vcombine.low %v1606_v28, %v1610_v29  ;;  %v5348_v51 = vcombine.low %v1607_v30, %v1611_v32  ;;  %v1408_v30 = vld [vmem:[#allocation15 + $0xd0] sm:$0xff] }
 0x4bf   : > { %v5349_v53 = vcombine.high %v1615_v48, %v1619_v49  ;;  %v1412_v32 = vld [vmem:[#allocation15 + $0xf0] sm:$0xff] }
 0x4c1   : > { %4590 = vmatpush1.bf16.msra.mxu0 %v5272_v56  ;;  %4718 = vmatpush1.bf16.msra.mxu1 %v5336_v57  ;;  %v1623_v56 = vld [vmem:[#allocation15 + $0x788] sm:$0xff] }
 0x4c2   : > { %4592 = vmatprep.subr.bf16.mxu0 %v5273_v58  ;;  %4720 = vmatprep.subr.bf16.mxu1 %v5337_v59  ;;  %v1627_v57 = vld [vmem:[#allocation15 + $0x7a8] sm:$0xff]  ;;  %v5286_v58 = vcombine.low %v1614_v46, %v1618_v47  ;;  %v5350_v59 = vcombine.low %v1615_v48, %v1619_v49  ;;  %v5361_v46 = vcombine.high %v1408_v30, %v1412_v32  ;;  %v1416_v48 = vld [vmem:[#allocation15 + $0x110] sm:$0xff] }
 0x4c3   : > { %v5351_v4 = vcombine.high %v1623_v56, %v1627_v57  ;;  %v1420_v49 = vld [vmem:[#allocation15 + $0x130] sm:$0xff] }
 0x4c5   : > { %4594 = vmatpush1.bf16.msra.mxu0 %v5274_v41  ;;  %4722 = vmatpush1.bf16.msra.mxu1 %v5338_v38  ;;  %v1631_v41 = vld [vmem:[#allocation15 + $0x7c8] sm:$0xff] }
 0x4c6   : > { %4596 = vmatprep.subr.bf16.mxu0 %v5275_v39  ;;  %4724 = vmatprep.subr.bf16.mxu1 %v5339_v40  ;;  %v1635_v38 = vld [vmem:[#allocation15 + $0x7e8] sm:$0xff]  ;;  %v5288_v39 = vcombine.low %v1622_v54, %v1626_v55  ;;  %v5352_v40 = vcombine.low %v1623_v56, %v1627_v57  ;;  %v1424_v55 = vld [vmem:[#allocation15 + $0x150] sm:$0xff]  ;;  %v1425_v57 = vld [vmem:[#allocation15 + $0x158] sm:$0xff] }
 0x4c7   : > { %v5353_v10 = vcombine.high %v1631_v41, %v1635_v38  ;;  %v1428_v56 = vld [vmem:[#allocation15 + $0x170] sm:$0xff] }
 0x4c9   : > { %4598 = vmatpush1.bf16.msra.mxu0 %v5276_v14  ;;  %4726 = vmatpush1.bf16.msra.mxu1 %v5340_v15  ;;  %v1385_v14 = vld [vmem:[#allocation15 + $0x18] sm:$0xff] }
 0x4ca   : > { %4600 = vmatprep.subr.bf16.mxu0 %v5277_v16  ;;  %4728 = vmatprep.subr.bf16.mxu1 %v5341_v17  ;;  %v1389_v15 = vld [vmem:[#allocation15 + $0x38] sm:$0xff]  ;;  %v5290_v16 = vcombine.low %v1630_v5, %v1634_v6  ;;  %v5354_v17 = vcombine.low %v1631_v41, %v1635_v38  ;;  %v1432_v6 = vld [vmem:[#allocation15 + $0x190] sm:$0xff] }
 0x4cb   : > { %v5419_v19 = vcombine.high %v1385_v14, %v1389_v15  ;;  %v5420_v20 = vcombine.low %v1385_v14, %v1389_v15  ;;  %v1436_v41 = vld [vmem:[#allocation15 + $0x1b0] sm:$0xff]  ;;  %v1433_v38 = vld [vmem:[#allocation15 + $0x198] sm:$0xff] }
 0x4cc   : > { %v1444_v14 = vld [vmem:[#allocation15 + $0x1f0] sm:$0xff]  ;;  %v1441_v15 = vld [vmem:[#allocation15 + $0x1d8] sm:$0xff] }
 0x4cd   : > { %4602 = vmatpush1.bf16.msra.mxu0 %v5278_v62  ;;  %4730 = vmatpush1.bf16.msra.mxu1 %v5342_v0  ;;  %v1393_v62 = vld [vmem:[#allocation15 + $0x58] sm:$0xff] }
 0x4ce   : > { %4604 = vmatprep.subr.bf16.mxu0 %v5279_v1  ;;  %4732 = vmatprep.subr.bf16.mxu1 %v5343_v3  ;;  %v1397_v0 = vld [vmem:[#allocation15 + $0x78] sm:$0xff]  ;;  %v5356_v1 = vcombine.low %v1384_v12, %v1388_v13  ;;  %v6746_v3 = vmax.f32 %v6725_v63, 0.0  ;;  %v1440_v13 = vld [vmem:[#allocation15 + $0x1d0] sm:$0xff] }
 0x4cf   : > { %v5421_v22 = vcombine.high %v1393_v62, %v1397_v0  ;;  %v5422_v63 = vcombine.low %v1393_v62, %v1397_v0  ;;  %v1452_v62 = vld [vmem:[#allocation15 + $0x230] sm:$0xff]  ;;  %v1449_v0 = vld [vmem:[#allocation15 + $0x218] sm:$0xff] }
 0x4d1   : > { %4606 = vmatpush1.bf16.msra.mxu0 %v5280_v24  ;;  %4734 = vmatpush1.bf16.msra.mxu1 %v5344_v25  ;;  %v1404_v24 = vld [vmem:[#allocation15 + $0xb0] sm:$0xff]  ;;  %v1401_v25 = vld [vmem:[#allocation15 + $0x98] sm:$0xff] }
 0x4d2   : > { %4608 = vmatprep.subr.bf16.mxu0 %v5281_v26  ;;  %4736 = vmatprep.subr.bf16.mxu1 %v5345_v27  ;;  %v1405_v26 = vld [vmem:[#allocation15 + $0xb8] sm:$0xff]  ;;  %v5358_v27 = vcombine.low %v1392_v60, %v1396_v61  ;;  %v5359_v28 = vcombine.high %v1400_v23, %v1404_v24  ;;  %v1448_v61 = vld [vmem:[#allocation15 + $0x210] sm:$0xff] }
 0x4d3   : > { %v5423_v29 = vcombine.high %v1401_v25, %v1405_v26 }
 0x4d5   : > { %4610 = vmatpush1.bf16.msra.mxu0 %v5282_v33  ;;  %4738 = vmatpush1.bf16.msra.mxu1 %v5346_v35  ;;  %v1409_v33 = vld [vmem:[#allocation15 + $0xd8] sm:$0xff] }
 0x4d6   : > { %4612 = vmatprep.subr.bf16.mxu0 %v5283_v42  ;;  %4740 = vmatprep.subr.bf16.mxu1 %v5347_v44  ;;  %v1413_v35 = vld [vmem:[#allocation15 + $0xf8] sm:$0xff]  ;;  %v5360_v42 = vcombine.low %v1400_v23, %v1404_v24  ;;  %v5424_v44 = vcombine.low %v1401_v25, %v1405_v26  ;;  %v1456_v24 = vld [vmem:[#allocation15 + $0x250] sm:$0xff] }
 0x4d7   : > { %v5425_v47 = vcombine.high %v1409_v33, %v1413_v35  ;;  %v1460_v25 = vld [vmem:[#allocation15 + $0x270] sm:$0xff]  ;;  %v1457_v26 = vld [vmem:[#allocation15 + $0x258] sm:$0xff] }
 0x4d9   : > { %4614 = vmatpush1.bf16.msra.mxu0 %v5284_v50  ;;  %4742 = vmatpush1.bf16.msra.mxu1 %v5348_v51  ;;  %v1421_v50 = vld [vmem:[#allocation15 + $0x138] sm:$0xff]  ;;  %v5362_v51 = vcombine.low %v1408_v30, %v1412_v32  ;;  %v1464_v32 = vld [vmem:[#allocation15 + $0x290] sm:$0xff] }
 0x4da   : > { %4616 = vmatprep.subr.bf16.mxu0 %v5285_v52  ;;  %4744 = vmatprep.subr.bf16.mxu1 %v5349_v53  ;;  %v5426_v52 = vcombine.low %v1409_v33, %v1413_v35  ;;  %v5363_v53 = vcombine.high %v1416_v48, %v1420_v49  ;;  %v1468_v33 = vld [vmem:[#allocation15 + $0x2b0] sm:$0xff]  ;;  %v1465_v35 = vld [vmem:[#allocation15 + $0x298] sm:$0xff] }
 0x4dd   : > { %4618 = vmatpush1.bf16.msra.mxu0 %v5286_v58  ;;  %4746 = vmatpush1.bf16.msra.mxu1 %v5350_v59  ;;  %v1429_v58 = vld [vmem:[#allocation15 + $0x178] sm:$0xff]  ;;  %v5364_v59 = vcombine.low %v1416_v48, %v1420_v49  ;;  %v1472_v49 = vld [vmem:[#allocation15 + $0x2d0] sm:$0xff] }
 0x4de   : > { %4620 = vmatprep.subr.bf16.mxu0 %v5287_v2  ;;  %4748 = vmatprep.subr.bf16.mxu1 %v5351_v4  ;;  %v5365_v4 = vcombine.high %v1424_v55, %v1428_v56  ;;  %v5429_v5 = vcombine.high %v1425_v57, %v1429_v58 }
 0x4e1   : > { %4622 = vmatpush1.bf16.msra.mxu0 %v5288_v39  ;;  %4750 = vmatpush1.bf16.msra.mxu1 %v5352_v40  ;;  %v1437_v39 = vld [vmem:[#allocation15 + $0x1b8] sm:$0xff]  ;;  %v5366_v40 = vcombine.low %v1424_v55, %v1428_v56  ;;  %v1480_v56 = vld [vmem:[#allocation15 + $0x310] sm:$0xff] }
 0x4e2   : > { %4624 = vmatprep.subr.bf16.mxu0 %v5289_v9  ;;  %4752 = vmatprep.subr.bf16.mxu1 %v5353_v10  ;;  %v5430_v9 = vcombine.low %v1425_v57, %v1429_v58  ;;  %v5367_v10 = vcombine.high %v1432_v6, %v1436_v41  ;;  %v5431_v12 = vcombine.high %v1433_v38, %v1437_v39  ;;  %v1484_v57 = vld [vmem:[#allocation15 + $0x330] sm:$0xff]  ;;  %v1481_v58 = vld [vmem:[#allocation15 + $0x318] sm:$0xff] }
 0x4e5   : > { %4626 = vmatpush1.bf16.msra.mxu0 %v5290_v16  ;;  %4754 = vmatpush1.bf16.msra.mxu1 %v5354_v17  ;;  %v1445_v16 = vld [vmem:[#allocation15 + $0x1f8] sm:$0xff]  ;;  %v5368_v17 = vcombine.low %v1432_v6, %v1436_v41  ;;  %v1488_v41 = vld [vmem:[#allocation15 + $0x350] sm:$0xff] }
 0x4e6   : > { %4756 = vmatprep.subr.bf16.mxu0 %v5355_v18  ;;  %4884 = vmatprep.subr.bf16.mxu1 %v5419_v19  ;;  %v5432_v18 = vcombine.low %v1433_v38, %v1437_v39  ;;  %v5369_v19 = vcombine.high %v1440_v13, %v1444_v14  ;;  %v5433_v60 = vcombine.high %v1441_v15, %v1445_v16  ;;  %v1492_v38 = vld [vmem:[#allocation15 + $0x370] sm:$0xff]  ;;  %v1489_v39 = vld [vmem:[#allocation15 + $0x358] sm:$0xff] }
 0x4e8   : > { %2286 = vmatmul.mubr.f32.vlgmr.msra.gmra.mrb[4].mxu0 %v6746_v3  ;;  %2428 = vmatmul.mubr.f32.vlgmr.msra.gmra.mrb[4].mxu1 %v6746_v3 }
 0x4e9   : > { %4758 = vmatpush1.bf16.msra.mxu0 %v5356_v1  ;;  %2498 = vmatprep.mubr.f32.mxu0 %v6727_v7  ;;  %v1453_v1 = vld [vmem:[#allocation15 + $0x238] sm:$0xff] }
 0x4ea   : > { %4886 = vmatpush1.bf16.msra.mxu1 %v5420_v20  ;;  %2640 = vmatprep.mubr.f32.mxu1 %v6727_v7  ;;  %v1417_v7 = vld [vmem:[#allocation15 + $0x118] sm:$0xff]  ;;  %v5370_v20 = vcombine.low %v1440_v13, %v1444_v14  ;;  %v5435_v23 = vcombine.high %v1449_v0, %v1453_v1  ;;  %v1496_v14 = vld [vmem:[#allocation15 + $0x390] sm:$0xff] }
 0x4eb   : > { %4760 = vmatprep.subr.bf16.mxu0 %v5357_v21  ;;  %4888 = vmatprep.subr.bf16.mxu1 %v5421_v22  ;;  %v5427_v54 = vcombine.high %v1417_v7, %v1421_v50  ;;  %v5428_v2 = vcombine.low %v1417_v7, %v1421_v50  ;;  %v5434_v21 = vcombine.low %v1441_v15, %v1445_v16  ;;  %v1476_v7 = vld [vmem:[#allocation15 + $0x2f0] sm:$0xff]  ;;  %v1473_v50 = vld [vmem:[#allocation15 + $0x2d8] sm:$0xff] }
 0x4ec   : > { %v5371_v22 = vcombine.high %v1448_v61, %v1452_v62  ;;  %v1500_v15 = vld [vmem:[#allocation15 + $0x3b0] sm:$0xff]  ;;  %v1497_v16 = vld [vmem:[#allocation15 + $0x398] sm:$0xff] }
 0x4ed   : > { %4762 = vmatpush1.bf16.msra.mxu0 %v5358_v27  ;;  %v1461_v27 = vld [vmem:[#allocation15 + $0x278] sm:$0xff] }
 0x4ee   : > { %4890 = vmatpush1.bf16.msra.mxu1 %v5422_v63  ;;  %4764 = vmatprep.subr.bf16.mxu0 %v5359_v28  ;;  %v5372_v63 = vcombine.low %v1448_v61, %v1452_v62  ;;  %v5436_v28 = vcombine.low %v1449_v0, %v1453_v1  ;;  %v5437_v30 = vcombine.high %v1457_v26, %v1461_v27  ;;  %v1504_v62 = vld [vmem:[#allocation15 + $0x3d0] sm:$0xff]  ;;  %v1505_v1 = vld [vmem:[#allocation15 + $0x3d8] sm:$0xff] }
 0x4ef   : > { %4892 = vmatprep.subr.bf16.mxu1 %v5423_v29  ;;  %v5373_v29 = vcombine.high %v1456_v24, %v1460_v25  ;;  %v1508_v0 = vld [vmem:[#allocation15 + $0x3f0] sm:$0xff] }
 0x4f1   : > { %4766 = vmatpush1.bf16.msra.mxu0 %v5360_v42  ;;  %v1469_v42 = vld [vmem:[#allocation15 + $0x2b8] sm:$0xff] }
 0x4f2   : > { %4894 = vmatpush1.bf16.msra.mxu1 %v5424_v44  ;;  %4768 = vmatprep.subr.bf16.mxu0 %v5361_v46  ;;  %v5374_v44 = vcombine.low %v1456_v24, %v1460_v25  ;;  %v5438_v46 = vcombine.low %v1457_v26, %v1461_v27  ;;  %v5439_v48 = vcombine.high %v1465_v35, %v1469_v42  ;;  %v1512_v25 = vld [vmem:[#allocation15 + $0x410] sm:$0xff]  ;;  %v1513_v27 = vld [vmem:[#allocation15 + $0x418] sm:$0xff] }
 0x4f3   : > { %4896 = vmatprep.subr.bf16.mxu1 %v5425_v47  ;;  %v5375_v47 = vcombine.high %v1464_v32, %v1468_v33  ;;  %v1516_v26 = vld [vmem:[#allocation15 + $0x430] sm:$0xff] }
 0x4f5   : > { %4770 = vmatpush1.bf16.msra.mxu0 %v5362_v51  ;;  %v1477_v51 = vld [vmem:[#allocation15 + $0x2f8] sm:$0xff] }
 0x4f6   : > { %4898 = vmatpush1.bf16.msra.mxu1 %v5426_v52  ;;  %4772 = vmatprep.subr.bf16.mxu0 %v5363_v53  ;;  %v5376_v52 = vcombine.low %v1464_v32, %v1468_v33  ;;  %v5440_v53 = vcombine.low %v1465_v35, %v1469_v42  ;;  %v5441_v55 = vcombine.high %v1473_v50, %v1477_v51  ;;  %v1520_v33 = vld [vmem:[#allocation15 + $0x450] sm:$0xff] }
 0x4f7   : > { %4900 = vmatprep.subr.bf16.mxu1 %v5427_v54  ;;  %v5377_v54 = vcombine.high %v1472_v49, %v1476_v7  ;;  %v1524_v35 = vld [vmem:[#allocation15 + $0x470] sm:$0xff]  ;;  %v5388_v42 = vcombine.low %v1512_v25, %v1516_v26 }
 0x4f9   : > { %4774 = vmatpush1.bf16.msra.mxu0 %v5364_v59  ;;  %v1485_v59 = vld [vmem:[#allocation15 + $0x338] sm:$0xff] }
 0x4fa   : > { %4902 = vmatpush1.bf16.msra.mxu1 %v5428_v2  ;;  %4776 = vmatprep.subr.bf16.mxu0 %v5365_v4  ;;  %v5378_v2 = vcombine.low %v1472_v49, %v1476_v7  ;;  %v5442_v4 = vcombine.low %v1473_v50, %v1477_v51  ;;  %v5443_v6 = vcombine.high %v1481_v58, %v1485_v59  ;;  %v1528_v49 = vld [vmem:[#allocation15 + $0x490] sm:$0xff]  ;;  %v1529_v51 = vld [vmem:[#allocation15 + $0x498] sm:$0xff] }
 0x4fb   : > { %4904 = vmatprep.subr.bf16.mxu1 %v5429_v5  ;;  %v5379_v5 = vcombine.high %v1480_v56, %v1484_v57  ;;  %v1532_v7 = vld [vmem:[#allocation15 + $0x4b0] sm:$0xff] }
 0x4fd   : > { %4778 = vmatpush1.bf16.msra.mxu0 %v5366_v40  ;;  %v1493_v40 = vld [vmem:[#allocation15 + $0x378] sm:$0xff] }
 0x4fe   : > { %4906 = vmatpush1.bf16.msra.mxu1 %v5430_v9  ;;  %4780 = vmatprep.subr.bf16.mxu0 %v5367_v10  ;;  %v5380_v9 = vcombine.low %v1480_v56, %v1484_v57  ;;  %v5444_v10 = vcombine.low %v1481_v58, %v1485_v59  ;;  %v5445_v13 = vcombine.high %v1489_v39, %v1493_v40  ;;  %v1536_v57 = vld [vmem:[#allocation15 + $0x4d0] sm:$0xff]  ;;  %v1537_v59 = vld [vmem:[#allocation15 + $0x4d8] sm:$0xff] }
 0x4ff   : > { %4908 = vmatprep.subr.bf16.mxu1 %v5431_v12  ;;  %v5381_v12 = vcombine.high %v1488_v41, %v1492_v38  ;;  %v1540_v58 = vld [vmem:[#allocation15 + $0x4f0] sm:$0xff] }
 0x501   : > { %4782 = vmatpush1.bf16.msra.mxu0 %v5368_v17  ;;  %v1501_v17 = vld [vmem:[#allocation15 + $0x3b8] sm:$0xff] }
 0x502   : > { %4910 = vmatpush1.bf16.msra.mxu1 %v5432_v18  ;;  %4784 = vmatprep.subr.bf16.mxu0 %v5369_v19  ;;  %v5382_v18 = vcombine.low %v1488_v41, %v1492_v38  ;;  %v5446_v19 = vcombine.low %v1489_v39, %v1493_v40  ;;  %v5447_v61 = vcombine.high %v1497_v16, %v1501_v17  ;;  %v1544_v41 = vld [vmem:[#allocation15 + $0x510] sm:$0xff]  ;;  %v1545_v39 = vld [vmem:[#allocation15 + $0x518] sm:$0xff] }
 0x503   : > { %4912 = vmatprep.subr.bf16.mxu1 %v5433_v60  ;;  %v5383_v60 = vcombine.high %v1496_v14, %v1500_v15  ;;  %v1548_v38 = vld [vmem:[#allocation15 + $0x530] sm:$0xff]  ;;  %v1549_v40 = vld [vmem:[#allocation15 + $0x538] sm:$0xff] }
 0x505   : > { %4786 = vmatpush1.bf16.msra.mxu0 %v5370_v20  ;;  %v1509_v20 = vld [vmem:[#allocation15 + $0x3f8] sm:$0xff] }
 0x506   : > { %4914 = vmatpush1.bf16.msra.mxu1 %v5434_v21  ;;  %4788 = vmatprep.subr.bf16.mxu0 %v5371_v22  ;;  %v5384_v21 = vcombine.low %v1496_v14, %v1500_v15  ;;  %v5448_v22 = vcombine.low %v1497_v16, %v1501_v17  ;;  %v5449_v24 = vcombine.high %v1505_v1, %v1509_v20  ;;  %v1556_v14 = vld [vmem:[#allocation15 + $0x570] sm:$0xff]  ;;  %v1553_v15 = vld [vmem:[#allocation15 + $0x558] sm:$0xff] }
 0x507   : > { %4916 = vmatprep.subr.bf16.mxu1 %v5435_v23  ;;  %v5385_v23 = vcombine.high %v1504_v62, %v1508_v0  ;;  %v1557_v16 = vld [vmem:[#allocation15 + $0x578] sm:$0xff]  ;;  %v5396_v17 = vcombine.low %v1544_v41, %v1548_v38 }
 0x509   : > { %4790 = vmatpush1.bf16.msra.mxu0 %v5372_v63  ;;  %v1517_v63 = vld [vmem:[#allocation15 + $0x438] sm:$0xff] }
 0x50a   : > { %4918 = vmatpush1.bf16.msra.mxu1 %v5436_v28  ;;  %4792 = vmatprep.subr.bf16.mxu0 %v5373_v29  ;;  %v5386_v28 = vcombine.low %v1504_v62, %v1508_v0  ;;  %v5450_v29 = vcombine.low %v1505_v1, %v1509_v20  ;;  %v5451_v32 = vcombine.high %v1513_v27, %v1517_v63  ;;  %v1564_v62 = vld [vmem:[#allocation15 + $0x5b0] sm:$0xff]  ;;  %v1561_v0 = vld [vmem:[#allocation15 + $0x598] sm:$0xff] }
 0x50b   : > { %4920 = vmatprep.subr.bf16.mxu1 %v5437_v30  ;;  %v5387_v30 = vcombine.high %v1512_v25, %v1516_v26  ;;  %v1565_v1 = vld [vmem:[#allocation15 + $0x5b8] sm:$0xff]  ;;  %v1572_v25 = vld [vmem:[#allocation15 + $0x5f0] sm:$0xff] }
 0x50c   : > { %v1569_v26 = vld [vmem:[#allocation15 + $0x5d8] sm:$0xff] }
 0x50d   : > { %4794 = vmatpush1.bf16.msra.mxu0 %v5374_v44  ;;  %v1521_v44 = vld [vmem:[#allocation15 + $0x458] sm:$0xff] }
 0x50e   : > { %4922 = vmatpush1.bf16.msra.mxu1 %v5438_v46  ;;  %4796 = vmatprep.subr.bf16.mxu0 %v5375_v47  ;;  %v1525_v46 = vld [vmem:[#allocation15 + $0x478] sm:$0xff]  ;;  %v5452_v47 = vcombine.low %v1513_v27, %v1517_v63 }
 0x50f   : > { %4924 = vmatprep.subr.bf16.mxu1 %v5439_v48  ;;  %v5389_v48 = vcombine.high %v1520_v33, %v1524_v35  ;;  %v5453_v50 = vcombine.high %v1521_v44, %v1525_v46  ;;  %v1573_v27 = vld [vmem:[#allocation15 + $0x5f8] sm:$0xff] }
 0x511   : > { %4798 = vmatpush1.bf16.msra.mxu0 %v5376_v52  ;;  %v1533_v52 = vld [vmem:[#allocation15 + $0x4b8] sm:$0xff] }
 0x512   : > { %4926 = vmatpush1.bf16.msra.mxu1 %v5440_v53  ;;  %4800 = vmatprep.subr.bf16.mxu0 %v5377_v54  ;;  %v5390_v53 = vcombine.low %v1520_v33, %v1524_v35  ;;  %v5454_v54 = vcombine.low %v1521_v44, %v1525_v46  ;;  %v5455_v56 = vcombine.high %v1529_v51, %v1533_v52  ;;  %v1580_v33 = vld [vmem:[#allocation15 + $0x630] sm:$0xff]  ;;  %v1577_v35 = vld [vmem:[#allocation15 + $0x618] sm:$0xff] }
 0x513   : > { %4928 = vmatprep.subr.bf16.mxu1 %v5441_v55  ;;  %v5391_v55 = vcombine.high %v1528_v49, %v1532_v7  ;;  %v5466_v46 = vcombine.low %v1569_v26, %v1573_v27 }
 0x515   : > { %4802 = vmatpush1.bf16.msra.mxu0 %v5378_v2  ;;  %v1541_v2 = vld [vmem:[#allocation15 + $0x4f8] sm:$0xff] }
 0x516   : > { %4930 = vmatpush1.bf16.msra.mxu1 %v5442_v4  ;;  %4804 = vmatprep.subr.bf16.mxu0 %v5379_v5  ;;  %v5392_v4 = vcombine.low %v1528_v49, %v1532_v7  ;;  %v5393_v5 = vcombine.high %v1536_v57, %v1540_v58  ;;  %v1584_v49 = vld [vmem:[#allocation15 + $0x650] sm:$0xff] }
 0x517   : > { %4932 = vmatprep.subr.bf16.mxu1 %v5443_v6  ;;  %v5457_v6 = vcombine.high %v1537_v59, %v1541_v2  ;;  %v1588_v7 = vld [vmem:[#allocation15 + $0x670] sm:$0xff] }
 0x519   : > { %4806 = vmatpush1.bf16.msra.mxu0 %v5380_v9  ;;  %v5458_v9 = vcombine.low %v1537_v59, %v1541_v2  ;;  %v1597_v59 = vld [vmem:[#allocation15 + $0x6b8] sm:$0xff]  ;;  %v5406_v2 = vcombine.low %v1584_v49, %v1588_v7 }
 0x51a   : > { %4934 = vmatpush1.bf16.msra.mxu1 %v5444_v10  ;;  %4808 = vmatprep.subr.bf16.mxu0 %v5381_v12  ;;  %v5395_v10 = vcombine.high %v1544_v41, %v1548_v38  ;;  %v5459_v12 = vcombine.high %v1545_v39, %v1549_v40  ;;  %v1604_v41 = vld [vmem:[#allocation15 + $0x6f0] sm:$0xff]  ;;  %v1601_v38 = vld [vmem:[#allocation15 + $0x6d8] sm:$0xff] }
 0x51b   : > { %4936 = vmatprep.subr.bf16.mxu1 %v5445_v13  ;;  %v1552_v13 = vld [vmem:[#allocation15 + $0x550] sm:$0xff] }
 0x51c   : > { %v5398_v20 = vcombine.low %v1552_v13, %v1556_v14 }
 0x51d   : > { %4810 = vmatpush1.bf16.msra.mxu0 %v5382_v18  ;;  %v5460_v18 = vcombine.low %v1545_v39, %v1549_v40  ;;  %v1605_v39 = vld [vmem:[#allocation15 + $0x6f8] sm:$0xff] }
 0x51e   : > { %4938 = vmatpush1.bf16.msra.mxu1 %v5446_v19  ;;  %4812 = vmatprep.subr.bf16.mxu0 %v5383_v60  ;;  %v5397_v19 = vcombine.high %v1552_v13, %v1556_v14  ;;  %v5461_v60 = vcombine.high %v1553_v15, %v1557_v16  ;;  %v1612_v13 = vld [vmem:[#allocation15 + $0x730] sm:$0xff]  ;;  %v1609_v14 = vld [vmem:[#allocation15 + $0x718] sm:$0xff] }
 0x51f   : > { %4940 = vmatprep.subr.bf16.mxu1 %v5447_v61  ;;  %v1560_v61 = vld [vmem:[#allocation15 + $0x590] sm:$0xff] }
 0x520   : > { %v5400_v63 = vcombine.low %v1560_v61, %v1564_v62 }
 0x521   : > { %4814 = vmatpush1.bf16.msra.mxu0 %v5384_v21  ;;  %v5462_v21 = vcombine.low %v1553_v15, %v1557_v16  ;;  %v1613_v15 = vld [vmem:[#allocation15 + $0x738] sm:$0xff] }
 0x522   : > { %4942 = vmatpush1.bf16.msra.mxu1 %v5448_v22  ;;  %4816 = vmatprep.subr.bf16.mxu0 %v5385_v23  ;;  %v5399_v22 = vcombine.high %v1560_v61, %v1564_v62  ;;  %v5463_v23 = vcombine.high %v1561_v0, %v1565_v1  ;;  %v1620_v61 = vld [vmem:[#allocation15 + $0x770] sm:$0xff]  ;;  %v1617_v62 = vld [vmem:[#allocation15 + $0x758] sm:$0xff] }
 0x523   : > { %4944 = vmatprep.subr.bf16.mxu1 %v5449_v24  ;;  %v1568_v24 = vld [vmem:[#allocation15 + $0x5d0] sm:$0xff] }
 0x524   : > { %v5402_v44 = vcombine.low %v1568_v24, %v1572_v25 }
 0x525   : > { %4818 = vmatpush1.bf16.msra.mxu0 %v5386_v28  ;;  %v5464_v28 = vcombine.low %v1561_v0, %v1565_v1  ;;  %v1621_v0 = vld [vmem:[#allocation15 + $0x778] sm:$0xff] }
 0x526   : > { %4946 = vmatpush1.bf16.msra.mxu1 %v5450_v29  ;;  %4820 = vmatprep.subr.bf16.mxu0 %v5387_v30  ;;  %v5401_v29 = vcombine.high %v1568_v24, %v1572_v25  ;;  %v5465_v30 = vcombine.high %v1569_v26, %v1573_v27  ;;  %v1628_v24 = vld [vmem:[#allocation15 + $0x7b0] sm:$0xff]  ;;  %v1625_v25 = vld [vmem:[#allocation15 + $0x798] sm:$0xff] }
 0x527   : > { %4948 = vmatprep.subr.bf16.mxu1 %v5451_v32  ;;  %v1576_v32 = vld [vmem:[#allocation15 + $0x610] sm:$0xff]  ;;  %v1629_v26 = vld [vmem:[#allocation15 + $0x7b8] sm:$0xff] }
 0x528   : > { %2499 = vmatmul.mubr.f32.vlgmr.msra.gmra.mrb[6].mxu0 %v6729_v8 }
 0x529   : > { %2641 = vmatmul.mubr.f32.vlgmr.msra.gmra.mrb[6].mxu1 %v6729_v8  ;;  %4822 = vmatpush1.bf16.msra.mxu0 %v5388_v42  ;;  %v5456_v8 = vcombine.low %v1529_v51, %v1533_v52  ;;  %v1581_v42 = vld [vmem:[#allocation15 + $0x638] sm:$0xff]  ;;  %v5404_v52 = vcombine.low %v1576_v32, %v1580_v33 }
 0x52a   : > { %2569 = vmatprep.mubr.f32.mxu0 %v6735_v11  ;;  %4950 = vmatpush1.bf16.msra.mxu1 %v5452_v47  ;;  %v5403_v47 = vcombine.high %v1576_v32, %v1580_v33  ;;  %v1589_v51 = vld [vmem:[#allocation15 + $0x678] sm:$0xff]  ;;  %v1636_v32 = vld [vmem:[#allocation15 + $0x7f0] sm:$0xff] }
 0x52b   : > { %2711 = vmatprep.mubr.f32.mxu1 %v6735_v11  ;;  %4824 = vmatprep.subr.bf16.mxu0 %v5389_v48  ;;  %v5394_v11 = vcombine.low %v1536_v57, %v1540_v58  ;;  %v5467_v48 = vcombine.high %v1577_v35, %v1581_v42  ;;  %v1596_v57 = vld [vmem:[#allocation15 + $0x6b0] sm:$0xff]  ;;  %v1593_v58 = vld [vmem:[#allocation15 + $0x698] sm:$0xff] }
 0x52c   : > { %4952 = vmatprep.subr.bf16.mxu1 %v5453_v50  ;;  %v1585_v50 = vld [vmem:[#allocation15 + $0x658] sm:$0xff] }
 0x52d   : > { %4826 = vmatpush1.bf16.msra.mxu0 %v5390_v53  ;;  %v5468_v53 = vcombine.low %v1577_v35, %v1581_v42  ;;  %v1633_v33 = vld [vmem:[#allocation15 + $0x7d8] sm:$0xff] }
 0x52e   : > { %4954 = vmatpush1.bf16.msra.mxu1 %v5454_v54  ;;  %4828 = vmatprep.subr.bf16.mxu0 %v5391_v55  ;;  %v5405_v54 = vcombine.high %v1584_v49, %v1588_v7  ;;  %v5469_v55 = vcombine.high %v1585_v50, %v1589_v51  ;;  %v1637_v35 = vld [vmem:[#allocation15 + $0x7f8] sm:$0xff] }
 0x52f   : > { %4956 = vmatprep.subr.bf16.mxu1 %v5455_v56  ;;  %v1592_v56 = vld [vmem:[#allocation15 + $0x690] sm:$0xff]  ;;  %v5482_v49 = vcombine.low %v1633_v33, %v1637_v35 }
 0x530   : > { %v5408_v40 = vcombine.low %v1592_v56, %v1596_v57 }
 0x531   : > { %4830 = vmatpush1.bf16.msra.mxu0 %v5392_v4  ;;  %v5470_v4 = vcombine.low %v1585_v50, %v1589_v51 }
 0x532   : > { %4958 = vmatpush1.bf16.msra.mxu1 %v5456_v8  ;;  %4832 = vmatprep.subr.bf16.mxu0 %v5393_v5  ;;  %v5407_v8 = vcombine.high %v1592_v56, %v1596_v57  ;;  %v5471_v5 = vcombine.high %v1593_v58, %v1597_v59 }
 0x533   : > { %4960 = vmatprep.subr.bf16.mxu1 %v5457_v6  ;;  %v1600_v6 = vld [vmem:[#allocation15 + $0x6d0] sm:$0xff] }
 0x534   : > { %v5410_v16 = vcombine.low %v1600_v6, %v1604_v41 }
 0x535   : > { %4834 = vmatpush1.bf16.msra.mxu0 %v5394_v11  ;;  %v5472_v11 = vcombine.low %v1593_v58, %v1597_v59 }
 0x536   : > { %4962 = vmatpush1.bf16.msra.mxu1 %v5458_v9  ;;  %4836 = vmatprep.subr.bf16.mxu0 %v5395_v10  ;;  %v5409_v9 = vcombine.high %v1600_v6, %v1604_v41  ;;  %v5473_v10 = vcombine.high %v1601_v38, %v1605_v39 }
 0x537   : > { %4964 = vmatprep.subr.bf16.mxu1 %v5459_v12  ;;  %v1608_v12 = vld [vmem:[#allocation15 + $0x710] sm:$0xff] }
 0x538   : > { %v5412_v1 = vcombine.low %v1608_v12, %v1612_v13 }
 0x539   : > { %4838 = vmatpush1.bf16.msra.mxu0 %v5396_v17  ;;  %v5474_v17 = vcombine.low %v1601_v38, %v1605_v39 }
 0x53a   : > { %4966 = vmatpush1.bf16.msra.mxu1 %v5460_v18  ;;  %4840 = vmatprep.subr.bf16.mxu0 %v5397_v19  ;;  %v5411_v18 = vcombine.high %v1608_v12, %v1612_v13  ;;  %v5475_v19 = vcombine.high %v1609_v14, %v1613_v15 }
 0x53b   : > { %4968 = vmatprep.subr.bf16.mxu1 %v5461_v60  ;;  %v1616_v60 = vld [vmem:[#allocation15 + $0x750] sm:$0xff] }
 0x53c   : > { %v5414_v27 = vcombine.low %v1616_v60, %v1620_v61 }
 0x53d   : > { %4842 = vmatpush1.bf16.msra.mxu0 %v5398_v20  ;;  %v5476_v20 = vcombine.low %v1609_v14, %v1613_v15 }
 0x53e   : > { %4970 = vmatpush1.bf16.msra.mxu1 %v5462_v21  ;;  %4844 = vmatprep.subr.bf16.mxu0 %v5399_v22  ;;  %v5413_v21 = vcombine.high %v1616_v60, %v1620_v61  ;;  %v5477_v22 = vcombine.high %v1617_v62, %v1621_v0 }
 0x53f   : > { %4972 = vmatprep.subr.bf16.mxu1 %v5463_v23  ;;  %v1624_v23 = vld [vmem:[#allocation15 + $0x790] sm:$0xff] }
 0x540   : > { %v5416_v42 = vcombine.low %v1624_v23, %v1628_v24 }
 0x541   : > { %4846 = vmatpush1.bf16.msra.mxu0 %v5400_v63  ;;  %v5478_v63 = vcombine.low %v1617_v62, %v1621_v0 }
 0x542   : > { %4974 = vmatpush1.bf16.msra.mxu1 %v5464_v28  ;;  %4848 = vmatprep.subr.bf16.mxu0 %v5401_v29  ;;  %v5415_v28 = vcombine.high %v1624_v23, %v1628_v24  ;;  %v5479_v29 = vcombine.high %v1625_v25, %v1629_v26 }
 0x543   : > { %4976 = vmatprep.subr.bf16.mxu1 %v5465_v30  ;;  %v1632_v30 = vld [vmem:[#allocation15 + $0x7d0] sm:$0xff] }
 0x545   : > { %4850 = vmatpush1.bf16.msra.mxu0 %v5402_v44  ;;  %v5480_v44 = vcombine.low %v1625_v25, %v1629_v26 }
 0x546   : > { %4978 = vmatpush1.bf16.msra.mxu1 %v5466_v46  ;;  %4852 = vmatprep.subr.bf16.mxu0 %v5403_v47  ;;  %v5417_v46 = vcombine.high %v1632_v30, %v1636_v32  ;;  %v5481_v47 = vcombine.high %v1633_v33, %v1637_v35 }
 0x547   : > { %4980 = vmatprep.subr.bf16.mxu1 %v5467_v48  ;;  %v5418_v48 = vcombine.low %v1632_v30, %v1636_v32 }
 0x549   : > { %4854 = vmatpush1.bf16.msra.mxu0 %v5404_v52 }
 0x54a   : > { %4982 = vmatpush1.bf16.msra.mxu1 %v5468_v53  ;;  %4856 = vmatprep.subr.bf16.mxu0 %v5405_v54 }
 0x54b   : > { %4984 = vmatprep.subr.bf16.mxu1 %v5469_v55 }
 0x54d   : > { %4858 = vmatpush1.bf16.msra.mxu0 %v5406_v2 }
 0x54e   : > { %4986 = vmatpush1.bf16.msra.mxu1 %v5470_v4  ;;  %4860 = vmatprep.subr.bf16.mxu0 %v5407_v8 }
 0x54f   : > { %4988 = vmatprep.subr.bf16.mxu1 %v5471_v5 }
 0x551   : > { %4862 = vmatpush1.bf16.msra.mxu0 %v5408_v40 }
 0x552   : > { %4990 = vmatpush1.bf16.msra.mxu1 %v5472_v11  ;;  %4864 = vmatprep.subr.bf16.mxu0 %v5409_v9 }
 0x553   : > { %4992 = vmatprep.subr.bf16.mxu1 %v5473_v10 }
 0x555   : > { %4866 = vmatpush1.bf16.msra.mxu0 %v5410_v16 }
 0x556   : > { %4994 = vmatpush1.bf16.msra.mxu1 %v5474_v17  ;;  %4868 = vmatprep.subr.bf16.mxu0 %v5411_v18 }
 0x557   : > { %4996 = vmatprep.subr.bf16.mxu1 %v5475_v19 }
 0x559   : > { %4870 = vmatpush1.bf16.msra.mxu0 %v5412_v1 }
 0x55a   : > { %4998 = vmatpush1.bf16.msra.mxu1 %v5476_v20  ;;  %4872 = vmatprep.subr.bf16.mxu0 %v5413_v21 }
 0x55b   : > { %5000 = vmatprep.subr.bf16.mxu1 %v5477_v22 }
 0x55d   : > { %4874 = vmatpush1.bf16.msra.mxu0 %v5414_v27 }
 0x55e   : > { %5002 = vmatpush1.bf16.msra.mxu1 %v5478_v63  ;;  %4876 = vmatprep.subr.bf16.mxu0 %v5415_v28 }
 0x55f   : > { %5004 = vmatprep.subr.bf16.mxu1 %v5479_v29 }
 0x561   : > { %4878 = vmatpush1.bf16.msra.mxu0 %v5416_v42 }
 0x562   : > { %5006 = vmatpush1.bf16.msra.mxu1 %v5480_v44  ;;  %4880 = vmatprep.subr.bf16.mxu0 %v5417_v46 }
 0x563   : > { %5008 = vmatprep.subr.bf16.mxu1 %v5481_v47 }
 0x565   : > { %4882 = vmatpush1.bf16.msra.mxu0 %v5418_v48 }
 0x566   : > { %5010 = vmatpush1.bf16.msra.mxu1 %v5482_v49 }
 0x568   : > { %2570 = vmatmul.mubr.f32.vlgmr.msra.gmra.mrb[6].mxu0 %v6746_v3 }
 0x569   : > { %2712 = vmatmul.mubr.f32.vlgmr.msra.gmra.mrb[6].mxu1 %v6746_v3 }
 0x5bb   : > { %v2287_v7 = vpop.f32.mrb[4].mxu0  ;;  %v2429_v50 = vpop.f32.mrb[4].mxu1 }
 0x5bc   : > { %v2718_v51 = vrot.slane %v2287_v7, 4  ;;  %v2730_v52 = vrot.slane %v2429_v50, 4  ;;  %v2289_v53 = vpop.f32.mrb[5].mxu0  ;;  %v2431_v54 = vpop.f32.mrb[5].mxu1 }
 0x5bd   : > { %v2724_v55 = vrot.slane %v2289_v53, 4  ;;  %v2736_v56 = vrot.slane %v2431_v54, 4 }
 0x5be   : > { %v2719_v57 = vadd.f32 %v2718_v51, %v2287_v7  ;;  %v2731_v58 = vadd.f32 %v2730_v52, %v2429_v50 }
 0x5bf   : > { %v2725_v59 = vadd.f32 %v2724_v55, %v2289_v53  ;;  %v2737_v2 = vadd.f32 %v2736_v56, %v2431_v54 }
 0x5c0   : > { %v2720_v4 = vrot.slane %v2719_v57, 2  ;;  %v2732_v8 = vrot.slane %v2731_v58, 2 }
 0x5c1   : > { %v2726_v5 = vrot.slane %v2725_v59, 2  ;;  %v2738_v6 = vrot.slane %v2737_v2, 2 }
 0x5c2   : > { %v2721_v41 = vadd.f32 %v2720_v4, %v2719_v57  ;;  %v2733_v38 = vadd.f32 %v2732_v8, %v2731_v58 }
 0x5c3   : > { %v2727_v39 = vadd.f32 %v2726_v5, %v2725_v59  ;;  %v2739_v3 = vadd.f32 %v2738_v6, %v2737_v2 }
 0x5c4   : > { %v2722_v40 = vrot.slane %v2721_v41, 1  ;;  %v2734_v11 = vrot.slane %v2733_v38, 1 }
 0x5c5   : > { %v2728_v9 = vrot.slane %v2727_v39, 1  ;;  %v2740_v10 = vrot.slane %v2739_v3, 1 }
 0x5c6   : > { %v2723_v12 = vadd.f32 %v2722_v40, %v2721_v41  ;;  %v2735_v13 = vadd.f32 %v2734_v11, %v2733_v38 }
 0x5c7   : > { %v2729_v14 = vadd.f32 %v2728_v9, %v2727_v39  ;;  %v2741_v15 = vadd.f32 %v2740_v10, %v2739_v3 }
 0x5c8   : > { %v2766_v16 = vmul.f32 0.125, %v2723_v12  ;;  %v2768_v17 = vmul.f32 0.125, %v2735_v13 }
 0x5c9   : > { %v2767_v18 = vmul.f32 0.125, %v2729_v14  ;;  %v2769_v19 = vmul.f32 0.125, %v2741_v15 }
 0x5ca   : > { %v6758_v60 = vsub.f32 %v2287_v7, %v2766_v16  ;;  %v6760_v61 = vsub.f32 %v2429_v50, %v2768_v17 }
 0x5cb   : > { %v6762_v62 = vsub.f32 %v2289_v53, %v2767_v18  ;;  %v6764_v0 = vsub.f32 %v2431_v54, %v2769_v19 }
 0x5cc   : > { %v2782_v1 = vmul.f32 %v6758_v60, %v6758_v60  ;;  %v2784_v20 = vmul.f32 %v6760_v61, %v6760_v61 }
 0x5cd   : > { %v2783_v21 = vmul.f32 %v6762_v62, %v6762_v62  ;;  %v2785_v22 = vmul.f32 %v6764_v0, %v6764_v0 }
 0x5ce   : > { %v2790_v23 = vrot.slane %v2782_v1, 4  ;;  %v2802_v24 = vrot.slane %v2784_v20, 4 }
 0x5cf   : > { %v2796_v25 = vrot.slane %v2783_v21, 4  ;;  %v2808_v26 = vrot.slane %v2785_v22, 4 }
 0x5d0   : > { %v2791_v27 = vadd.f32 %v2790_v23, %v2782_v1  ;;  %v2803_v63 = vadd.f32 %v2802_v24, %v2784_v20 }
 0x5d1   : > { %v2797_v28 = vadd.f32 %v2796_v25, %v2783_v21  ;;  %v2809_v29 = vadd.f32 %v2808_v26, %v2785_v22 }
 0x5d2   : > { %v2792_v30 = vrot.slane %v2791_v27, 2  ;;  %v2804_v32 = vrot.slane %v2803_v63, 2 }
 0x5d3   : > { %v2798_v33 = vrot.slane %v2797_v28, 2  ;;  %v2810_v35 = vrot.slane %v2809_v29, 2 }
 0x5d4   : > { %v2793_v42 = vadd.f32 %v2792_v30, %v2791_v27  ;;  %v2805_v44 = vadd.f32 %v2804_v32, %v2803_v63 }
 0x5d5   : > { %v2799_v46 = vadd.f32 %v2798_v33, %v2797_v28  ;;  %v2811_v47 = vadd.f32 %v2810_v35, %v2809_v29 }
 0x5d6   : > { %v2794_v48 = vrot.slane %v2793_v42, 1  ;;  %v2806_v49 = vrot.slane %v2805_v44, 1 }
 0x5d7   : > { %v2800_v7 = vrot.slane %v2799_v46, 1  ;;  %v2812_v50 = vrot.slane %v2811_v47, 1 }
 0x5d8   : > { %v2795_v51 = vadd.f32 %v2794_v48, %v2793_v42  ;;  %v2807_v52 = vadd.f32 %v2806_v49, %v2805_v44 }
 0x5d9   : > { %v2801_v53 = vadd.f32 %v2800_v7, %v2799_v46  ;;  %v2813_v54 = vadd.f32 %v2812_v50, %v2811_v47 }
 0x5da   : > { %v2838_v55 = vmul.f32 0.125, %v2795_v51  ;;  %v2840_v56 = vmul.f32 0.125, %v2807_v52 }
 0x5db   : > { %v2839_v57 = vmul.f32 0.125, %v2801_v53  ;;  %v2841_v58 = vmul.f32 0.125, %v2813_v54 }
 0x5dc   : > { %v2847_v59 = vadd.f32 1e-05, %v2838_v55  ;;  %v2849_v2 = vadd.f32 1e-05, %v2840_v56 }
 0x5dd   : > { %v2848_v4 = vadd.f32 1e-05, %v2839_v57  ;;  %v2850_v8 = vadd.f32 1e-05, %v2841_v58 }
 0x5de   : > { %5772 = vrsqrt.f32 %v2847_v59 }
 0x5df   : > { %5774 = vrsqrt.f32 %v2849_v2 }
 0x5e0   : > { %5776 = vrsqrt.f32 %v2848_v4 }
 0x5e1   : > { %5778 = vrsqrt.f32 %v2850_v8 }
 0x5e8   : > { %v5773_v5 = vpop.eup %5772 }
 0x5e9   : > { %v5775_v6 = vpop.eup %5774 }
 0x5ea   : > { %v5777_v41 = vpop.eup %5776 }
 0x5eb   : > { %v5779_v38 = vpop.eup %5778  ;;  %v2871_v39 = vcombine.low %v5773_v5, %v5777_v41 }
 0x5ec   : > { %v2872_v3 = vcombine.low %v5775_v6, %v5779_v38 }
 0x5ed   : > { %v6775_v40 = vrot.slane %v2871_v39, %v6661_v31 }
 0x5ee   : > { %v6778_v11 = vrot.slane %v2872_v3, %v6661_v31 }
 0x5f0   : > { %v2903_v9 = vcombine.low %v6775_v40, %v6778_v11 }
 0x63b   : > { %v2571_v10 = vpop.f32.mrb[6].mxu0 }
 0x63c   : > { %v2742_v12 = vrot.slane %v2571_v10, 4  ;;  %v2713_v13 = vpop.f32.mrb[6].mxu1  ;;  %v2573_v14 = vpop.f32.mrb[7].mxu0 }
 0x63d   : > { %v2754_v15 = vrot.slane %v2713_v13, 4  ;;  %v2748_v16 = vrot.slane %v2573_v14, 4  ;;  %v2715_v17 = vpop.f32.mrb[7].mxu1 }
 0x63e   : > { %v2743_v18 = vadd.f32 %v2742_v12, %v2571_v10  ;;  %v2760_v19 = vrot.slane %v2715_v17, 4 }
 0x63f   : > { %v2755_v1 = vadd.f32 %v2754_v15, %v2713_v13  ;;  %v2749_v20 = vadd.f32 %v2748_v16, %v2573_v14 }
 0x640   : > { %v2744_v21 = vrot.slane %v2743_v18, 2  ;;  %v2761_v22 = vadd.f32 %v2760_v19, %v2715_v17 }
 0x641   : > { %v2756_v23 = vrot.slane %v2755_v1, 2  ;;  %v2750_v24 = vrot.slane %v2749_v20, 2 }
 0x642   : > { %v2745_v25 = vadd.f32 %v2744_v21, %v2743_v18  ;;  %v2762_v26 = vrot.slane %v2761_v22, 2 }
 0x643   : > { %v2757_v27 = vadd.f32 %v2756_v23, %v2755_v1  ;;  %v2751_v63 = vadd.f32 %v2750_v24, %v2749_v20 }
 0x644   : > { %v2746_v28 = vrot.slane %v2745_v25, 1  ;;  %v2763_v29 = vadd.f32 %v2762_v26, %v2761_v22 }
 0x645   : > { %v2758_v30 = vrot.slane %v2757_v27, 1  ;;  %v2752_v32 = vrot.slane %v2751_v63, 1 }
 0x646   : > { %v2747_v33 = vadd.f32 %v2746_v28, %v2745_v25  ;;  %v2764_v35 = vrot.slane %v2763_v29, 1 }
 0x647   : > { %v2759_v42 = vadd.f32 %v2758_v30, %v2757_v27  ;;  %v2753_v44 = vadd.f32 %v2752_v32, %v2751_v63 }
 0x648   : > { %v2770_v46 = vmul.f32 0.125, %v2747_v33  ;;  %v2765_v47 = vadd.f32 %v2764_v35, %v2763_v29 }
 0x649   : > { %v2772_v48 = vmul.f32 0.125, %v2759_v42  ;;  %v2771_v49 = vmul.f32 0.125, %v2753_v44 }
 0x64a   : > { %v6782_v7 = vsub.f32 %v2571_v10, %v2770_v46  ;;  %v2773_v50 = vmul.f32 0.125, %v2765_v47 }
 0x64b   : > { %v6784_v51 = vsub.f32 %v2713_v13, %v2772_v48  ;;  %v6786_v52 = vsub.f32 %v2573_v14, %v2771_v49  ;;  %v2972_v49 = vld [vmem:[#allocation17 + $0x1] ss:$2 sm:$0xff] }
 0x64c   : > { %v2786_v53 = vmul.f32 %v6782_v7, %v6782_v7  ;;  %v6790_v54 = vsub.f32 %v2715_v17, %v2773_v50  ;;  %v2911_v50 = vrot.slane %v2903_v9, %v6661_v31 }
 0x64d   : > { %v2788_v55 = vmul.f32 %v6784_v51, %v6784_v51  ;;  %v2787_v56 = vmul.f32 %v6786_v52, %v6786_v52 }
 0x64e   : > { %v2814_v57 = vrot.slane %v2786_v53, 4  ;;  %v2789_v58 = vmul.f32 %v6790_v54, %v6790_v54 }
 0x64f   : > { %v2826_v59 = vrot.slane %v2788_v55, 4  ;;  %v2820_v2 = vrot.slane %v2787_v56, 4 }
 0x650   : > { %v2815_v4 = vadd.f32 %v2814_v57, %v2786_v53  ;;  %v2832_v8 = vrot.slane %v2789_v58, 4 }
 0x651   : > { %v2827_v5 = vadd.f32 %v2826_v59, %v2788_v55  ;;  %v2821_v6 = vadd.f32 %v2820_v2, %v2787_v56  ;;  %v2846_v55 = vld [vmem:[#allocation17] ss:$2 sm:$0xff]  ;;  %v2941_v56 = vsub.s32 4, %v6654_v43  ;;  %v2949_v59 = vsub.s32 6, %v6654_v43 }
 0x652   : > { %v2816_v41 = vrot.slane %v2815_v4, 2  ;;  %v2833_v38 = vadd.f32 %v2832_v8, %v2789_v58  ;;  %v2945_v58 = vsub.s32 5, %v6654_v43  ;;  %v2977_v2 = vrot.slane %v2972_v49, %v6657_v45 }
 0x653   : > { %v2828_v39 = vrot.slane %v2827_v5, 2  ;;  %v2822_v3 = vrot.slane %v2821_v6, 2  ;;  %v2981_v8 = vrot.slane %v2972_v49, %v6666_v37  ;;  %v2993_v40 = vrot.slane %v2972_v49, %v2941_v56 }
 0x654   : > { %v2817_v10 = vadd.f32 %v2816_v41, %v2815_v4  ;;  %v2834_v12 = vrot.slane %v2833_v38, 2  ;;  %v2953_v4 = vsub.s32 7, %v6654_v43  ;;  %v2997_v9 = vrot.slane %v2972_v49, %v2945_v58 }
 0x655   : > { %v2829_v13 = vadd.f32 %v2828_v39, %v2827_v5  ;;  %v2823_v14 = vadd.f32 %v2822_v3, %v2821_v6  ;;  %v2989_v5 = vrot.slane %v2972_v49, %v6708_v34  ;;  %v2985_v6 = vrot.slane %v2972_v49, %v6711_v36 }
 0x656   : > { %v2818_v15 = vrot.slane %v2817_v10, 1  ;;  %v2835_v16 = vadd.f32 %v2834_v12, %v2833_v38  ;;  %v3005_v41 = vrot.slane %v2972_v49, %v2953_v4 }
 0x657   : > { %v2830_v17 = vrot.slane %v2829_v13, 1  ;;  %v2824_v18 = vrot.slane %v2823_v14, 1 }
 0x658   : > { %v2819_v19 = vadd.f32 %v2818_v15, %v2817_v10  ;;  %v2836_v1 = vrot.slane %v2835_v16, 1 }
 0x659   : > { %v2831_v20 = vadd.f32 %v2830_v17, %v2829_v13  ;;  %v2825_v21 = vadd.f32 %v2824_v18, %v2823_v14 }
 0x65a   : > { %v2842_v22 = vmul.f32 0.125, %v2819_v19  ;;  %v2837_v23 = vadd.f32 %v2836_v1, %v2835_v16 }
 0x65b   : > { %v2844_v24 = vmul.f32 0.125, %v2831_v20  ;;  %v2843_v25 = vmul.f32 0.125, %v2825_v21 }
 0x65c   : > { %v2851_v26 = vadd.f32 1e-05, %v2842_v22  ;;  %v2845_v27 = vmul.f32 0.125, %v2837_v23 }
 0x65d   : > { %v2853_v63 = vadd.f32 1e-05, %v2844_v24  ;;  %v2852_v28 = vadd.f32 1e-05, %v2843_v25 }
 0x65e   : > { %5780 = vrsqrt.f32 %v2851_v26  ;;  %v2854_v29 = vadd.f32 1e-05, %v2845_v27 }
 0x65f   : > { %5782 = vrsqrt.f32 %v2853_v63 }
 0x660   : > { %5784 = vrsqrt.f32 %v2852_v28 }
 0x661   : > { %5786 = vrsqrt.f32 %v2854_v29 }
 0x668   : > { %v5781_v30 = vpop.eup %5780 }
 0x669   : > { %v5783_v32 = vpop.eup %5782 }
 0x66a   : > { %v5785_v33 = vpop.eup %5784 }
 0x66b   : > { %v5787_v35 = vpop.eup %5786  ;;  %v2873_v42 = vcombine.low %v5781_v30, %v5785_v33 }
 0x66c   : > { %v2874_v44 = vcombine.low %v5783_v32, %v5787_v35 }
 0x66d   : > { %v2895_v46 = vrot.slane %v2873_v42, %v6661_v31 }
 0x66e   : > { %v2902_v47 = vrot.slane %v2874_v44, %v6661_v31 }
 0x670   : > { %v2904_v48 = vcombine.low %v2895_v46, %v2902_v47 }
 0x672   : > { %v2918_v53 = vrot.slane %v2904_v48, %v6661_v31  ;;  %v3001_v31 = vrot.slane %v2972_v49, %v2949_v59 }
 0x674   : > { %v2919_v57 = vcombine.low %v2911_v50, %v2918_v53 }
 0x676   : > { %v2921_v11 = vmul.f32 %v2919_v57, %v2846_v55 }
 0x678   : > { %v2926_v38 = vrot.slane %v2921_v11, %v6657_v45  ;;  %v2930_v39 = vrot.slane %v2921_v11, %v6666_v37  ;;  %v2934_v3 = vrot.slane %v2921_v11, %v6711_v36  ;;  %v2938_v10 = vrot.slane %v2921_v11, %v6708_v34 }
 0x679   : > { %v2942_v43 = vrot.slane %v2921_v11, %v2941_v56  ;;  %v2946_v12 = vrot.slane %v2921_v11, %v2945_v58  ;;  %v2950_v13 = vrot.slane %v2921_v11, %v2949_v59  ;;  %v2954_v14 = vrot.slane %v2921_v11, %v2953_v4 }
 0x67a   : > { %v2963_v15 = vmul.f32 %v2926_v38, %v6758_v60  ;;  %v2964_v16 = vmul.f32 %v2930_v39, %v6762_v62  ;;  %v2965_v17 = vmul.f32 %v2934_v3, %v6760_v61  ;;  %v2966_v18 = vmul.f32 %v2938_v10, %v6764_v0 }
 0x67b   : > { %v2967_v45 = vmul.f32 %v2942_v43, %v6782_v7  ;;  %v2968_v37 = vmul.f32 %v2946_v12, %v6786_v52  ;;  %v2969_v36 = vmul.f32 %v2950_v13, %v6784_v51  ;;  %v2970_v34 = vmul.f32 %v2954_v14, %v6790_v54 }
 0x67c   : > { %v3014_v19 = vadd.f32 %v2977_v2, %v2963_v15  ;;  %v3015_v1 = vadd.f32 %v2981_v8, %v2964_v16  ;;  %v3016_v20 = vadd.f32 %v2985_v6, %v2965_v17  ;;  %v3017_v21 = vadd.f32 %v2989_v5, %v2966_v18 }
 0x67d   : > { %v3018_v22 = vadd.f32 %v2993_v40, %v2967_v45  ;;  %v3019_v60 = vadd.f32 %v2997_v9, %v2968_v37  ;;  %v3020_v23 = vadd.f32 %v3001_v31, %v2969_v36  ;;  %v3021_v62 = vadd.f32 %v3005_v41, %v2970_v34 }
 0x67e   : > { %v3022_v24 = vmax.f32 %v3014_v19, 0.0  ;;  %v3023_v61 = vmax.f32 %v3015_v1, 0.0  ;;  %v3024_v25 = vmax.f32 %v3016_v20, 0.0  ;;  %v3025_v0 = vmax.f32 %v3017_v21, 0.0 }
 0x67f   : > { %v3026_v26 = vmax.f32 %v3018_v22, 0.0  ;;  %v3027_v7 = vmax.f32 %v3019_v60, 0.0  ;;  %v3028_v27 = vmax.f32 %v3020_v23, 0.0  ;;  %v3029_v52 = vmax.f32 %v3021_v62, 0.0 }
 0x680   : > { %3030 = vst [vmem:[#allocation2] sm:$0xff] %v3022_v24  ;;  %3031 = vst [vmem:[#allocation2 + $0x8] sm:$0xff] %v3023_v61 }
 0x681   : > { %3032 = vst [vmem:[#allocation2 + $0x10] sm:$0xff] %v3024_v25  ;;  %3033 = vst [vmem:[#allocation2 + $0x18] sm:$0xff] %v3025_v0 }
 0x682   : > { %3034 = vst [vmem:[#allocation2 + $0x20] sm:$0xff] %v3026_v26  ;;  %3035 = vst [vmem:[#allocation2 + $0x28] sm:$0xff] %v3027_v7 }
 0x683   : > { %3036 = vst [vmem:[#allocation2 + $0x30] sm:$0xff] %v3028_v27  ;;  %3037 = vst [vmem:[#allocation2 + $0x38] sm:$0xff] %v3029_v52 }
 0x684 PF: > { %v4103_v51 = vld [vmem:[%s6642_s30 + $0x40] sm:$0xff]   ;;  %v4104_v29 = vld [vmem:[%s6642_s30 + $0x48] sm:$0xff]   ;;  %v4105_v35 = vld [vmem:[%s6642_s30 + $0x50] sm:$0xff]   ;;  %s3818_s14 = sshll.u32 %s6298_s23, 7  ;;  %s3610_s27 = sshll.u32 %s6650_s12, 4  ;;  %s6898_s27 = int_to_ptr.vmem [resolvable:$true] %s3610_s27 }
 0x685   : > { %v3838_v54 = vld [vmem:[%s6642_s30] sm:$0xff]   ;;  %5012 = vmatprep.subr.bf16.mxu0 %v4103_v51  ;;  %v4120_v30 = vld [vmem:[%s6642_s30 + $0xc8] sm:$0xff]   ;;  %v4121_v42 = vld [vmem:[%s6642_s30 + $0xd0] sm:$0xff]   ;;  %s7019_s28 = sld [smem:[#allocation40_spill]]  ;;  %s3597_s22 = scalar_lea.sflag [#allocation5], %s6639_s26 }
 0x686   : > { %v4119_v63 = vld [vmem:[%s6642_s30 + $0xc0] sm:$0xff]   ;;  %5014 = vmatpush3.bf16.msra.mxu0 %v3838_v54  ;;  %v4096_v32 = vld [vmem:[%s6642_s30 + $0x8] sm:$0xff]   ;;  %v4097_v44 = vld [vmem:[%s6642_s30 + $0x10] sm:$0xff]   ;;  %s6104_s1 = scalar_lea.vmem %s6898_s27, 128  ;;  %p7020_p10 = scmp.ne.s32.totalorder %s6992_s24, 0 }
 0x687   : > { %5044 = vmatprep.subr.bf16.mxu1 %v4119_v63  ;;  %v4111_v28 = vld [vmem:[%s6642_s30 + $0x80] sm:$0xff]   ;;  %5016 = vmatprep.subr.bf16.mxu0 %v4104_v29  ;;  %v4112_v33 = vld [vmem:[%s6642_s30 + $0x88] sm:$0xff]   ;;  %v4113_v46 = vld [vmem:[%s6642_s30 + $0x90] sm:$0xff]   ;;  %p6105_p11 = scmp.ne.s32.totalorder %s6898_s27, %s6104_s1  ;;  %s6216_s23 = smov [#allocation21]  }
 0x688   : > { %5046 = vmatpush3.bf16.msra.mxu1 %v4111_v28  ;;  %v4106_v47 = vld [vmem:[%s6642_s30 + $0x58] sm:$0xff]   ;;  %v3039_v49 = vld [vmem:[#allocation2 + $0x8] sm:$0xff]  ;;  %v4109_v40 = vld [vmem:[%s6642_s30 + $0x70] sm:$0xff]   ;;  %s6108_s13 = sshll.u32 %s6216_s23, 4  ;;  %s6109_s13 = int_to_ptr.vmem [resolvable:$false] %s6108_s13 }
 0x689   : > { %5048 = vmatprep.subr.bf16.mxu1 %v4120_v30  ;;  %v4122_v48 = vld [vmem:[%s6642_s30 + $0xd8] sm:$0xff]   ;;  %v4107_v56 = vld [vmem:[%s6642_s30 + $0x60] sm:$0xff]   ;;  %3373 = vmatprep.mubr.f32.mxu0 %v3039_v49  ;;  %v4108_v2 = vld [vmem:[%s6642_s30 + $0x68] sm:$0xff]   ;;  %p6106_p0 = pnand %p6105_p11, %p7020_p10  ;;  %s6110_s5 = scalar_lea.vmem %s6109_s13, 256 }
 0x68a   : > { %5018 = vmatpush3.bf16.msra.mxu0 %v4096_v32  ;;  %v4098_v50 = vld [vmem:[%s6642_s30 + $0x18] sm:$0xff]   ;;  %v4123_v57 = vld [vmem:[%s6642_s30 + $0xe0] sm:$0xff]   ;;  %v4124_v4 = vld [vmem:[%s6642_s30 + $0xe8] sm:$0xff]   ;;  %p6111_p4 = scmp.lt.s32.totalorder %s6898_s27, %s6109_s13  ;;  %p6112_p12 = scmp.lt.s32.totalorder %s6110_s5, %s6104_s1 }
 0x68b   : > { %5020 = vmatprep.subr.bf16.mxu0 %v4105_v35  ;;  %v4114_v53 = vld [vmem:[%s6642_s30 + $0x98] sm:$0xff]   ;;  %v4099_v58 = vld [vmem:[%s6642_s30 + $0x20] sm:$0xff]   ;;  %v4100_v8 = vld [vmem:[%s6642_s30 + $0x28] sm:$0xff]   ;;  %s6896_s9 = scalar_lea.hbm %s7019_s28, %s3818_s14  ;;  %p6107_p9 = pneg %p6106_p0 }
 0x68c   : > { %5050 = vmatpush3.bf16.msra.mxu1 %v4112_v33  ;;  %v3041_v55 = vld [vmem:[#allocation2 + $0x18] sm:$0xff]  ;;  %v4115_v59 = vld [vmem:[%s6642_s30 + $0xa0] sm:$0xff]   ;;  %v4116_v5 = vld [vmem:[%s6642_s30 + $0xa8] sm:$0xff]   ;;  %p6113_p13 = por %p6112_p12, %p6111_p4 }
 0x68d   : > { %5052 = vmatprep.subr.bf16.mxu1 %v4121_v42  ;;  %3443 = vmatprep.mubr.f32.mxu1 %v3041_v55  ;;  %v4125_v11 = vld [vmem:[%s6642_s30 + $0xf0] sm:$0xff]   ;;  %v4110_v6 = vld [vmem:[%s6642_s30 + $0x78] sm:$0xff]   ;;  %v4135_v3 = vld [vmem:[%s6642_s30 + $0x140] sm:$0xff]  }
 0x68e   : > { %5022 = vmatpush3.bf16.msra.mxu0 %v4097_v44  ;;  %v4101_v9 = vld [vmem:[%s6642_s30 + $0x30] sm:$0xff]   ;;  %v4126_v41 = vld [vmem:[%s6642_s30 + $0xf8] sm:$0xff]   ;;  %v4151_v10 = vld [vmem:[%s6642_s30 + $0x1c0] sm:$0xff]   ;;  %p6114_p1 = pnand %p6113_p13, %p6107_p9 }
 0x68f   : > { %5024 = vmatprep.subr.bf16.mxu0 %v4106_v47  ;;  %v4117_v31 = vld [vmem:[%s6642_s30 + $0xb0] sm:$0xff]   ;;  %v4102_v38 = vld [vmem:[%s6642_s30 + $0x38] sm:$0xff]   ;;  %v4127_v13 = vld [vmem:[%s6642_s30 + $0x100] sm:$0xff]  }
 0x690   : > { %5054 = vmatpush3.bf16.msra.mxu1 %v4113_v46  ;;  %v4118_v39 = vld [vmem:[%s6642_s30 + $0xb8] sm:$0xff]   ;;  %v3040_v12 = vld [vmem:[#allocation2 + $0x10] sm:$0xff]  ;;  %v4143_v14 = vld [vmem:[%s6642_s30 + $0x180] sm:$0xff]  }
 0x691   : > { %5056 = vmatprep.subr.bf16.mxu1 %v4122_v48  ;;  %v3038_v43 = vld [vmem:[#allocation2] sm:$0xff]  ;;  %v4136_v15 = vld [vmem:[%s6642_s30 + $0x148] sm:$0xff]   ;;  %v3045_v18 = vld [vmem:[#allocation2 + $0x38] sm:$0xff] }
 0x692   : > { %5026 = vmatpush3.bf16.msra.mxu0 %v4098_v50  ;;  %v4152_v16 = vld [vmem:[%s6642_s30 + $0x1c8] sm:$0xff]   ;;  %v4137_v36 = vld [vmem:[%s6642_s30 + $0x150] sm:$0xff]   ;;  %v4138_v20 = vld [vmem:[%s6642_s30 + $0x158] sm:$0xff]  }
 0x693   : > { %5028 = vmatprep.subr.bf16.mxu0 %v4107_v56  ;;  %v3043_v17 = vld [vmem:[#allocation2 + $0x28] sm:$0xff]  ;;  %v4153_v34 = vld [vmem:[%s6642_s30 + $0x1d0] sm:$0xff]   ;;  %v4154_v21 = vld [vmem:[%s6642_s30 + $0x1d8] sm:$0xff]  }
 0x694   : > { %5058 = vmatpush3.bf16.msra.mxu1 %v4114_v53  ;;  %v4128_v45 = vld [vmem:[%s6642_s30 + $0x108] sm:$0xff]   ;;  %v4129_v19 = vld [vmem:[%s6642_s30 + $0x110] sm:$0xff]   ;;  %v4130_v22 = vld [vmem:[%s6642_s30 + $0x118] sm:$0xff]  }
 0x695   : > { %5060 = vmatprep.subr.bf16.mxu1 %v4123_v57  ;;  %v4144_v37 = vld [vmem:[%s6642_s30 + $0x188] sm:$0xff]   ;;  %v4145_v1 = vld [vmem:[%s6642_s30 + $0x190] sm:$0xff]   ;;  %v4146_v60 = vld [vmem:[%s6642_s30 + $0x198] sm:$0xff]  }
 0x696   : > { %5030 = vmatpush3.bf16.msra.mxu0 %v4099_v58  ;;  %v4139_v23 = vld [vmem:[%s6642_s30 + $0x160] sm:$0xff]   ;;  %v4140_v25 = vld [vmem:[%s6642_s30 + $0x168] sm:$0xff]   ;;  %v4141_v27 = vld [vmem:[%s6642_s30 + $0x170] sm:$0xff]  }
 0x697   : > { %5032 = vmatprep.subr.bf16.mxu0 %v4108_v2  ;;  %v4155_v62 = vld [vmem:[%s6642_s30 + $0x1e0] sm:$0xff]   ;;  %v4156_v0 = vld [vmem:[%s6642_s30 + $0x1e8] sm:$0xff]   ;;  %v4157_v52 = vld [vmem:[%s6642_s30 + $0x1f0] sm:$0xff]  }
 0x698   : > { %5062 = vmatpush3.bf16.msra.mxu1 %v4115_v59  ;;  %v4131_v24 = vld [vmem:[%s6642_s30 + $0x120] sm:$0xff]   ;;  %v4132_v26 = vld [vmem:[%s6642_s30 + $0x128] sm:$0xff]   ;;  %v4133_v51 = vld [vmem:[%s6642_s30 + $0x130] sm:$0xff]  }
 0x699   : > { %5064 = vmatprep.subr.bf16.mxu1 %v4124_v4  ;;  %v4147_v61 = vld [vmem:[%s6642_s30 + $0x1a0] sm:$0xff]   ;;  %v4148_v7 = vld [vmem:[%s6642_s30 + $0x1a8] sm:$0xff]   ;;  %v4149_v54 = vld [vmem:[%s6642_s30 + $0x1b0] sm:$0xff]  }
 0x69a   : > { %5034 = vmatpush3.bf16.msra.mxu0 %v4100_v8  ;;  %v4142_v63 = vld [vmem:[%s6642_s30 + $0x178] sm:$0xff]   ;;  %v3044_v33 = vld [vmem:[#allocation2 + $0x30] sm:$0xff] }
 0x69b   : > { %5036 = vmatprep.subr.bf16.mxu0 %v4109_v40  ;;  %v4158_v28 = vld [vmem:[%s6642_s30 + $0x1f8] sm:$0xff]  }
 0x69c   : > { %5066 = vmatpush3.bf16.msra.mxu1 %v4116_v5  ;;  %v4134_v29 = vld [vmem:[%s6642_s30 + $0x138] sm:$0xff]  }
 0x69d   : > { %5068 = vmatprep.subr.bf16.mxu1 %v4125_v11  ;;  %v4150_v30 = vld [vmem:[%s6642_s30 + $0x1b8] sm:$0xff]  }
 0x69e   : > { %5038 = vmatpush3.bf16.msra.mxu0 %v4101_v9  ;;  %v3042_v32 = vld [vmem:[#allocation2 + $0x20] sm:$0xff] }
 0x69f   : > { %5040 = vmatprep.subr.bf16.mxu0 %v4110_v6  ;;  %v3815_v44 = vld [vmem:[%s513_s10] ss:$0 sm:$0xff] }
 0x6a0   : > { %5070 = vmatpush3.bf16.msra.mxu1 %v4117_v31 }
 0x6a1   : > { %5072 = vmatprep.subr.bf16.mxu1 %v4126_v41 }
 0x6a2   : > { %5042 = vmatpush3.bf16.msra.mxu0 %v4102_v38 }
 0x6a3   : > { %5076 = vmatprep.subr.bf16.mxu0 %v4135_v3 }
 0x6a4   : > { %5074 = vmatpush3.bf16.msra.mxu1 %v4118_v39 }
 0x6a5   : > { %5108 = vmatprep.subr.bf16.mxu1 %v4151_v10  ;;  %3374 = vmatmul.mubr.f32.vlgmr.msra.gmra.mrb[0].mxu0 %v3038_v43 }
 0x6a6   : > { %5078 = vmatpush3.bf16.msra.mxu0 %v4127_v13  ;;  %3513 = vmatprep.mubr.f32.mxu0 %v3043_v17 }
 0x6a7   : > { %3444 = vmatmul.mubr.f32.vlgmr.msra.gmra.mrb[0].mxu1 %v3040_v12  ;;  %5080 = vmatprep.subr.bf16.mxu0 %v4136_v15 }
 0x6a8   : > { %5110 = vmatpush3.bf16.msra.mxu1 %v4143_v14  ;;  %3583 = vmatprep.mubr.f32.mxu1 %v3045_v18 }
 0x6a9   : > { %5112 = vmatprep.subr.bf16.mxu1 %v4152_v16 }
 0x6aa   : > { %5082 = vmatpush3.bf16.msra.mxu0 %v4128_v45 }
 0x6ab   : > { %5084 = vmatprep.subr.bf16.mxu0 %v4137_v36 }
 0x6ac   : > { %5114 = vmatpush3.bf16.msra.mxu1 %v4144_v37 }
 0x6ad   : > { %5116 = vmatprep.subr.bf16.mxu1 %v4153_v34 }
 0x6ae   : > { %5086 = vmatpush3.bf16.msra.mxu0 %v4129_v19 }
 0x6af   : > { %5088 = vmatprep.subr.bf16.mxu0 %v4138_v20 }
 0x6b0   : > { %5118 = vmatpush3.bf16.msra.mxu1 %v4145_v1 }
 0x6b1   : > { %5120 = vmatprep.subr.bf16.mxu1 %v4154_v21 }
 0x6b2   : > { %5090 = vmatpush3.bf16.msra.mxu0 %v4130_v22 }
 0x6b3   : > { %5092 = vmatprep.subr.bf16.mxu0 %v4139_v23 }
 0x6b4   : > { %5122 = vmatpush3.bf16.msra.mxu1 %v4146_v60 }
 0x6b5   : > { %5124 = vmatprep.subr.bf16.mxu1 %v4155_v62 }
 0x6b6   : > { %5094 = vmatpush3.bf16.msra.mxu0 %v4131_v24 }
 0x6b7   : > { %5096 = vmatprep.subr.bf16.mxu0 %v4140_v25 }
 0x6b8   : > { %5126 = vmatpush3.bf16.msra.mxu1 %v4147_v61 }
 0x6b9   : > { %5128 = vmatprep.subr.bf16.mxu1 %v4156_v0 }
 0x6ba   : > { %5098 = vmatpush3.bf16.msra.mxu0 %v4132_v26 }
 0x6bb   : > { %5100 = vmatprep.subr.bf16.mxu0 %v4141_v27 }
 0x6bc   : > { %5130 = vmatpush3.bf16.msra.mxu1 %v4148_v7 }
 0x6bd   : > { %5132 = vmatprep.subr.bf16.mxu1 %v4157_v52 }
 0x6be   : > { %5102 = vmatpush3.bf16.msra.mxu0 %v4133_v51 }
 0x6bf   : > { %5104 = vmatprep.subr.bf16.mxu0 %v4142_v63 }
 0x6c0   : > { %5134 = vmatpush3.bf16.msra.mxu1 %v4149_v54 }
 0x6c1   : > { %5136 = vmatprep.subr.bf16.mxu1 %v4158_v28 }
 0x6c2   : > { %5106 = vmatpush3.bf16.msra.mxu0 %v4134_v29 }
 0x6c4   : > { %5138 = vmatpush3.bf16.msra.mxu1 %v4150_v30 }
 0x6c5   : > { %3514 = vmatmul.mubr.f32.vlgmr.msra.gmra.mrb[2].mxu0 %v3042_v32 }
 0x6c7   : > { %3584 = vmatmul.mubr.f32.vlgmr.msra.gmra.mrb[2].mxu1 %v3044_v33 }
 0x778   : > { %v4200_v35 = vpop.f32.mrb[0].mxu0 }
 0x779   : > { %v4201_v46 = vpop.f32.mrb[1].mxu0 }
 0x77a   : > { %v4235_v42 = vpop.f32.mrb[0].mxu1  ;;  %v4202_v48 = vadd.f32 %v4201_v46, %v4200_v35 }
 0x77b   : > { %v4236_v47 = vpop.f32.mrb[1].mxu1 }
 0x77c   : > { %v4237_v49 = vadd.f32 %v4236_v47, %v4235_v42  ;;  %v3376_v50 = vadd.f32 %v4202_v48, %v3815_v44 }
 0x77e   : > { %v3446_v53 = vadd.f32 %v4237_v49, %v3376_v50 }
 0x798   : > { %v4270_v55 = vpop.f32.mrb[2].mxu0 }
 0x799   : > { %v4271_v57 = vpop.f32.mrb[3].mxu0 }
 0x79a   : > { %v4305_v56 = vpop.f32.mrb[2].mxu1  ;;  %v4272_v59 = vadd.f32 %v4271_v57, %v4270_v55 }
 0x79b   : > { %v4306_v58 = vpop.f32.mrb[3].mxu1 }
 0x79c   : > { %v4307_v2 = vadd.f32 %v4306_v58, %v4305_v56  ;;  %v3516_v4 = vadd.f32 %v4272_v59, %v3446_v53 }
 0x79e   : > { %v3586_v8 = vadd.f32 %v4307_v2, %v3516_v4 }
 0x7a0   : > { %v3816_v5 = vmul.f32 -1.442695, %v3586_v8 }
 0x7a2   : > { %5788 = vpow2.f32 %v3816_v5 }
 0x7ac   : > { %v5789_v40 = vpop.eup %5788 }
 0x7ad   : > { %v3592_v11 = vadd.f32 1.0, %v5789_v40 }
 0x7af   : > { %5790 = vrcp.f32 %v3592_v11 }
 0x7b9   : > { %v5791_v9 = vpop.eup %5790 }
 0x7ba   : > { %3595 = vst [vmem:[%s6650_s12] sm:$0xff] %v5791_v9 }
 0x7bb   : > { %6117 = shalt.err (!%p6114_p1)
}
 0x7bc   : > { %s6118_s17 = scalar_lea.hbm %s6896_s9, 128  ;;  %s6122_s26 = scalar_lea.hbm %s7019_s28, 896 }
 0x7bd   : > { %p6119_p5 = scmp.ne.s32.totalorder %s6896_s9, %s6118_s17  ;;  %p6123_p2 = scmp.lt.u32.totalorder %s6896_s9, %s7019_s28 }
 0x7be   : > { %p6124_p3 = scmp.lt.u32.totalorder %s6122_s26, %s6118_s17  ;;  %p6126_p11 = scmp.lt.u32.totalorder %s6118_s17, %s6896_s9 }
 0x7bf   : > { %p6120_p7 = pnand %p6119_p5, %p7020_p10 }
 0x7c0   : > { %p6125_p6 = por %p6124_p3, %p6123_p2 }
 0x7c1   : > { %p6121_p8 = pneg %p6120_p7 }
 0x7c2   : > { %p6127_p0 = por %p6126_p11, %p6125_p6 }
 0x7c4   : > { %p6128_p9 = pnand %p6127_p0, %p6121_p8 }
 0x7c6   : > { %6131 = shalt.err (!%p6128_p9)
}
 0x7c7   : > { %5523 = dma.vmem_to_hbm [thread:$0]  (%p7020_p10), %s6898_s27, 128, %s6896_s9, %s3597_s22  }
 0x7c8 PF: > { %s7021_s30 = sld [smem:[#allocation29_spill]]  ;;  %s7022_s16 = sld [smem:[#allocation33_spill]] }
 0x7c9   : > { %p5583_p4 = scmp.ge.s32.totalorder %s6190_s20, 2 }
 0x7ce   : > { %s3622_s10 = sand.u32 1, %s7021_s30   ;;  %p7023_p12 = scmp.ne.s32.totalorder %s7022_s16, 0 }
 0x7cf   : > { %s3623_s12 = scalar_lea.sflag [#allocation5], %s3622_s10 }
 0x7d0   : > { %p5561_p13 = pnand %p5583_p4, %p7023_p12 }
 0x7d2   : > { %6173 = dma.done.wait (!%p5561_p13), %s3623_s12, 128  }
 0x7d3   : > { %6175 = vsyncadd (!%p5561_p13), %s3623_s12, 4294967168  ;;  %s7024_s20 = sld [smem:[#allocation31_spill]]  ;;  %s7025_s14 = sld [smem:[#allocation32_spill]] }
 0x7d4   : > { %s7026_s17 = smov %s6182_s18  ;;  %s7027_s18 = smov %s6186_s19 }
 0x7d9   : > { %p29_p1 = scmp.ge.s32.totalorder %s7024_s20, 9   ;;  %s7028_s19 = smov %s7025_s14 }
 0x7db   :  { %31 = sbr.rel (!%p29_p1) target bundleno = 18 (0x12), region = 164 }
 0x7e2   :  { %3628 = vsyncpa [#allocation4], 1 }
 0x7e3   :  { %3630 = vsyncpa [#allocation4 + $0x1], 1 }
 0x7e4   :  { %3631 = vsyncpa [#allocation7], 1 }
 0x7e5   :  { %3632 = vsyncpa [#allocation10], 1 }
 0x7e6   :  { %3633 = vsyncpa [#allocation13], 1 }
 0x7e7   :  { %3634 = vsyncpa [#allocation16], 1 }
 0x7e8   :  { %3635 = vsyncpa [#allocation19], 1 }
 0x7e9   :  { %3637 = vsyncpa [#allocation19 + $0x1], 1 }
 0x7ea   :  { %3638 = vsyncpa [#allocation5], 1 }
 0x7eb   :  { %3640 = vsyncpa [#allocation5 + $0x1], 1 }

</bundles_post_ra>
